<compile_context>
chip_gen: v6e
topology: v6e:2x2x1
jax: 0.10.0
libtpu: 0.0.40
codegen_flags: <defaults>
</compile_context>

<pallas_src>
import jax
import jax.numpy as jnp
from jax import lax
from jax.experimental import pallas as pl
from jax.experimental.pallas import tpu as pltpu


def _round_up(x, m):
    return ((x + m - 1) // m) * m


BP = 8  # sublane tile: rows per timestep slab (single live batch row, padded)


# ------------------------------ fused kernel -------------------------------- #

def _make_fused_kernel(nlayers, T, HP, OP):
    """All GRU layers + FC head in one kernel invocation.

    Ref order:
      x_p (T*BP, HP),
      per layer: w_ih (HP,3HP), b_ih (1,3HP), w_hh (HP,3HP), b_hh (1,3HP),
      sel (TP, T*BP), fc_w (HP,OP), fc_b (1,OP),
      out (TP, OP),
      scratch: gi (T*BP, 3HP), seq (T*BP, HP)
    """

    def kernel(*refs):
        idx = 0
        x_ref = refs[idx]; idx += 1
        wih, bih, whh, bhh = [], [], [], []
        for _ in range(nlayers):
            wih.append(refs[idx]); bih.append(refs[idx + 1])
            whh.append(refs[idx + 2]); bhh.append(refs[idx + 3])
            idx += 4
        sel_ref = refs[idx]; fcw_ref = refs[idx + 1]; fcb_ref = refs[idx + 2]
        idx += 3
        out_ref = refs[idx]; idx += 1
        gi_scr = refs[idx]; seq_scr = refs[idx + 1]

        # Layer-0 input projection for the WHOLE sequence: one big MXU matmul
        # (independent per timestep -> never sits on the serial chain).
        gi_scr[...] = (
            jnp.dot(x_ref[...], wih[0][...],
                    preferred_element_type=jnp.float32)
            + bih[0][...])

        for layer in range(nlayers):
            not_last = layer + 1 < nlayers
            # Hoisted ref loads: one load per layer, not one per timestep.
            w_hh = whh[layer][...]
            b_hh = bhh[layer][...]
            if not_last:
                w_ih_nxt = wih[layer + 1][...]
                b_ih_nxt = bih[layer + 1][...]
            else:
                w_ih_nxt = None
                b_ih_nxt = None

            def step(t, h_prev):
                off = pl.multiple_of(t * BP, BP)
                gi = gi_scr[pl.ds(off, BP), :]                   # (BP, 3HP)
                gh = jnp.dot(h_prev, w_hh,
                             preferred_element_type=jnp.float32) + b_hh
                # One sigmoid over the contiguous r|z block, then slice.
                rz = jax.nn.sigmoid(gi[:, :2 * HP] + gh[:, :2 * HP])
                r = rz[:, :HP]
                z = rz[:, HP:]
                n = jnp.tanh(gi[:, 2 * HP:] + r * gh[:, 2 * HP:])
                h_new = n + z * (h_prev - n)       # == (1-z)*n + z*h_prev
                if not_last:
                    # Next layer's input projection, interleaved off the
                    # serial critical chain (fills idle MXU slots).  The gi
                    # slot written here was already consumed above, and the
                    # store value depends on that load, so no race.
                    gi_scr[pl.ds(off, BP), :] = (
                        jnp.dot(h_new, w_ih_nxt,
                                preferred_element_type=jnp.float32)
                        + b_ih_nxt)
                else:
                    # Last layer: full (8,128)-aligned slab store; the FC row
                    # is extracted below with a dense selection matmul.
                    seq_scr[pl.ds(off, BP), :] = h_new
                return h_new

            lax.fori_loop(0, T, step, jnp.zeros((BP, HP), jnp.float32),
                          unroll=min(T, 8))

        # FC head on the module's x[:, -1, :]: pick sequence row t*BP (the
        # real batch row) via a 0/1 matmul -> dense (TP, HP), then one
        # (TP,HP)@(HP,OP) matmul, full-tile output store.
        h_last = jnp.dot(sel_ref[...], seq_scr[...],
                         preferred_element_type=jnp.float32)       # (TP, HP)
        out_ref[...] = (
            jnp.dot(h_last, fcw_ref[...], preferred_element_type=jnp.float32)
            + fcb_ref[...]).astype(out_ref.dtype)

    return kernel


# --------------------------- weight preparation ------------------------------ #

def _prep_gate_weight(w, H, HP, in_dim, in_p):
    """torch (3H, in_dim), gate order r,z,n -> lane-dense (in_p, 3*HP)."""
    w = jnp.asarray(w, jnp.float32).reshape(3, H, in_dim)
    w = jnp.transpose(w, (2, 0, 1))                          # (in_dim, 3, H)
    w = jnp.pad(w, ((0, in_p - in_dim), (0, 0), (0, HP - H)))
    return w.reshape(in_p, 3 * HP)


def _prep_gate_bias(b, H, HP):
    b = jnp.asarray(b, jnp.float32).reshape(3, H)
    b = jnp.pad(b, ((0, 0), (0, HP - H)))
    return b.reshape(1, 3 * HP)


# ------------------------------ model forward -------------------------------- #

def gru_model_forward(x, gru_params, fc_w, fc_b):
    """Mirrors: x, _ = self.gru(x); x = x[:, -1, :]; x = self.fc(x)."""
    x = jnp.asarray(x, jnp.float32)
    T, B, F = x.shape
    nlayers = len(gru_params)
    H = gru_params[0][1].shape[1]          # w_hh: (3H, H)
    O = fc_w.shape[0]

    HP = _round_up(max(H, F), 128)         # lane-dense hidden / gate width
    OP = _round_up(O, 128)                 # lane-dense FC output width
    TP = _round_up(T, BP)                  # sublane-dense FC rows

    # x[:, -1, :] (batch_first=False) indexes the LAST BATCH ELEMENT; the GRU
    # is batch-independent, so the other batch rows are dead work and dropped.
    x_sel = x[:, B - 1, :]                                        # (T, F)
    x_sel = jnp.pad(x_sel, ((0, 0), (0, HP - F)))                 # (T, HP)
    x_p = jnp.zeros((T, BP, HP), jnp.float32).at[:, 0, :].set(x_sel)
    x_p = x_p.reshape(T * BP, HP)                                 # (T*BP, HP)

    inputs = [x_p]
    for (w_ih, w_hh, b_ih, b_hh) in gru_params:
        in_dim = w_ih.shape[1]
        inputs.append(_prep_gate_weight(w_ih, H, HP, in_dim, HP))  # (HP, 3HP)
        inputs.append(_prep_gate_bias(b_ih, H, HP))                # (1, 3HP)
        inputs.append(_prep_gate_weight(w_hh, H, HP, H, HP))       # (HP, 3HP)
        inputs.append(_prep_gate_bias(b_hh, H, HP))                # (1, 3HP)

    # 0/1 selection: row t picks sequence row t*BP (the real batch row).
    sel = jnp.zeros((TP, T * BP), jnp.float32)
    sel = sel.at[jnp.arange(T), jnp.arange(T) * BP].set(1.0)

    fcw_p = jnp.pad(jnp.asarray(fc_w, jnp.float32).T,
                    ((0, HP - H), (0, OP - O)))                    # (HP, OP)
    fcb_p = jnp.pad(jnp.asarray(fc_b, jnp.float32), (0, OP - O))[None, :]
    inputs += [sel, fcw_p, fcb_p]

    def full_spec(shape):
        nd = len(shape)
        return pl.BlockSpec(shape, lambda i, _nd=nd: (0,) * _nd)

    kernel = _make_fused_kernel(nlayers, T, HP, OP)

    out = pl.pallas_call(
        kernel,
        out_shape=jax.ShapeDtypeStruct((TP, OP), jnp.float32),
        grid=(1,),
        in_specs=[full_spec(a.shape) for a in inputs],
        out_specs=full_spec((TP, OP)),
        scratch_shapes=[
            pltpu.VMEM((T * BP, 3 * HP), jnp.float32),   # pre-projected gates
            pltpu.VMEM((T * BP, HP), jnp.float32),       # last-layer sequence
        ],
        compiler_params=pltpu.CompilerParams(
            dimension_semantics=("arbitrary",)),
    )(*inputs)

    return out[:T, :O]                                             # (T, lseq)


# ---------------------------- pure-JAX reference ----------------------------- #

def _gru_layer_ref(x, w_ih, w_hh, b_ih, b_hh):
    B = x.shape[1]
    H = w_hh.shape[1]

    def step(h, x_t):
        gi = x_t @ w_ih.T + b_ih
        gh = h @ w_hh.T + b_hh
        i_r, i_z, i_n = jnp.split(gi, 3, axis=-1)
        h_r, h_z, h_n = jnp.split(gh, 3, axis=-1)
        r = jax.nn.sigmoid(i_r + h_r)
        z = jax.nn.sigmoid(i_z + h_z)
        n = jnp.tanh(i_n + r * h_n)
        h_new = (1.0 - z) * n + z * h
        return h_new, h_new

    _, out = lax.scan(step, jnp.zeros((B, H), jnp.float32), x)
    return out


def gru_model_ref(x, gru_params, fc_w, fc_b):
    h = x
    for (w_ih, w_hh, b_ih, b_hh) in gru_params:
        h = _gru_layer_ref(h, w_ih, w_hh, b_ih, b_hh)
    h_last = h[:, -1, :]
    return h_last @ fc_w.T + fc_b


# ----------------------------------- main ------------------------------------ #

if __name__ == "__main__":
    # Small config consistent with the module:
    #   cfg.data.nfeats=4, params.hidden_size=32, params.nlayers=2, cfg.data.lseq=6
    T, B = 8, 2
    NFEATS, HIDDEN, NLAYERS, LSEQ = 4, 32, 2, 6

    key = jax.random.PRNGKey(0)
    k_x, key = jax.random.split(key)
    x = jax.random.normal(k_x, (T, B, NFEATS), jnp.float32)

    # PyTorch-style uniform(-1/sqrt(H), 1/sqrt(H)) init.
    bound = 1.0 / (HIDDEN ** 0.5)
    gru_params = []
    for layer in range(NLAYERS):
        in_dim = NFEATS if layer == 0 else HIDDEN
        k1, k2, k3, k4, key = jax.random.split(key, 5)
        w_ih = jax.random.uniform(k1, (3 * HIDDEN, in_dim), jnp.float32, -bound, bound)
        w_hh = jax.random.uniform(k2, (3 * HIDDEN, HIDDEN), jnp.float32, -bound, bound)
        b_ih = jax.random.uniform(k3, (3 * HIDDEN,), jnp.float32, -bound, bound)
        b_hh = jax.random.uniform(k4, (3 * HIDDEN,), jnp.float32, -bound, bound)
        gru_params.append((w_ih, w_hh, b_ih, b_hh))

    k5, k6, key = jax.random.split(key, 3)
    fc_w = jax.random.uniform(k5, (LSEQ, HIDDEN), jnp.float32, -bound, bound)
    fc_b = jax.random.uniform(k6, (LSEQ,), jnp.float32, -bound, bound)

    fwd = jax.jit(gru_model_forward)
    out = jax.block_until_ready(fwd(x, gru_params, fc_w, fc_b))

    ref = gru_model_ref(x, gru_params, fc_w, fc_b)
    assert out.shape == (T, LSEQ), out.shape
    err = jnp.max(jnp.abs(out - ref))
    assert jnp.allclose(out, ref, atol=2e-5, rtol=2e-5), f"max abs err {err}"

    print("KERNEL_OK")
</pallas_src>

<mosaic_0001>
module attributes {stable_mosaic.version = 11 : i64} {
  func.func @kernel(%arg0: i32, %arg1: memref<64x128xf32, #tpu.memory_space<vmem>>, %arg2: memref<128x384xf32, #tpu.memory_space<vmem>>, %arg3: memref<1x384xf32, #tpu.memory_space<vmem>>, %arg4: memref<128x384xf32, #tpu.memory_space<vmem>>, %arg5: memref<1x384xf32, #tpu.memory_space<vmem>>, %arg6: memref<128x384xf32, #tpu.memory_space<vmem>>, %arg7: memref<1x384xf32, #tpu.memory_space<vmem>>, %arg8: memref<128x384xf32, #tpu.memory_space<vmem>>, %arg9: memref<1x384xf32, #tpu.memory_space<vmem>>, %arg10: memref<8x64xf32, #tpu.memory_space<vmem>>, %arg11: memref<128x128xf32, #tpu.memory_space<vmem>>, %arg12: memref<1x128xf32, #tpu.memory_space<vmem>>, %arg13: memref<8x128xf32, #tpu.memory_space<vmem>>, %arg14: memref<64x384xf32, #tpu.memory_space<vmem>>, %arg15: memref<64x128xf32, #tpu.memory_space<vmem>>) attributes {dimension_semantics = [#tpu.dimension_semantics<arbitrary>], iteration_bounds = array<i64: 1>, scalar_prefetch = 0 : i64, scratch_operands = 2 : i64, tpu.core_type = #tpu.core_type<tc>, window_params = [{pipeline_mode = #tpu.pipeline_mode<synchronous>, transform_indices = @transform_0, window_bounds = array<i64: 64, 128>}, {pipeline_mode = #tpu.pipeline_mode<synchronous>, transform_indices = @transform_1, window_bounds = array<i64: 128, 384>}, {pipeline_mode = #tpu.pipeline_mode<synchronous>, transform_indices = @transform_2, window_bounds = array<i64: 1, 384>}, {pipeline_mode = #tpu.pipeline_mode<synchronous>, transform_indices = @transform_3, window_bounds = array<i64: 128, 384>}, {pipeline_mode = #tpu.pipeline_mode<synchronous>, transform_indices = @transform_4, window_bounds = array<i64: 1, 384>}, {pipeline_mode = #tpu.pipeline_mode<synchronous>, transform_indices = @transform_5, window_bounds = array<i64: 128, 384>}, {pipeline_mode = #tpu.pipeline_mode<synchronous>, transform_indices = @transform_6, window_bounds = array<i64: 1, 384>}, {pipeline_mode = #tpu.pipeline_mode<synchronous>, transform_indices = @transform_7, window_bounds = array<i64: 128, 384>}, {pipeline_mode = #tpu.pipeline_mode<synchronous>, transform_indices = @transform_8, window_bounds = array<i64: 1, 384>}, {pipeline_mode = #tpu.pipeline_mode<synchronous>, transform_indices = @transform_9, window_bounds = array<i64: 8, 64>}, {pipeline_mode = #tpu.pipeline_mode<synchronous>, transform_indices = @transform_10, window_bounds = array<i64: 128, 128>}, {pipeline_mode = #tpu.pipeline_mode<synchronous>, transform_indices = @transform_11, window_bounds = array<i64: 1, 128>}, {pipeline_mode = #tpu.pipeline_mode<synchronous>, transform_indices = @transform_12, window_bounds = array<i64: 8, 128>}]} {
    %c0 = arith.constant 0 : index
    %c0_0 = arith.constant 0 : index
    %0 = vector.load %arg1[%c0, %c0_0] : memref<64x128xf32, #tpu.memory_space<vmem>>, vector<64x128xf32>
    %c0_1 = arith.constant 0 : index
    %c0_2 = arith.constant 0 : index
    %1 = vector.load %arg2[%c0_1, %c0_2] : memref<128x384xf32, #tpu.memory_space<vmem>>, vector<128x384xf32>
    %cst = arith.constant dense<0.000000e+00> : vector<64x384xf32>
    %2 = tpu.matmul %0, %1, %cst {dimension_numbers = #tpu.dot_dimension_numbers<[1], [0], [0], [1], [0, 0, 1, 1], [], []>} : vector<64x128xf32>, vector<128x384xf32>, vector<64x384xf32> -> vector<64x384xf32>
    %c0_3 = arith.constant 0 : index
    %c0_4 = arith.constant 0 : index
    %3 = vector.load %arg3[%c0_3, %c0_4] : memref<1x384xf32, #tpu.memory_space<vmem>>, vector<1x384xf32>
    %4 = vector.broadcast %3 : vector<1x384xf32> to vector<64x384xf32>
    %5 = arith.addf %2, %4 : vector<64x384xf32>
    %c0_5 = arith.constant 0 : index
    %c0_6 = arith.constant 0 : index
    %6 = vector.load %arg14[%c0_5, %c0_6] : memref<64x384xf32, #tpu.memory_space<vmem>>, vector<64x384xf32>
    tpu.vector_store %arg14[%c0_5, %c0_6], %5 {strides = array<i32>} : memref<64x384xf32, #tpu.memory_space<vmem>>, vector<64x384xf32>,
    %c0_7 = arith.constant 0 : index
    %c0_8 = arith.constant 0 : index
    %7 = vector.load %arg4[%c0_7, %c0_8] : memref<128x384xf32, #tpu.memory_space<vmem>>, vector<128x384xf32>
    %c0_9 = arith.constant 0 : index
    %c0_10 = arith.constant 0 : index
    %8 = vector.load %arg5[%c0_9, %c0_10] : memref<1x384xf32, #tpu.memory_space<vmem>>, vector<1x384xf32>
    %c0_11 = arith.constant 0 : index
    %c0_12 = arith.constant 0 : index
    %9 = vector.load %arg6[%c0_11, %c0_12] : memref<128x384xf32, #tpu.memory_space<vmem>>, vector<128x384xf32>
    %c0_13 = arith.constant 0 : index
    %c0_14 = arith.constant 0 : index
    %10 = vector.load %arg7[%c0_13, %c0_14] : memref<1x384xf32, #tpu.memory_space<vmem>>, vector<1x384xf32>
    %cst_15 = arith.constant 0.000000e+00 : f32
    %11 = vector.broadcast %cst_15 : f32 to vector<8x128xf32>
    %c0_i32 = arith.constant 0 : i32
    %c8_i32 = arith.constant 8 : i32
    %12 = arith.muli %c0_i32, %c8_i32 : i32
    %13 = tpu.assume_multiple %12, 8 : i32
    %14 = arith.index_cast %13 : i32 to index
    %c0_16 = arith.constant 0 : index
    %15 = vector.load %arg14[%14, %c0_16] : memref<64x384xf32, #tpu.memory_space<vmem>>, vector<8x384xf32>
    %cst_17 = arith.constant dense<0.000000e+00> : vector<8x384xf32>
    %16 = tpu.matmul %11, %7, %cst_17 {dimension_numbers = #tpu.dot_dimension_numbers<[1], [0], [0], [1], [0, 0, 1, 1], [], []>} : vector<8x128xf32>, vector<128x384xf32>, vector<8x384xf32> -> vector<8x384xf32>
    %17 = vector.broadcast %8 : vector<1x384xf32> to vector<8x384xf32>
    %18 = arith.addf %16, %17 : vector<8x384xf32>
    %19 = vector.extract_strided_slice %15 {offsets = [0, 0], sizes = [8, 256], strides = [1, 1]} : vector<8x384xf32> to vector<8x256xf32>
    %20 = vector.extract_strided_slice %18 {offsets = [0, 0], sizes = [8, 256], strides = [1, 1]} : vector<8x384xf32> to vector<8x256xf32>
    %21 = arith.addf %19, %20 : vector<8x256xf32>
    %22 = arith.negf %21 : vector<8x256xf32>
    %23 = math.exp %22 : vector<8x256xf32>
    %cst_18 = arith.constant 1.000000e+00 : f32
    %24 = vector.broadcast %cst_18 : f32 to vector<8x256xf32>
    %25 = arith.addf %24, %23 : vector<8x256xf32>
    %26 = arith.divf %24, %25 : vector<8x256xf32>
    %27 = vector.extract_strided_slice %26 {offsets = [0, 0], sizes = [8, 128], strides = [1, 1]} : vector<8x256xf32> to vector<8x128xf32>
    %28 = vector.extract_strided_slice %26 {offsets = [0, 128], sizes = [8, 128], strides = [1, 1]} : vector<8x256xf32> to vector<8x128xf32>
    %29 = vector.extract_strided_slice %15 {offsets = [0, 256], sizes = [8, 128], strides = [1, 1]} : vector<8x384xf32> to vector<8x128xf32>
    %30 = vector.extract_strided_slice %18 {offsets = [0, 256], sizes = [8, 128], strides = [1, 1]} : vector<8x384xf32> to vector<8x128xf32>
    %31 = arith.mulf %27, %30 : vector<8x128xf32>
    %32 = arith.addf %29, %31 : vector<8x128xf32>
    %33 = math.tanh %32 : vector<8x128xf32>
    %34 = arith.subf %11, %33 : vector<8x128xf32>
    %35 = arith.mulf %28, %34 : vector<8x128xf32>
    %36 = arith.addf %33, %35 : vector<8x128xf32>
    %cst_19 = arith.constant dense<0.000000e+00> : vector<8x384xf32>
    %37 = tpu.matmul %36, %9, %cst_19 {dimension_numbers = #tpu.dot_dimension_numbers<[1], [0], [0], [1], [0, 0, 1, 1], [], []>} : vector<8x128xf32>, vector<128x384xf32>, vector<8x384xf32> -> vector<8x384xf32>
    %38 = vector.broadcast %10 : vector<1x384xf32> to vector<8x384xf32>
    %39 = arith.addf %37, %38 : vector<8x384xf32>
    %40 = arith.index_cast %13 : i32 to index
    %c0_20 = arith.constant 0 : index
    %41 = vector.load %arg14[%40, %c0_20] : memref<64x384xf32, #tpu.memory_space<vmem>>, vector<8x384xf32>
    tpu.vector_store %arg14[%40, %c0_20], %39 {strides = array<i32>} : memref<64x384xf32, #tpu.memory_space<vmem>>, vector<8x384xf32>,
    %c1_i32 = arith.constant 1 : i32
    %c8_i32_21 = arith.constant 8 : i32
    %42 = arith.muli %c1_i32, %c8_i32_21 : i32
    %43 = tpu.assume_multiple %42, 8 : i32
    %44 = arith.index_cast %43 : i32 to index
    %c0_22 = arith.constant 0 : index
    %45 = vector.load %arg14[%44, %c0_22] : memref<64x384xf32, #tpu.memory_space<vmem>>, vector<8x384xf32>
    %cst_23 = arith.constant dense<0.000000e+00> : vector<8x384xf32>
    %46 = tpu.matmul %36, %7, %cst_23 {dimension_numbers = #tpu.dot_dimension_numbers<[1], [0], [0], [1], [0, 0, 1, 1], [], []>} : vector<8x128xf32>, vector<128x384xf32>, vector<8x384xf32> -> vector<8x384xf32>
    %47 = vector.broadcast %8 : vector<1x384xf32> to vector<8x384xf32>
    %48 = arith.addf %46, %47 : vector<8x384xf32>
    %49 = vector.extract_strided_slice %45 {offsets = [0, 0], sizes = [8, 256], strides = [1, 1]} : vector<8x384xf32> to vector<8x256xf32>
    %50 = vector.extract_strided_slice %48 {offsets = [0, 0], sizes = [8, 256], strides = [1, 1]} : vector<8x384xf32> to vector<8x256xf32>
    %51 = arith.addf %49, %50 : vector<8x256xf32>
    %52 = arith.negf %51 : vector<8x256xf32>
    %53 = math.exp %52 : vector<8x256xf32>
    %cst_24 = arith.constant 1.000000e+00 : f32
    %54 = vector.broadcast %cst_24 : f32 to vector<8x256xf32>
    %55 = arith.addf %54, %53 : vector<8x256xf32>
    %56 = arith.divf %54, %55 : vector<8x256xf32>
    %57 = vector.extract_strided_slice %56 {offsets = [0, 0], sizes = [8, 128], strides = [1, 1]} : vector<8x256xf32> to vector<8x128xf32>
    %58 = vector.extract_strided_slice %56 {offsets = [0, 128], sizes = [8, 128], strides = [1, 1]} : vector<8x256xf32> to vector<8x128xf32>
    %59 = vector.extract_strided_slice %45 {offsets = [0, 256], sizes = [8, 128], strides = [1, 1]} : vector<8x384xf32> to vector<8x128xf32>
    %60 = vector.extract_strided_slice %48 {offsets = [0, 256], sizes = [8, 128], strides = [1, 1]} : vector<8x384xf32> to vector<8x128xf32>
    %61 = arith.mulf %57, %60 : vector<8x128xf32>
    %62 = arith.addf %59, %61 : vector<8x128xf32>
    %63 = math.tanh %62 : vector<8x128xf32>
    %64 = arith.subf %36, %63 : vector<8x128xf32>
    %65 = arith.mulf %58, %64 : vector<8x128xf32>
    %66 = arith.addf %63, %65 : vector<8x128xf32>
    %cst_25 = arith.constant dense<0.000000e+00> : vector<8x384xf32>
    %67 = tpu.matmul %66, %9, %cst_25 {dimension_numbers = #tpu.dot_dimension_numbers<[1], [0], [0], [1], [0, 0, 1, 1], [], []>} : vector<8x128xf32>, vector<128x384xf32>, vector<8x384xf32> -> vector<8x384xf32>
    %68 = vector.broadcast %10 : vector<1x384xf32> to vector<8x384xf32>
    %69 = arith.addf %67, %68 : vector<8x384xf32>
    %70 = arith.index_cast %43 : i32 to index
    %c0_26 = arith.constant 0 : index
    %71 = vector.load %arg14[%70, %c0_26] : memref<64x384xf32, #tpu.memory_space<vmem>>, vector<8x384xf32>
    tpu.vector_store %arg14[%70, %c0_26], %69 {strides = array<i32>} : memref<64x384xf32, #tpu.memory_space<vmem>>, vector<8x384xf32>,
    %c2_i32 = arith.constant 2 : i32
    %c8_i32_27 = arith.constant 8 : i32
    %72 = arith.muli %c2_i32, %c8_i32_27 : i32
    %73 = tpu.assume_multiple %72, 8 : i32
    %74 = arith.index_cast %73 : i32 to index
    %c0_28 = arith.constant 0 : index
    %75 = vector.load %arg14[%74, %c0_28] : memref<64x384xf32, #tpu.memory_space<vmem>>, vector<8x384xf32>
    %cst_29 = arith.constant dense<0.000000e+00> : vector<8x384xf32>
    %76 = tpu.matmul %66, %7, %cst_29 {dimension_numbers = #tpu.dot_dimension_numbers<[1], [0], [0], [1], [0, 0, 1, 1], [], []>} : vector<8x128xf32>, vector<128x384xf32>, vector<8x384xf32> -> vector<8x384xf32>
    %77 = vector.broadcast %8 : vector<1x384xf32> to vector<8x384xf32>
    %78 = arith.addf %76, %77 : vector<8x384xf32>
    %79 = vector.extract_strided_slice %75 {offsets = [0, 0], sizes = [8, 256], strides = [1, 1]} : vector<8x384xf32> to vector<8x256xf32>
    %80 = vector.extract_strided_slice %78 {offsets = [0, 0], sizes = [8, 256], strides = [1, 1]} : vector<8x384xf32> to vector<8x256xf32>
    %81 = arith.addf %79, %80 : vector<8x256xf32>
    %82 = arith.negf %81 : vector<8x256xf32>
    %83 = math.exp %82 : vector<8x256xf32>
    %cst_30 = arith.constant 1.000000e+00 : f32
    %84 = vector.broadcast %cst_30 : f32 to vector<8x256xf32>
    %85 = arith.addf %84, %83 : vector<8x256xf32>
    %86 = arith.divf %84, %85 : vector<8x256xf32>
    %87 = vector.extract_strided_slice %86 {offsets = [0, 0], sizes = [8, 128], strides = [1, 1]} : vector<8x256xf32> to vector<8x128xf32>
    %88 = vector.extract_strided_slice %86 {offsets = [0, 128], sizes = [8, 128], strides = [1, 1]} : vector<8x256xf32> to vector<8x128xf32>
    %89 = vector.extract_strided_slice %75 {offsets = [0, 256], sizes = [8, 128], strides = [1, 1]} : vector<8x384xf32> to vector<8x128xf32>
    %90 = vector.extract_strided_slice %78 {offsets = [0, 256], sizes = [8, 128], strides = [1, 1]} : vector<8x384xf32> to vector<8x128xf32>
    %91 = arith.mulf %87, %90 : vector<8x128xf32>
    %92 = arith.addf %89, %91 : vector<8x128xf32>
    %93 = math.tanh %92 : vector<8x128xf32>
    %94 = arith.subf %66, %93 : vector<8x128xf32>
    %95 = arith.mulf %88, %94 : vector<8x128xf32>
    %96 = arith.addf %93, %95 : vector<8x128xf32>
    %cst_31 = arith.constant dense<0.000000e+00> : vector<8x384xf32>
    %97 = tpu.matmul %96, %9, %cst_31 {dimension_numbers = #tpu.dot_dimension_numbers<[1], [0], [0], [1], [0, 0, 1, 1], [], []>} : vector<8x128xf32>, vector<128x384xf32>, vector<8x384xf32> -> vector<8x384xf32>
    %98 = vector.broadcast %10 : vector<1x384xf32> to vector<8x384xf32>
    %99 = arith.addf %97, %98 : vector<8x384xf32>
    %100 = arith.index_cast %73 : i32 to index
    %c0_32 = arith.constant 0 : index
    %101 = vector.load %arg14[%100, %c0_32] : memref<64x384xf32, #tpu.memory_space<vmem>>, vector<8x384xf32>
    tpu.vector_store %arg14[%100, %c0_32], %99 {strides = array<i32>} : memref<64x384xf32, #tpu.memory_space<vmem>>, vector<8x384xf32>,
    %c3_i32 = arith.constant 3 : i32
    %c8_i32_33 = arith.constant 8 : i32
    %102 = arith.muli %c3_i32, %c8_i32_33 : i32
    %103 = tpu.assume_multiple %102, 8 : i32
    %104 = arith.index_cast %103 : i32 to index
    %c0_34 = arith.constant 0 : index
    %105 = vector.load %arg14[%104, %c0_34] : memref<64x384xf32, #tpu.memory_space<vmem>>, vector<8x384xf32>
    %cst_35 = arith.constant dense<0.000000e+00> : vector<8x384xf32>
    %106 = tpu.matmul %96, %7, %cst_35 {dimension_numbers = #tpu.dot_dimension_numbers<[1], [0], [0], [1], [0, 0, 1, 1], [], []>} : vector<8x128xf32>, vector<128x384xf32>, vector<8x384xf32> -> vector<8x384xf32>
    %107 = vector.broadcast %8 : vector<1x384xf32> to vector<8x384xf32>
    %108 = arith.addf %106, %107 : vector<8x384xf32>
    %109 = vector.extract_strided_slice %105 {offsets = [0, 0], sizes = [8, 256], strides = [1, 1]} : vector<8x384xf32> to vector<8x256xf32>
    %110 = vector.extract_strided_slice %108 {offsets = [0, 0], sizes = [8, 256], strides = [1, 1]} : vector<8x384xf32> to vector<8x256xf32>
    %111 = arith.addf %109, %110 : vector<8x256xf32>
    %112 = arith.negf %111 : vector<8x256xf32>
    %113 = math.exp %112 : vector<8x256xf32>
    %cst_36 = arith.constant 1.000000e+00 : f32
    %114 = vector.broadcast %cst_36 : f32 to vector<8x256xf32>
    %115 = arith.addf %114, %113 : vector<8x256xf32>
    %116 = arith.divf %114, %115 : vector<8x256xf32>
    %117 = vector.extract_strided_slice %116 {offsets = [0, 0], sizes = [8, 128], strides = [1, 1]} : vector<8x256xf32> to vector<8x128xf32>
    %118 = vector.extract_strided_slice %116 {offsets = [0, 128], sizes = [8, 128], strides = [1, 1]} : vector<8x256xf32> to vector<8x128xf32>
    %119 = vector.extract_strided_slice %105 {offsets = [0, 256], sizes = [8, 128], strides = [1, 1]} : vector<8x384xf32> to vector<8x128xf32>
    %120 = vector.extract_strided_slice %108 {offsets = [0, 256], sizes = [8, 128], strides = [1, 1]} : vector<8x384xf32> to vector<8x128xf32>
    %121 = arith.mulf %117, %120 : vector<8x128xf32>
    %122 = arith.addf %119, %121 : vector<8x128xf32>
    %123 = math.tanh %122 : vector<8x128xf32>
    %124 = arith.subf %96, %123 : vector<8x128xf32>
    %125 = arith.mulf %118, %124 : vector<8x128xf32>
    %126 = arith.addf %123, %125 : vector<8x128xf32>
    %cst_37 = arith.constant dense<0.000000e+00> : vector<8x384xf32>
    %127 = tpu.matmul %126, %9, %cst_37 {dimension_numbers = #tpu.dot_dimension_numbers<[1], [0], [0], [1], [0, 0, 1, 1], [], []>} : vector<8x128xf32>, vector<128x384xf32>, vector<8x384xf32> -> vector<8x384xf32>
    %128 = vector.broadcast %10 : vector<1x384xf32> to vector<8x384xf32>
    %129 = arith.addf %127, %128 : vector<8x384xf32>
    %130 = arith.index_cast %103 : i32 to index
    %c0_38 = arith.constant 0 : index
    %131 = vector.load %arg14[%130, %c0_38] : memref<64x384xf32, #tpu.memory_space<vmem>>, vector<8x384xf32>
    tpu.vector_store %arg14[%130, %c0_38], %129 {strides = array<i32>} : memref<64x384xf32, #tpu.memory_space<vmem>>, vector<8x384xf32>,
    %c4_i32 = arith.constant 4 : i32
    %c8_i32_39 = arith.constant 8 : i32
    %132 = arith.muli %c4_i32, %c8_i32_39 : i32
    %133 = tpu.assume_multiple %132, 8 : i32
    %134 = arith.index_cast %133 : i32 to index
    %c0_40 = arith.constant 0 : index
    %135 = vector.load %arg14[%134, %c0_40] : memref<64x384xf32, #tpu.memory_space<vmem>>, vector<8x384xf32>
    %cst_41 = arith.constant dense<0.000000e+00> : vector<8x384xf32>
    %136 = tpu.matmul %126, %7, %cst_41 {dimension_numbers = #tpu.dot_dimension_numbers<[1], [0], [0], [1], [0, 0, 1, 1], [], []>} : vector<8x128xf32>, vector<128x384xf32>, vector<8x384xf32> -> vector<8x384xf32>
    %137 = vector.broadcast %8 : vector<1x384xf32> to vector<8x384xf32>
    %138 = arith.addf %136, %137 : vector<8x384xf32>
    %139 = vector.extract_strided_slice %135 {offsets = [0, 0], sizes = [8, 256], strides = [1, 1]} : vector<8x384xf32> to vector<8x256xf32>
    %140 = vector.extract_strided_slice %138 {offsets = [0, 0], sizes = [8, 256], strides = [1, 1]} : vector<8x384xf32> to vector<8x256xf32>
    %141 = arith.addf %139, %140 : vector<8x256xf32>
    %142 = arith.negf %141 : vector<8x256xf32>
    %143 = math.exp %142 : vector<8x256xf32>
    %cst_42 = arith.constant 1.000000e+00 : f32
    %144 = vector.broadcast %cst_42 : f32 to vector<8x256xf32>
    %145 = arith.addf %144, %143 : vector<8x256xf32>
    %146 = arith.divf %144, %145 : vector<8x256xf32>
    %147 = vector.extract_strided_slice %146 {offsets = [0, 0], sizes = [8, 128], strides = [1, 1]} : vector<8x256xf32> to vector<8x128xf32>
    %148 = vector.extract_strided_slice %146 {offsets = [0, 128], sizes = [8, 128], strides = [1, 1]} : vector<8x256xf32> to vector<8x128xf32>
    %149 = vector.extract_strided_slice %135 {offsets = [0, 256], sizes = [8, 128], strides = [1, 1]} : vector<8x384xf32> to vector<8x128xf32>
    %150 = vector.extract_strided_slice %138 {offsets = [0, 256], sizes = [8, 128], strides = [1, 1]} : vector<8x384xf32> to vector<8x128xf32>
    %151 = arith.mulf %147, %150 : vector<8x128xf32>
    %152 = arith.addf %149, %151 : vector<8x128xf32>
    %153 = math.tanh %152 : vector<8x128xf32>
    %154 = arith.subf %126, %153 : vector<8x128xf32>
    %155 = arith.mulf %148, %154 : vector<8x128xf32>
    %156 = arith.addf %153, %155 : vector<8x128xf32>
    %cst_43 = arith.constant dense<0.000000e+00> : vector<8x384xf32>
    %157 = tpu.matmul %156, %9, %cst_43 {dimension_numbers = #tpu.dot_dimension_numbers<[1], [0], [0], [1], [0, 0, 1, 1], [], []>} : vector<8x128xf32>, vector<128x384xf32>, vector<8x384xf32> -> vector<8x384xf32>
    %158 = vector.broadcast %10 : vector<1x384xf32> to vector<8x384xf32>
    %159 = arith.addf %157, %158 : vector<8x384xf32>
    %160 = arith.index_cast %133 : i32 to index
    %c0_44 = arith.constant 0 : index
    %161 = vector.load %arg14[%160, %c0_44] : memref<64x384xf32, #tpu.memory_space<vmem>>, vector<8x384xf32>
    tpu.vector_store %arg14[%160, %c0_44], %159 {strides = array<i32>} : memref<64x384xf32, #tpu.memory_space<vmem>>, vector<8x384xf32>,
    %c5_i32 = arith.constant 5 : i32
    %c8_i32_45 = arith.constant 8 : i32
    %162 = arith.muli %c5_i32, %c8_i32_45 : i32
    %163 = tpu.assume_multiple %162, 8 : i32
    %164 = arith.index_cast %163 : i32 to index
    %c0_46 = arith.constant 0 : index
    %165 = vector.load %arg14[%164, %c0_46] : memref<64x384xf32, #tpu.memory_space<vmem>>, vector<8x384xf32>
    %cst_47 = arith.constant dense<0.000000e+00> : vector<8x384xf32>
    %166 = tpu.matmul %156, %7, %cst_47 {dimension_numbers = #tpu.dot_dimension_numbers<[1], [0], [0], [1], [0, 0, 1, 1], [], []>} : vector<8x128xf32>, vector<128x384xf32>, vector<8x384xf32> -> vector<8x384xf32>
    %167 = vector.broadcast %8 : vector<1x384xf32> to vector<8x384xf32>
    %168 = arith.addf %166, %167 : vector<8x384xf32>
    %169 = vector.extract_strided_slice %165 {offsets = [0, 0], sizes = [8, 256], strides = [1, 1]} : vector<8x384xf32> to vector<8x256xf32>
    %170 = vector.extract_strided_slice %168 {offsets = [0, 0], sizes = [8, 256], strides = [1, 1]} : vector<8x384xf32> to vector<8x256xf32>
    %171 = arith.addf %169, %170 : vector<8x256xf32>
    %172 = arith.negf %171 : vector<8x256xf32>
    %173 = math.exp %172 : vector<8x256xf32>
    %cst_48 = arith.constant 1.000000e+00 : f32
    %174 = vector.broadcast %cst_48 : f32 to vector<8x256xf32>
    %175 = arith.addf %174, %173 : vector<8x256xf32>
    %176 = arith.divf %174, %175 : vector<8x256xf32>
    %177 = vector.extract_strided_slice %176 {offsets = [0, 0], sizes = [8, 128], strides = [1, 1]} : vector<8x256xf32> to vector<8x128xf32>
    %178 = vector.extract_strided_slice %176 {offsets = [0, 128], sizes = [8, 128], strides = [1, 1]} : vector<8x256xf32> to vector<8x128xf32>
    %179 = vector.extract_strided_slice %165 {offsets = [0, 256], sizes = [8, 128], strides = [1, 1]} : vector<8x384xf32> to vector<8x128xf32>
    %180 = vector.extract_strided_slice %168 {offsets = [0, 256], sizes = [8, 128], strides = [1, 1]} : vector<8x384xf32> to vector<8x128xf32>
    %181 = arith.mulf %177, %180 : vector<8x128xf32>
    %182 = arith.addf %179, %181 : vector<8x128xf32>
    %183 = math.tanh %182 : vector<8x128xf32>
    %184 = arith.subf %156, %183 : vector<8x128xf32>
    %185 = arith.mulf %178, %184 : vector<8x128xf32>
    %186 = arith.addf %183, %185 : vector<8x128xf32>
    %cst_49 = arith.constant dense<0.000000e+00> : vector<8x384xf32>
    %187 = tpu.matmul %186, %9, %cst_49 {dimension_numbers = #tpu.dot_dimension_numbers<[1], [0], [0], [1], [0, 0, 1, 1], [], []>} : vector<8x128xf32>, vector<128x384xf32>, vector<8x384xf32> -> vector<8x384xf32>
    %188 = vector.broadcast %10 : vector<1x384xf32> to vector<8x384xf32>
    %189 = arith.addf %187, %188 : vector<8x384xf32>
    %190 = arith.index_cast %163 : i32 to index
    %c0_50 = arith.constant 0 : index
    %191 = vector.load %arg14[%190, %c0_50] : memref<64x384xf32, #tpu.memory_space<vmem>>, vector<8x384xf32>
    tpu.vector_store %arg14[%190, %c0_50], %189 {strides = array<i32>} : memref<64x384xf32, #tpu.memory_space<vmem>>, vector<8x384xf32>,
    %c6_i32 = arith.constant 6 : i32
    %c8_i32_51 = arith.constant 8 : i32
    %192 = arith.muli %c6_i32, %c8_i32_51 : i32
    %193 = tpu.assume_multiple %192, 8 : i32
    %194 = arith.index_cast %193 : i32 to index
    %c0_52 = arith.constant 0 : index
    %195 = vector.load %arg14[%194, %c0_52] : memref<64x384xf32, #tpu.memory_space<vmem>>, vector<8x384xf32>
    %cst_53 = arith.constant dense<0.000000e+00> : vector<8x384xf32>
    %196 = tpu.matmul %186, %7, %cst_53 {dimension_numbers = #tpu.dot_dimension_numbers<[1], [0], [0], [1], [0, 0, 1, 1], [], []>} : vector<8x128xf32>, vector<128x384xf32>, vector<8x384xf32> -> vector<8x384xf32>
    %197 = vector.broadcast %8 : vector<1x384xf32> to vector<8x384xf32>
    %198 = arith.addf %196, %197 : vector<8x384xf32>
    %199 = vector.extract_strided_slice %195 {offsets = [0, 0], sizes = [8, 256], strides = [1, 1]} : vector<8x384xf32> to vector<8x256xf32>
    %200 = vector.extract_strided_slice %198 {offsets = [0, 0], sizes = [8, 256], strides = [1, 1]} : vector<8x384xf32> to vector<8x256xf32>
    %201 = arith.addf %199, %200 : vector<8x256xf32>
    %202 = arith.negf %201 : vector<8x256xf32>
    %203 = math.exp %202 : vector<8x256xf32>
    %cst_54 = arith.constant 1.000000e+00 : f32
    %204 = vector.broadcast %cst_54 : f32 to vector<8x256xf32>
    %205 = arith.addf %204, %203 : vector<8x256xf32>
    %206 = arith.divf %204, %205 : vector<8x256xf32>
    %207 = vector.extract_strided_slice %206 {offsets = [0, 0], sizes = [8, 128], strides = [1, 1]} : vector<8x256xf32> to vector<8x128xf32>
    %208 = vector.extract_strided_slice %206 {offsets = [0, 128], sizes = [8, 128], strides = [1, 1]} : vector<8x256xf32> to vector<8x128xf32>
    %209 = vector.extract_strided_slice %195 {offsets = [0, 256], sizes = [8, 128], strides = [1, 1]} : vector<8x384xf32> to vector<8x128xf32>
    %210 = vector.extract_strided_slice %198 {offsets = [0, 256], sizes = [8, 128], strides = [1, 1]} : vector<8x384xf32> to vector<8x128xf32>
    %211 = arith.mulf %207, %210 : vector<8x128xf32>
    %212 = arith.addf %209, %211 : vector<8x128xf32>
    %213 = math.tanh %212 : vector<8x128xf32>
    %214 = arith.subf %186, %213 : vector<8x128xf32>
    %215 = arith.mulf %208, %214 : vector<8x128xf32>
    %216 = arith.addf %213, %215 : vector<8x128xf32>
    %cst_55 = arith.constant dense<0.000000e+00> : vector<8x384xf32>
    %217 = tpu.matmul %216, %9, %cst_55 {dimension_numbers = #tpu.dot_dimension_numbers<[1], [0], [0], [1], [0, 0, 1, 1], [], []>} : vector<8x128xf32>, vector<128x384xf32>, vector<8x384xf32> -> vector<8x384xf32>
    %218 = vector.broadcast %10 : vector<1x384xf32> to vector<8x384xf32>
    %219 = arith.addf %217, %218 : vector<8x384xf32>
    %220 = arith.index_cast %193 : i32 to index
    %c0_56 = arith.constant 0 : index
    %221 = vector.load %arg14[%220, %c0_56] : memref<64x384xf32, #tpu.memory_space<vmem>>, vector<8x384xf32>
    tpu.vector_store %arg14[%220, %c0_56], %219 {strides = array<i32>} : memref<64x384xf32, #tpu.memory_space<vmem>>, vector<8x384xf32>,
    %c7_i32 = arith.constant 7 : i32
    %c8_i32_57 = arith.constant 8 : i32
    %222 = arith.muli %c7_i32, %c8_i32_57 : i32
    %223 = tpu.assume_multiple %222, 8 : i32
    %224 = arith.index_cast %223 : i32 to index
    %c0_58 = arith.constant 0 : index
    %225 = vector.load %arg14[%224, %c0_58] : memref<64x384xf32, #tpu.memory_space<vmem>>, vector<8x384xf32>
    %cst_59 = arith.constant dense<0.000000e+00> : vector<8x384xf32>
    %226 = tpu.matmul %216, %7, %cst_59 {dimension_numbers = #tpu.dot_dimension_numbers<[1], [0], [0], [1], [0, 0, 1, 1], [], []>} : vector<8x128xf32>, vector<128x384xf32>, vector<8x384xf32> -> vector<8x384xf32>
    %227 = vector.broadcast %8 : vector<1x384xf32> to vector<8x384xf32>
    %228 = arith.addf %226, %227 : vector<8x384xf32>
    %229 = vector.extract_strided_slice %225 {offsets = [0, 0], sizes = [8, 256], strides = [1, 1]} : vector<8x384xf32> to vector<8x256xf32>
    %230 = vector.extract_strided_slice %228 {offsets = [0, 0], sizes = [8, 256], strides = [1, 1]} : vector<8x384xf32> to vector<8x256xf32>
    %231 = arith.addf %229, %230 : vector<8x256xf32>
    %232 = arith.negf %231 : vector<8x256xf32>
    %233 = math.exp %232 : vector<8x256xf32>
    %cst_60 = arith.constant 1.000000e+00 : f32
    %234 = vector.broadcast %cst_60 : f32 to vector<8x256xf32>
    %235 = arith.addf %234, %233 : vector<8x256xf32>
    %236 = arith.divf %234, %235 : vector<8x256xf32>
    %237 = vector.extract_strided_slice %236 {offsets = [0, 0], sizes = [8, 128], strides = [1, 1]} : vector<8x256xf32> to vector<8x128xf32>
    %238 = vector.extract_strided_slice %236 {offsets = [0, 128], sizes = [8, 128], strides = [1, 1]} : vector<8x256xf32> to vector<8x128xf32>
    %239 = vector.extract_strided_slice %225 {offsets = [0, 256], sizes = [8, 128], strides = [1, 1]} : vector<8x384xf32> to vector<8x128xf32>
    %240 = vector.extract_strided_slice %228 {offsets = [0, 256], sizes = [8, 128], strides = [1, 1]} : vector<8x384xf32> to vector<8x128xf32>
    %241 = arith.mulf %237, %240 : vector<8x128xf32>
    %242 = arith.addf %239, %241 : vector<8x128xf32>
    %243 = math.tanh %242 : vector<8x128xf32>
    %244 = arith.subf %216, %243 : vector<8x128xf32>
    %245 = arith.mulf %238, %244 : vector<8x128xf32>
    %246 = arith.addf %243, %245 : vector<8x128xf32>
    %cst_61 = arith.constant dense<0.000000e+00> : vector<8x384xf32>
    %247 = tpu.matmul %246, %9, %cst_61 {dimension_numbers = #tpu.dot_dimension_numbers<[1], [0], [0], [1], [0, 0, 1, 1], [], []>} : vector<8x128xf32>, vector<128x384xf32>, vector<8x384xf32> -> vector<8x384xf32>
    %248 = vector.broadcast %10 : vector<1x384xf32> to vector<8x384xf32>
    %249 = arith.addf %247, %248 : vector<8x384xf32>
    %250 = arith.index_cast %223 : i32 to index
    %c0_62 = arith.constant 0 : index
    %251 = vector.load %arg14[%250, %c0_62] : memref<64x384xf32, #tpu.memory_space<vmem>>, vector<8x384xf32>
    tpu.vector_store %arg14[%250, %c0_62], %249 {strides = array<i32>} : memref<64x384xf32, #tpu.memory_space<vmem>>, vector<8x384xf32>,
    %c8_i32_63 = arith.constant 8 : i32
    %c0_64 = arith.constant 0 : index
    %c0_65 = arith.constant 0 : index
    %252 = vector.load %arg8[%c0_64, %c0_65] : memref<128x384xf32, #tpu.memory_space<vmem>>, vector<128x384xf32>
    %c0_66 = arith.constant 0 : index
    %c0_67 = arith.constant 0 : index
    %253 = vector.load %arg9[%c0_66, %c0_67] : memref<1x384xf32, #tpu.memory_space<vmem>>, vector<1x384xf32>
    %cst_68 = arith.constant 0.000000e+00 : f32
    %254 = vector.broadcast %cst_68 : f32 to vector<8x128xf32>
    %c0_i32_69 = arith.constant 0 : i32
    %c8_i32_70 = arith.constant 8 : i32
    %255 = arith.muli %c0_i32_69, %c8_i32_70 : i32
    %256 = tpu.assume_multiple %255, 8 : i32
    %257 = arith.index_cast %256 : i32 to index
    %c0_71 = arith.constant 0 : index
    %258 = vector.load %arg14[%257, %c0_71] : memref<64x384xf32, #tpu.memory_space<vmem>>, vector<8x384xf32>
    %cst_72 = arith.constant dense<0.000000e+00> : vector<8x384xf32>
    %259 = tpu.matmul %254, %252, %cst_72 {dimension_numbers = #tpu.dot_dimension_numbers<[1], [0], [0], [1], [0, 0, 1, 1], [], []>} : vector<8x128xf32>, vector<128x384xf32>, vector<8x384xf32> -> vector<8x384xf32>
    %260 = vector.broadcast %253 : vector<1x384xf32> to vector<8x384xf32>
    %261 = arith.addf %259, %260 : vector<8x384xf32>
    %262 = vector.extract_strided_slice %258 {offsets = [0, 0], sizes = [8, 256], strides = [1, 1]} : vector<8x384xf32> to vector<8x256xf32>
    %263 = vector.extract_strided_slice %261 {offsets = [0, 0], sizes = [8, 256], strides = [1, 1]} : vector<8x384xf32> to vector<8x256xf32>
    %264 = arith.addf %262, %263 : vector<8x256xf32>
    %265 = arith.negf %264 : vector<8x256xf32>
    %266 = math.exp %265 : vector<8x256xf32>
    %cst_73 = arith.constant 1.000000e+00 : f32
    %267 = vector.broadcast %cst_73 : f32 to vector<8x256xf32>
    %268 = arith.addf %267, %266 : vector<8x256xf32>
    %269 = arith.divf %267, %268 : vector<8x256xf32>
    %270 = vector.extract_strided_slice %269 {offsets = [0, 0], sizes = [8, 128], strides = [1, 1]} : vector<8x256xf32> to vector<8x128xf32>
    %271 = vector.extract_strided_slice %269 {offsets = [0, 128], sizes = [8, 128], strides = [1, 1]} : vector<8x256xf32> to vector<8x128xf32>
    %272 = vector.extract_strided_slice %258 {offsets = [0, 256], sizes = [8, 128], strides = [1, 1]} : vector<8x384xf32> to vector<8x128xf32>
    %273 = vector.extract_strided_slice %261 {offsets = [0, 256], sizes = [8, 128], strides = [1, 1]} : vector<8x384xf32> to vector<8x128xf32>
    %274 = arith.mulf %270, %273 : vector<8x128xf32>
    %275 = arith.addf %272, %274 : vector<8x128xf32>
    %276 = math.tanh %275 : vector<8x128xf32>
    %277 = arith.subf %254, %276 : vector<8x128xf32>
    %278 = arith.mulf %271, %277 : vector<8x128xf32>
    %279 = arith.addf %276, %278 : vector<8x128xf32>
    %280 = arith.index_cast %256 : i32 to index
    %c0_74 = arith.constant 0 : index
    %281 = vector.load %arg15[%280, %c0_74] : memref<64x128xf32, #tpu.memory_space<vmem>>, vector<8x128xf32>
    tpu.vector_store %arg15[%280, %c0_74], %279 {strides = array<i32>} : memref<64x128xf32, #tpu.memory_space<vmem>>, vector<8x128xf32>,
    %c1_i32_75 = arith.constant 1 : i32
    %c8_i32_76 = arith.constant 8 : i32
    %282 = arith.muli %c1_i32_75, %c8_i32_76 : i32
    %283 = tpu.assume_multiple %282, 8 : i32
    %284 = arith.index_cast %283 : i32 to index
    %c0_77 = arith.constant 0 : index
    %285 = vector.load %arg14[%284, %c0_77] : memref<64x384xf32, #tpu.memory_space<vmem>>, vector<8x384xf32>
    %cst_78 = arith.constant dense<0.000000e+00> : vector<8x384xf32>
    %286 = tpu.matmul %279, %252, %cst_78 {dimension_numbers = #tpu.dot_dimension_numbers<[1], [0], [0], [1], [0, 0, 1, 1], [], []>} : vector<8x128xf32>, vector<128x384xf32>, vector<8x384xf32> -> vector<8x384xf32>
    %287 = vector.broadcast %253 : vector<1x384xf32> to vector<8x384xf32>
    %288 = arith.addf %286, %287 : vector<8x384xf32>
    %289 = vector.extract_strided_slice %285 {offsets = [0, 0], sizes = [8, 256], strides = [1, 1]} : vector<8x384xf32> to vector<8x256xf32>
    %290 = vector.extract_strided_slice %288 {offsets = [0, 0], sizes = [8, 256], strides = [1, 1]} : vector<8x384xf32> to vector<8x256xf32>
    %291 = arith.addf %289, %290 : vector<8x256xf32>
    %292 = arith.negf %291 : vector<8x256xf32>
    %293 = math.exp %292 : vector<8x256xf32>
    %cst_79 = arith.constant 1.000000e+00 : f32
    %294 = vector.broadcast %cst_79 : f32 to vector<8x256xf32>
    %295 = arith.addf %294, %293 : vector<8x256xf32>
    %296 = arith.divf %294, %295 : vector<8x256xf32>
    %297 = vector.extract_strided_slice %296 {offsets = [0, 0], sizes = [8, 128], strides = [1, 1]} : vector<8x256xf32> to vector<8x128xf32>
    %298 = vector.extract_strided_slice %296 {offsets = [0, 128], sizes = [8, 128], strides = [1, 1]} : vector<8x256xf32> to vector<8x128xf32>
    %299 = vector.extract_strided_slice %285 {offsets = [0, 256], sizes = [8, 128], strides = [1, 1]} : vector<8x384xf32> to vector<8x128xf32>
    %300 = vector.extract_strided_slice %288 {offsets = [0, 256], sizes = [8, 128], strides = [1, 1]} : vector<8x384xf32> to vector<8x128xf32>
    %301 = arith.mulf %297, %300 : vector<8x128xf32>
    %302 = arith.addf %299, %301 : vector<8x128xf32>
    %303 = math.tanh %302 : vector<8x128xf32>
    %304 = arith.subf %279, %303 : vector<8x128xf32>
    %305 = arith.mulf %298, %304 : vector<8x128xf32>
    %306 = arith.addf %303, %305 : vector<8x128xf32>
    %307 = arith.index_cast %283 : i32 to index
    %c0_80 = arith.constant 0 : index
    %308 = vector.load %arg15[%307, %c0_80] : memref<64x128xf32, #tpu.memory_space<vmem>>, vector<8x128xf32>
    tpu.vector_store %arg15[%307, %c0_80], %306 {strides = array<i32>} : memref<64x128xf32, #tpu.memory_space<vmem>>, vector<8x128xf32>,
    %c2_i32_81 = arith.constant 2 : i32
    %c8_i32_82 = arith.constant 8 : i32
    %309 = arith.muli %c2_i32_81, %c8_i32_82 : i32
    %310 = tpu.assume_multiple %309, 8 : i32
    %311 = arith.index_cast %310 : i32 to index
    %c0_83 = arith.constant 0 : index
    %312 = vector.load %arg14[%311, %c0_83] : memref<64x384xf32, #tpu.memory_space<vmem>>, vector<8x384xf32>
    %cst_84 = arith.constant dense<0.000000e+00> : vector<8x384xf32>
    %313 = tpu.matmul %306, %252, %cst_84 {dimension_numbers = #tpu.dot_dimension_numbers<[1], [0], [0], [1], [0, 0, 1, 1], [], []>} : vector<8x128xf32>, vector<128x384xf32>, vector<8x384xf32> -> vector<8x384xf32>
    %314 = vector.broadcast %253 : vector<1x384xf32> to vector<8x384xf32>
    %315 = arith.addf %313, %314 : vector<8x384xf32>
    %316 = vector.extract_strided_slice %312 {offsets = [0, 0], sizes = [8, 256], strides = [1, 1]} : vector<8x384xf32> to vector<8x256xf32>
    %317 = vector.extract_strided_slice %315 {offsets = [0, 0], sizes = [8, 256], strides = [1, 1]} : vector<8x384xf32> to vector<8x256xf32>
    %318 = arith.addf %316, %317 : vector<8x256xf32>
    %319 = arith.negf %318 : vector<8x256xf32>
    %320 = math.exp %319 : vector<8x256xf32>
    %cst_85 = arith.constant 1.000000e+00 : f32
    %321 = vector.broadcast %cst_85 : f32 to vector<8x256xf32>
    %322 = arith.addf %321, %320 : vector<8x256xf32>
    %323 = arith.divf %321, %322 : vector<8x256xf32>
    %324 = vector.extract_strided_slice %323 {offsets = [0, 0], sizes = [8, 128], strides = [1, 1]} : vector<8x256xf32> to vector<8x128xf32>
    %325 = vector.extract_strided_slice %323 {offsets = [0, 128], sizes = [8, 128], strides = [1, 1]} : vector<8x256xf32> to vector<8x128xf32>
    %326 = vector.extract_strided_slice %312 {offsets = [0, 256], sizes = [8, 128], strides = [1, 1]} : vector<8x384xf32> to vector<8x128xf32>
    %327 = vector.extract_strided_slice %315 {offsets = [0, 256], sizes = [8, 128], strides = [1, 1]} : vector<8x384xf32> to vector<8x128xf32>
    %328 = arith.mulf %324, %327 : vector<8x128xf32>
    %329 = arith.addf %326, %328 : vector<8x128xf32>
    %330 = math.tanh %329 : vector<8x128xf32>
    %331 = arith.subf %306, %330 : vector<8x128xf32>
    %332 = arith.mulf %325, %331 : vector<8x128xf32>
    %333 = arith.addf %330, %332 : vector<8x128xf32>
    %334 = arith.index_cast %310 : i32 to index
    %c0_86 = arith.constant 0 : index
    %335 = vector.load %arg15[%334, %c0_86] : memref<64x128xf32, #tpu.memory_space<vmem>>, vector<8x128xf32>
    tpu.vector_store %arg15[%334, %c0_86], %333 {strides = array<i32>} : memref<64x128xf32, #tpu.memory_space<vmem>>, vector<8x128xf32>,
    %c3_i32_87 = arith.constant 3 : i32
    %c8_i32_88 = arith.constant 8 : i32
    %336 = arith.muli %c3_i32_87, %c8_i32_88 : i32
    %337 = tpu.assume_multiple %336, 8 : i32
    %338 = arith.index_cast %337 : i32 to index
    %c0_89 = arith.constant 0 : index
    %339 = vector.load %arg14[%338, %c0_89] : memref<64x384xf32, #tpu.memory_space<vmem>>, vector<8x384xf32>
    %cst_90 = arith.constant dense<0.000000e+00> : vector<8x384xf32>
    %340 = tpu.matmul %333, %252, %cst_90 {dimension_numbers = #tpu.dot_dimension_numbers<[1], [0], [0], [1], [0, 0, 1, 1], [], []>} : vector<8x128xf32>, vector<128x384xf32>, vector<8x384xf32> -> vector<8x384xf32>
    %341 = vector.broadcast %253 : vector<1x384xf32> to vector<8x384xf32>
    %342 = arith.addf %340, %341 : vector<8x384xf32>
    %343 = vector.extract_strided_slice %339 {offsets = [0, 0], sizes = [8, 256], strides = [1, 1]} : vector<8x384xf32> to vector<8x256xf32>
    %344 = vector.extract_strided_slice %342 {offsets = [0, 0], sizes = [8, 256], strides = [1, 1]} : vector<8x384xf32> to vector<8x256xf32>
    %345 = arith.addf %343, %344 : vector<8x256xf32>
    %346 = arith.negf %345 : vector<8x256xf32>
    %347 = math.exp %346 : vector<8x256xf32>
    %cst_91 = arith.constant 1.000000e+00 : f32
    %348 = vector.broadcast %cst_91 : f32 to vector<8x256xf32>
    %349 = arith.addf %348, %347 : vector<8x256xf32>
    %350 = arith.divf %348, %349 : vector<8x256xf32>
    %351 = vector.extract_strided_slice %350 {offsets = [0, 0], sizes = [8, 128], strides = [1, 1]} : vector<8x256xf32> to vector<8x128xf32>
    %352 = vector.extract_strided_slice %350 {offsets = [0, 128], sizes = [8, 128], strides = [1, 1]} : vector<8x256xf32> to vector<8x128xf32>
    %353 = vector.extract_strided_slice %339 {offsets = [0, 256], sizes = [8, 128], strides = [1, 1]} : vector<8x384xf32> to vector<8x128xf32>
    %354 = vector.extract_strided_slice %342 {offsets = [0, 256], sizes = [8, 128], strides = [1, 1]} : vector<8x384xf32> to vector<8x128xf32>
    %355 = arith.mulf %351, %354 : vector<8x128xf32>
    %356 = arith.addf %353, %355 : vector<8x128xf32>
    %357 = math.tanh %356 : vector<8x128xf32>
    %358 = arith.subf %333, %357 : vector<8x128xf32>
    %359 = arith.mulf %352, %358 : vector<8x128xf32>
    %360 = arith.addf %357, %359 : vector<8x128xf32>
    %361 = arith.index_cast %337 : i32 to index
    %c0_92 = arith.constant 0 : index
    %362 = vector.load %arg15[%361, %c0_92] : memref<64x128xf32, #tpu.memory_space<vmem>>, vector<8x128xf32>
    tpu.vector_store %arg15[%361, %c0_92], %360 {strides = array<i32>} : memref<64x128xf32, #tpu.memory_space<vmem>>, vector<8x128xf32>,
    %c4_i32_93 = arith.constant 4 : i32
    %c8_i32_94 = arith.constant 8 : i32
    %363 = arith.muli %c4_i32_93, %c8_i32_94 : i32
    %364 = tpu.assume_multiple %363, 8 : i32
    %365 = arith.index_cast %364 : i32 to index
    %c0_95 = arith.constant 0 : index
    %366 = vector.load %arg14[%365, %c0_95] : memref<64x384xf32, #tpu.memory_space<vmem>>, vector<8x384xf32>
    %cst_96 = arith.constant dense<0.000000e+00> : vector<8x384xf32>
    %367 = tpu.matmul %360, %252, %cst_96 {dimension_numbers = #tpu.dot_dimension_numbers<[1], [0], [0], [1], [0, 0, 1, 1], [], []>} : vector<8x128xf32>, vector<128x384xf32>, vector<8x384xf32> -> vector<8x384xf32>
    %368 = vector.broadcast %253 : vector<1x384xf32> to vector<8x384xf32>
    %369 = arith.addf %367, %368 : vector<8x384xf32>
    %370 = vector.extract_strided_slice %366 {offsets = [0, 0], sizes = [8, 256], strides = [1, 1]} : vector<8x384xf32> to vector<8x256xf32>
    %371 = vector.extract_strided_slice %369 {offsets = [0, 0], sizes = [8, 256], strides = [1, 1]} : vector<8x384xf32> to vector<8x256xf32>
    %372 = arith.addf %370, %371 : vector<8x256xf32>
    %373 = arith.negf %372 : vector<8x256xf32>
    %374 = math.exp %373 : vector<8x256xf32>
    %cst_97 = arith.constant 1.000000e+00 : f32
    %375 = vector.broadcast %cst_97 : f32 to vector<8x256xf32>
    %376 = arith.addf %375, %374 : vector<8x256xf32>
    %377 = arith.divf %375, %376 : vector<8x256xf32>
    %378 = vector.extract_strided_slice %377 {offsets = [0, 0], sizes = [8, 128], strides = [1, 1]} : vector<8x256xf32> to vector<8x128xf32>
    %379 = vector.extract_strided_slice %377 {offsets = [0, 128], sizes = [8, 128], strides = [1, 1]} : vector<8x256xf32> to vector<8x128xf32>
    %380 = vector.extract_strided_slice %366 {offsets = [0, 256], sizes = [8, 128], strides = [1, 1]} : vector<8x384xf32> to vector<8x128xf32>
    %381 = vector.extract_strided_slice %369 {offsets = [0, 256], sizes = [8, 128], strides = [1, 1]} : vector<8x384xf32> to vector<8x128xf32>
    %382 = arith.mulf %378, %381 : vector<8x128xf32>
    %383 = arith.addf %380, %382 : vector<8x128xf32>
    %384 = math.tanh %383 : vector<8x128xf32>
    %385 = arith.subf %360, %384 : vector<8x128xf32>
    %386 = arith.mulf %379, %385 : vector<8x128xf32>
    %387 = arith.addf %384, %386 : vector<8x128xf32>
    %388 = arith.index_cast %364 : i32 to index
    %c0_98 = arith.constant 0 : index
    %389 = vector.load %arg15[%388, %c0_98] : memref<64x128xf32, #tpu.memory_space<vmem>>, vector<8x128xf32>
    tpu.vector_store %arg15[%388, %c0_98], %387 {strides = array<i32>} : memref<64x128xf32, #tpu.memory_space<vmem>>, vector<8x128xf32>,
    %c5_i32_99 = arith.constant 5 : i32
    %c8_i32_100 = arith.constant 8 : i32
    %390 = arith.muli %c5_i32_99, %c8_i32_100 : i32
    %391 = tpu.assume_multiple %390, 8 : i32
    %392 = arith.index_cast %391 : i32 to index
    %c0_101 = arith.constant 0 : index
    %393 = vector.load %arg14[%392, %c0_101] : memref<64x384xf32, #tpu.memory_space<vmem>>, vector<8x384xf32>
    %cst_102 = arith.constant dense<0.000000e+00> : vector<8x384xf32>
    %394 = tpu.matmul %387, %252, %cst_102 {dimension_numbers = #tpu.dot_dimension_numbers<[1], [0], [0], [1], [0, 0, 1, 1], [], []>} : vector<8x128xf32>, vector<128x384xf32>, vector<8x384xf32> -> vector<8x384xf32>
    %395 = vector.broadcast %253 : vector<1x384xf32> to vector<8x384xf32>
    %396 = arith.addf %394, %395 : vector<8x384xf32>
    %397 = vector.extract_strided_slice %393 {offsets = [0, 0], sizes = [8, 256], strides = [1, 1]} : vector<8x384xf32> to vector<8x256xf32>
    %398 = vector.extract_strided_slice %396 {offsets = [0, 0], sizes = [8, 256], strides = [1, 1]} : vector<8x384xf32> to vector<8x256xf32>
    %399 = arith.addf %397, %398 : vector<8x256xf32>
    %400 = arith.negf %399 : vector<8x256xf32>
    %401 = math.exp %400 : vector<8x256xf32>
    %cst_103 = arith.constant 1.000000e+00 : f32
    %402 = vector.broadcast %cst_103 : f32 to vector<8x256xf32>
    %403 = arith.addf %402, %401 : vector<8x256xf32>
    %404 = arith.divf %402, %403 : vector<8x256xf32>
    %405 = vector.extract_strided_slice %404 {offsets = [0, 0], sizes = [8, 128], strides = [1, 1]} : vector<8x256xf32> to vector<8x128xf32>
    %406 = vector.extract_strided_slice %404 {offsets = [0, 128], sizes = [8, 128], strides = [1, 1]} : vector<8x256xf32> to vector<8x128xf32>
    %407 = vector.extract_strided_slice %393 {offsets = [0, 256], sizes = [8, 128], strides = [1, 1]} : vector<8x384xf32> to vector<8x128xf32>
    %408 = vector.extract_strided_slice %396 {offsets = [0, 256], sizes = [8, 128], strides = [1, 1]} : vector<8x384xf32> to vector<8x128xf32>
    %409 = arith.mulf %405, %408 : vector<8x128xf32>
    %410 = arith.addf %407, %409 : vector<8x128xf32>
    %411 = math.tanh %410 : vector<8x128xf32>
    %412 = arith.subf %387, %411 : vector<8x128xf32>
    %413 = arith.mulf %406, %412 : vector<8x128xf32>
    %414 = arith.addf %411, %413 : vector<8x128xf32>
    %415 = arith.index_cast %391 : i32 to index
    %c0_104 = arith.constant 0 : index
    %416 = vector.load %arg15[%415, %c0_104] : memref<64x128xf32, #tpu.memory_space<vmem>>, vector<8x128xf32>
    tpu.vector_store %arg15[%415, %c0_104], %414 {strides = array<i32>} : memref<64x128xf32, #tpu.memory_space<vmem>>, vector<8x128xf32>,
    %c6_i32_105 = arith.constant 6 : i32
    %c8_i32_106 = arith.constant 8 : i32
    %417 = arith.muli %c6_i32_105, %c8_i32_106 : i32
    %418 = tpu.assume_multiple %417, 8 : i32
    %419 = arith.index_cast %418 : i32 to index
    %c0_107 = arith.constant 0 : index
    %420 = vector.load %arg14[%419, %c0_107] : memref<64x384xf32, #tpu.memory_space<vmem>>, vector<8x384xf32>
    %cst_108 = arith.constant dense<0.000000e+00> : vector<8x384xf32>
    %421 = tpu.matmul %414, %252, %cst_108 {dimension_numbers = #tpu.dot_dimension_numbers<[1], [0], [0], [1], [0, 0, 1, 1], [], []>} : vector<8x128xf32>, vector<128x384xf32>, vector<8x384xf32> -> vector<8x384xf32>
    %422 = vector.broadcast %253 : vector<1x384xf32> to vector<8x384xf32>
    %423 = arith.addf %421, %422 : vector<8x384xf32>
    %424 = vector.extract_strided_slice %420 {offsets = [0, 0], sizes = [8, 256], strides = [1, 1]} : vector<8x384xf32> to vector<8x256xf32>
    %425 = vector.extract_strided_slice %423 {offsets = [0, 0], sizes = [8, 256], strides = [1, 1]} : vector<8x384xf32> to vector<8x256xf32>
    %426 = arith.addf %424, %425 : vector<8x256xf32>
    %427 = arith.negf %426 : vector<8x256xf32>
    %428 = math.exp %427 : vector<8x256xf32>
    %cst_109 = arith.constant 1.000000e+00 : f32
    %429 = vector.broadcast %cst_109 : f32 to vector<8x256xf32>
    %430 = arith.addf %429, %428 : vector<8x256xf32>
    %431 = arith.divf %429, %430 : vector<8x256xf32>
    %432 = vector.extract_strided_slice %431 {offsets = [0, 0], sizes = [8, 128], strides = [1, 1]} : vector<8x256xf32> to vector<8x128xf32>
    %433 = vector.extract_strided_slice %431 {offsets = [0, 128], sizes = [8, 128], strides = [1, 1]} : vector<8x256xf32> to vector<8x128xf32>
    %434 = vector.extract_strided_slice %420 {offsets = [0, 256], sizes = [8, 128], strides = [1, 1]} : vector<8x384xf32> to vector<8x128xf32>
    %435 = vector.extract_strided_slice %423 {offsets = [0, 256], sizes = [8, 128], strides = [1, 1]} : vector<8x384xf32> to vector<8x128xf32>
    %436 = arith.mulf %432, %435 : vector<8x128xf32>
    %437 = arith.addf %434, %436 : vector<8x128xf32>
    %438 = math.tanh %437 : vector<8x128xf32>
    %439 = arith.subf %414, %438 : vector<8x128xf32>
    %440 = arith.mulf %433, %439 : vector<8x128xf32>
    %441 = arith.addf %438, %440 : vector<8x128xf32>
    %442 = arith.index_cast %418 : i32 to index
    %c0_110 = arith.constant 0 : index
    %443 = vector.load %arg15[%442, %c0_110] : memref<64x128xf32, #tpu.memory_space<vmem>>, vector<8x128xf32>
    tpu.vector_store %arg15[%442, %c0_110], %441 {strides = array<i32>} : memref<64x128xf32, #tpu.memory_space<vmem>>, vector<8x128xf32>,
    %c7_i32_111 = arith.constant 7 : i32
    %c8_i32_112 = arith.constant 8 : i32
    %444 = arith.muli %c7_i32_111, %c8_i32_112 : i32
    %445 = tpu.assume_multiple %444, 8 : i32
    %446 = arith.index_cast %445 : i32 to index
    %c0_113 = arith.constant 0 : index
    %447 = vector.load %arg14[%446, %c0_113] : memref<64x384xf32, #tpu.memory_space<vmem>>, vector<8x384xf32>
    %cst_114 = arith.constant dense<0.000000e+00> : vector<8x384xf32>
    %448 = tpu.matmul %441, %252, %cst_114 {dimension_numbers = #tpu.dot_dimension_numbers<[1], [0], [0], [1], [0, 0, 1, 1], [], []>} : vector<8x128xf32>, vector<128x384xf32>, vector<8x384xf32> -> vector<8x384xf32>
    %449 = vector.broadcast %253 : vector<1x384xf32> to vector<8x384xf32>
    %450 = arith.addf %448, %449 : vector<8x384xf32>
    %451 = vector.extract_strided_slice %447 {offsets = [0, 0], sizes = [8, 256], strides = [1, 1]} : vector<8x384xf32> to vector<8x256xf32>
    %452 = vector.extract_strided_slice %450 {offsets = [0, 0], sizes = [8, 256], strides = [1, 1]} : vector<8x384xf32> to vector<8x256xf32>
    %453 = arith.addf %451, %452 : vector<8x256xf32>
    %454 = arith.negf %453 : vector<8x256xf32>
    %455 = math.exp %454 : vector<8x256xf32>
    %cst_115 = arith.constant 1.000000e+00 : f32
    %456 = vector.broadcast %cst_115 : f32 to vector<8x256xf32>
    %457 = arith.addf %456, %455 : vector<8x256xf32>
    %458 = arith.divf %456, %457 : vector<8x256xf32>
    %459 = vector.extract_strided_slice %458 {offsets = [0, 0], sizes = [8, 128], strides = [1, 1]} : vector<8x256xf32> to vector<8x128xf32>
    %460 = vector.extract_strided_slice %458 {offsets = [0, 128], sizes = [8, 128], strides = [1, 1]} : vector<8x256xf32> to vector<8x128xf32>
    %461 = vector.extract_strided_slice %447 {offsets = [0, 256], sizes = [8, 128], strides = [1, 1]} : vector<8x384xf32> to vector<8x128xf32>
    %462 = vector.extract_strided_slice %450 {offsets = [0, 256], sizes = [8, 128], strides = [1, 1]} : vector<8x384xf32> to vector<8x128xf32>
    %463 = arith.mulf %459, %462 : vector<8x128xf32>
    %464 = arith.addf %461, %463 : vector<8x128xf32>
    %465 = math.tanh %464 : vector<8x128xf32>
    %466 = arith.subf %441, %465 : vector<8x128xf32>
    %467 = arith.mulf %460, %466 : vector<8x128xf32>
    %468 = arith.addf %465, %467 : vector<8x128xf32>
    %469 = arith.index_cast %445 : i32 to index
    %c0_116 = arith.constant 0 : index
    %470 = vector.load %arg15[%469, %c0_116] : memref<64x128xf32, #tpu.memory_space<vmem>>, vector<8x128xf32>
    tpu.vector_store %arg15[%469, %c0_116], %468 {strides = array<i32>} : memref<64x128xf32, #tpu.memory_space<vmem>>, vector<8x128xf32>,
    %c8_i32_117 = arith.constant 8 : i32
    %c0_118 = arith.constant 0 : index
    %c0_119 = arith.constant 0 : index
    %471 = vector.load %arg10[%c0_118, %c0_119] : memref<8x64xf32, #tpu.memory_space<vmem>>, vector<8x64xf32>
    %c0_120 = arith.constant 0 : index
    %c0_121 = arith.constant 0 : index
    %472 = vector.load %arg15[%c0_120, %c0_121] : memref<64x128xf32, #tpu.memory_space<vmem>>, vector<64x128xf32>
    %cst_122 = arith.constant dense<0.000000e+00> : vector<8x128xf32>
    %473 = tpu.matmul %471, %472, %cst_122 {dimension_numbers = #tpu.dot_dimension_numbers<[1], [0], [0], [1], [0, 0, 1, 1], [], []>} : vector<8x64xf32>, vector<64x128xf32>, vector<8x128xf32> -> vector<8x128xf32>
    %c0_123 = arith.constant 0 : index
    %c0_124 = arith.constant 0 : index
    %474 = vector.load %arg11[%c0_123, %c0_124] : memref<128x128xf32, #tpu.memory_space<vmem>>, vector<128x128xf32>
    %cst_125 = arith.constant dense<0.000000e+00> : vector<8x128xf32>
    %475 = tpu.matmul %473, %474, %cst_125 {dimension_numbers = #tpu.dot_dimension_numbers<[1], [0], [0], [1], [0, 0, 1, 1], [], []>} : vector<8x128xf32>, vector<128x128xf32>, vector<8x128xf32> -> vector<8x128xf32>
    %c0_126 = arith.constant 0 : index
    %c0_127 = arith.constant 0 : index
    %476 = vector.load %arg12[%c0_126, %c0_127] : memref<1x128xf32, #tpu.memory_space<vmem>>, vector<1x128xf32>
    %477 = vector.broadcast %476 : vector<1x128xf32> to vector<8x128xf32>
    %478 = arith.addf %475, %477 : vector<8x128xf32>
    %c0_128 = arith.constant 0 : index
    %c0_129 = arith.constant 0 : index
    %479 = vector.load %arg13[%c0_128, %c0_129] : memref<8x128xf32, #tpu.memory_space<vmem>>, vector<8x128xf32>
    tpu.vector_store %arg13[%c0_128, %c0_129], %478 {strides = array<i32>} : memref<8x128xf32, #tpu.memory_space<vmem>>, vector<8x128xf32>,
    return
  }
  func.func @transform_0(%arg0: i32) -> (i32, i32) {
    %c0_i32 = arith.constant 0 : i32
    %c0_i32_0 = arith.constant 0 : i32
    %c0_i32_1 = arith.constant 0 : i32
    return %c0_i32, %c0_i32_0 : i32, i32
  }
  func.func @transform_1(%arg0: i32) -> (i32, i32) {
    %c0_i32 = arith.constant 0 : i32
    %c0_i32_0 = arith.constant 0 : i32
    %c0_i32_1 = arith.constant 0 : i32
    return %c0_i32, %c0_i32_0 : i32, i32
  }
  func.func @transform_2(%arg0: i32) -> (i32, i32) {
    %c0_i32 = arith.constant 0 : i32
    %c0_i32_0 = arith.constant 0 : i32
    %c0_i32_1 = arith.constant 0 : i32
    return %c0_i32, %c0_i32_0 : i32, i32
  }
  func.func @transform_3(%arg0: i32) -> (i32, i32) {
    %c0_i32 = arith.constant 0 : i32
    %c0_i32_0 = arith.constant 0 : i32
    %c0_i32_1 = arith.constant 0 : i32
    return %c0_i32, %c0_i32_0 : i32, i32
  }
  func.func @transform_4(%arg0: i32) -> (i32, i32) {
    %c0_i32 = arith.constant 0 : i32
    %c0_i32_0 = arith.constant 0 : i32
    %c0_i32_1 = arith.constant 0 : i32
    return %c0_i32, %c0_i32_0 : i32, i32
  }
  func.func @transform_5(%arg0: i32) -> (i32, i32) {
    %c0_i32 = arith.constant 0 : i32
    %c0_i32_0 = arith.constant 0 : i32
    %c0_i32_1 = arith.constant 0 : i32
    return %c0_i32, %c0_i32_0 : i32, i32
  }
  func.func @transform_6(%arg0: i32) -> (i32, i32) {
    %c0_i32 = arith.constant 0 : i32
    %c0_i32_0 = arith.constant 0 : i32
    %c0_i32_1 = arith.constant 0 : i32
    return %c0_i32, %c0_i32_0 : i32, i32
  }
  func.func @transform_7(%arg0: i32) -> (i32, i32) {
    %c0_i32 = arith.constant 0 : i32
    %c0_i32_0 = arith.constant 0 : i32
    %c0_i32_1 = arith.constant 0 : i32
    return %c0_i32, %c0_i32_0 : i32, i32
  }
  func.func @transform_8(%arg0: i32) -> (i32, i32) {
    %c0_i32 = arith.constant 0 : i32
    %c0_i32_0 = arith.constant 0 : i32
    %c0_i32_1 = arith.constant 0 : i32
    return %c0_i32, %c0_i32_0 : i32, i32
  }
  func.func @transform_9(%arg0: i32) -> (i32, i32) {
    %c0_i32 = arith.constant 0 : i32
    %c0_i32_0 = arith.constant 0 : i32
    %c0_i32_1 = arith.constant 0 : i32
    return %c0_i32, %c0_i32_0 : i32, i32
  }
  func.func @transform_10(%arg0: i32) -> (i32, i32) {
    %c0_i32 = arith.constant 0 : i32
    %c0_i32_0 = arith.constant 0 : i32
    %c0_i32_1 = arith.constant 0 : i32
    return %c0_i32, %c0_i32_0 : i32, i32
  }
  func.func @transform_11(%arg0: i32) -> (i32, i32) {
    %c0_i32 = arith.constant 0 : i32
    %c0_i32_0 = arith.constant 0 : i32
    %c0_i32_1 = arith.constant 0 : i32
    return %c0_i32, %c0_i32_0 : i32, i32
  }
  func.func @transform_12(%arg0: i32) -> (i32, i32) {
    %c0_i32 = arith.constant 0 : i32
    %c0_i32_0 = arith.constant 0 : i32
    %c0_i32_1 = arith.constant 0 : i32
    return %c0_i32, %c0_i32_0 : i32, i32
  }
}

</mosaic_0001>

<bundles_post_ra>
// kernel: gru_model_forward.1
= control target key start
LH: loop header
LB: loop body
LE: loop exit
PB: predicated region body
PF: predicated region fallthrough
CT: control target
= control target key end

     0   :  { %v10443_v4 = vmov 0.0   ;;  %s10416_s0 = inlined_call_operand.vmem [shape: f32[64,128], index: 0, kind: input, shape index: {}]   ;;  %s10417_s1 = inlined_call_operand.vmem [shape: f32[128,384], index: 1, kind: input, shape index: {}]   ;;  %s10418_s2 = inlined_call_operand.vmem [shape: f32[1,384], index: 2, kind: input, shape index: {}]   ;;  %s10419_s3 = inlined_call_operand.vmem [shape: f32[128,384], index: 3, kind: input, shape index: {}]   ;;  %s10420_s4 = inlined_call_operand.vmem [shape: f32[1,384], index: 4, kind: input, shape index: {}]   ;;  %s10421_s5 = inlined_call_operand.vmem [shape: f32[128,384], index: 5, kind: input, shape index: {}]   ;;  %s10422_s6 = inlined_call_operand.vmem [shape: f32[1,384], index: 6, kind: input, shape index: {}]   ;;  %s10423_s7 = inlined_call_operand.vmem [shape: f32[128,384], index: 7, kind: input, shape index: {}]   ;;  %s10424_s8 = inlined_call_operand.vmem [shape: f32[1,384], index: 8, kind: input, shape index: {}]   ;;  %s10425_s9 = inlined_call_operand.vmem [shape: f32[8,64], index: 9, kind: input, shape index: {}]   ;;  %s10426_s10 = inlined_call_operand.vmem [shape: f32[128,128], index: 10, kind: input, shape index: {}]   ;;  %s10427_s11 = inlined_call_operand.vmem [shape: f32[1,128], index: 11, kind: input, shape index: {}]   ;;  %s10428_s12 = inlined_call_operand.hbm [shape: f32[8,128], index: 12, kind: output, shape index: {}]  }
   0x1   :  { %v96_v0 = vld [vmem:[%s10417_s1 + $0x170] sm:$0xff]  ;;  %v95_v1 = vld [vmem:[%s10417_s1 + $0x168] sm:$0xff]  ;;  %v93_v2 = vld [vmem:[%s10417_s1 + $0x158] sm:$0xff]  ;;  %179 = vmatprep.mubr.f32.mxu0 %v10443_v4 }
   0x2   :  { %115 = vmatprep.subr.mxu0 %v96_v0  ;;  %v92_v3 = vld [vmem:[%s10417_s1 + $0x150] sm:$0xff]  ;;  %v90_v5 = vld [vmem:[%s10417_s1 + $0x140] sm:$0xff]  ;;  %v89_v6 = vld [vmem:[%s10417_s1 + $0x138] sm:$0xff] }
   0x3   :  { %116 = vmatpush1.msra.mxu0 %v95_v1  ;;  %v87_v7 = vld [vmem:[%s10417_s1 + $0x128] sm:$0xff]  ;;  %v86_v8 = vld [vmem:[%s10417_s1 + $0x120] sm:$0xff]  ;;  %v84_v9 = vld [vmem:[%s10417_s1 + $0x110] sm:$0xff] }
   0x4   :  { %117 = vmatprep.subr.mxu0 %v93_v2  ;;  %v83_v10 = vld [vmem:[%s10417_s1 + $0x108] sm:$0xff]  ;;  %v81_v11 = vld [vmem:[%s10417_s1 + $0xf8] sm:$0xff]  ;;  %v80_v12 = vld [vmem:[%s10417_s1 + $0xf0] sm:$0xff] }
   0x5   :  { %118 = vmatpush1.msra.mxu0 %v92_v3  ;;  %v78_v13 = vld [vmem:[%s10417_s1 + $0xe0] sm:$0xff]  ;;  %v77_v15 = vld [vmem:[%s10417_s1 + $0xd8] sm:$0xff]  ;;  %v75_v17 = vld [vmem:[%s10417_s1 + $0xc8] sm:$0xff] }
   0x6   :  { %119 = vmatprep.subr.mxu0 %v90_v5  ;;  %v6531_v14 = vld [vmem:[%s10416_s0] sm:$0xff]  ;;  %v97_v16 = vld [vmem:[%s10417_s1 + $0x178] sm:$0xff]  ;;  %v91_v20 = vld [vmem:[%s10417_s1 + $0x148] sm:$0xff] }
   0x7   :  { %120 = vmatpush1.msra.mxu0 %v89_v6  ;;  %5089 = vmatprep.mubr.f32.mxu1 %v6531_v14  ;;  %v94_v18 = vld [vmem:[%s10417_s1 + $0x160] sm:$0xff]  ;;  %v72_v21 = vld [vmem:[%s10417_s1 + $0xb0] sm:$0xff]  ;;  %v71_v22 = vld [vmem:[%s10417_s1 + $0xa8] sm:$0xff] }
   0x8   :  { %121 = vmatprep.subr.mxu0 %v87_v7  ;;  %5057 = vmatprep.subr.mxu1 %v97_v16  ;;  %v74_v19 = vld [vmem:[%s10417_s1 + $0xc0] sm:$0xff]  ;;  %v88_v23 = vld [vmem:[%s10417_s1 + $0x130] sm:$0xff]  ;;  %v69_v24 = vld [vmem:[%s10417_s1 + $0x98] sm:$0xff] }
   0x9   :  { %122 = vmatpush1.msra.mxu0 %v86_v8  ;;  %5058 = vmatpush3.msra.mxu1 %v97_v16  ;;  %v68_v25 = vld [vmem:[%s10417_s1 + $0x90] sm:$0xff]  ;;  %v85_v26 = vld [vmem:[%s10417_s1 + $0x118] sm:$0xff]  ;;  %v66_v27 = vld [vmem:[%s10417_s1 + $0x80] sm:$0xff] }
   0xa   :  { %123 = vmatprep.subr.mxu0 %v84_v9  ;;  %5059 = vmatprep.subr.mxu1 %v94_v18  ;;  %v65_v28 = vld [vmem:[%s10417_s1 + $0x78] sm:$0xff]  ;;  %v82_v29 = vld [vmem:[%s10417_s1 + $0x100] sm:$0xff]  ;;  %v63_v30 = vld [vmem:[%s10417_s1 + $0x68] sm:$0xff] }
   0xb   :  { %124 = vmatpush1.msra.mxu0 %v83_v10  ;;  %5060 = vmatpush3.msra.mxu1 %v94_v18  ;;  %v62_v31 = vld [vmem:[%s10417_s1 + $0x60] sm:$0xff]  ;;  %v79_v32 = vld [vmem:[%s10417_s1 + $0xe8] sm:$0xff]  ;;  %v60_v33 = vld [vmem:[%s10417_s1 + $0x50] sm:$0xff] }
   0xc   :  { %125 = vmatprep.subr.mxu0 %v81_v11  ;;  %5061 = vmatprep.subr.mxu1 %v91_v20  ;;  %v59_v34 = vld [vmem:[%s10417_s1 + $0x48] sm:$0xff]  ;;  %v76_v35 = vld [vmem:[%s10417_s1 + $0xd0] sm:$0xff]  ;;  %v57_v36 = vld [vmem:[%s10417_s1 + $0x38] sm:$0xff] }
   0xd   :  { %126 = vmatpush1.msra.mxu0 %v80_v12  ;;  %5062 = vmatpush3.msra.mxu1 %v91_v20  ;;  %v56_v37 = vld [vmem:[%s10417_s1 + $0x30] sm:$0xff]  ;;  %v73_v38 = vld [vmem:[%s10417_s1 + $0xb8] sm:$0xff]  ;;  %v54_v39 = vld [vmem:[%s10417_s1 + $0x20] sm:$0xff] }
   0xe   :  { %127 = vmatprep.subr.mxu0 %v78_v13  ;;  %5063 = vmatprep.subr.mxu1 %v88_v23  ;;  %v53_v40 = vld [vmem:[%s10417_s1 + $0x18] sm:$0xff]  ;;  %v70_v41 = vld [vmem:[%s10417_s1 + $0xa0] sm:$0xff]  ;;  %v51_v42 = vld [vmem:[%s10417_s1 + $0x8] sm:$0xff] }
   0xf   :  { %128 = vmatpush1.msra.mxu0 %v77_v15  ;;  %5064 = vmatpush3.msra.mxu1 %v88_v23  ;;  %v50_v43 = vld [vmem:[%s10417_s1] sm:$0xff]  ;;  %v67_v44 = vld [vmem:[%s10417_s1 + $0x88] sm:$0xff]  ;;  %v6627_v45 = vld [vmem:[%s10419_s3 + $0x170] sm:$0xff] }
  0x10   :  { %129 = vmatprep.subr.mxu0 %v75_v17  ;;  %5065 = vmatprep.subr.mxu1 %v85_v26  ;;  %10697 = vst [vmem:[#allocation7_spill] sm:$0xff] %v6627_v45  ;;  %v6632_v46 = vld [vmem:[%s10419_s3 + $0x168] sm:$0xff]  ;;  %v6637_v47 = vld [vmem:[%s10419_s3 + $0x158] sm:$0xff]  ;;  %v6644_v48 = vld [vmem:[%s10419_s3 + $0x150] sm:$0xff] }
  0x11   :  { %130 = vmatpush1.msra.mxu0 %v74_v19  ;;  %5066 = vmatpush3.msra.mxu1 %v85_v26  ;;  %v64_v49 = vld [vmem:[%s10417_s1 + $0x70] sm:$0xff]  ;;  %v6654_v50 = vld [vmem:[%s10416_s0 + $0x8] sm:$0xff]  ;;  %v6659_v51 = vld [vmem:[%s10419_s3 + $0x140] sm:$0xff] }
  0x12   :  { %131 = vmatprep.subr.mxu0 %v72_v21  ;;  %5067 = vmatprep.subr.mxu1 %v82_v29  ;;  %v6665_v52 = vld [vmem:[%s10419_s3 + $0x138] sm:$0xff] }
  0x13   :  { %132 = vmatpush1.msra.mxu0 %v71_v22  ;;  %5068 = vmatpush3.msra.mxu1 %v82_v29 }
  0x14   :  { %133 = vmatprep.subr.mxu0 %v69_v24  ;;  %5069 = vmatprep.subr.mxu1 %v79_v32 }
  0x15   :  { %134 = vmatpush1.msra.mxu0 %v68_v25  ;;  %5070 = vmatpush3.msra.mxu1 %v79_v32 }
  0x16   :  { %135 = vmatprep.subr.mxu0 %v66_v27  ;;  %5071 = vmatprep.subr.mxu1 %v76_v35 }
  0x17   :  { %136 = vmatpush1.msra.mxu0 %v65_v28  ;;  %5072 = vmatpush3.msra.mxu1 %v76_v35 }
  0x18   :  { %137 = vmatprep.subr.mxu0 %v63_v30  ;;  %5073 = vmatprep.subr.mxu1 %v73_v38 }
  0x19   :  { %138 = vmatpush1.msra.mxu0 %v62_v31  ;;  %5074 = vmatpush3.msra.mxu1 %v73_v38 }
  0x1a   :  { %139 = vmatprep.subr.mxu0 %v60_v33  ;;  %5075 = vmatprep.subr.mxu1 %v70_v41 }
  0x1b   :  { %140 = vmatpush1.msra.mxu0 %v59_v34  ;;  %5076 = vmatpush3.msra.mxu1 %v70_v41 }
  0x1c   :  { %141 = vmatprep.subr.mxu0 %v57_v36  ;;  %5077 = vmatprep.subr.mxu1 %v67_v44 }
  0x1d   :  { %142 = vmatpush1.msra.mxu0 %v56_v37  ;;  %5078 = vmatpush3.msra.mxu1 %v67_v44 }
  0x1e   :  { %143 = vmatprep.subr.mxu0 %v54_v39 }
  0x1f   :  { %144 = vmatpush1.msra.mxu0 %v53_v40 }
  0x20   :  { %145 = vmatprep.subr.mxu0 %v51_v42 }
  0x21   :  { %146 = vmatpush1.msra.mxu0 %v50_v43 }
  0x22   :  { %180 = vmatmul.mubr.f32.vlgmr.msra.gmra.mxu0 %v6531_v14  ;;  %477 = vmatprep.subr.mxu0 %v6627_v45 }
  0x23   :  { %478 = vmatpush1.msra.mxu0 %v6632_v46  ;;  %185 = vmatprep.mubr.f32.mxu0 %v10443_v4 }
  0x24   :  { %479 = vmatprep.subr.mxu0 %v6637_v47 }
  0x25   :  { %17 = vsyncpa [#allocation5], 0  ;;  %480 = vmatpush1.msra.mxu0 %v6644_v48  ;;  %v6671_v53 = vld [vmem:[%s10419_s3 + $0x128] sm:$0xff]  ;;  %5079 = vmatprep.subr.mxu1 %v64_v49  ;;  %v6678_v54 = vld [vmem:[%s10419_s3 + $0x120] sm:$0xff]  ;;  %vm6421_vm0 = vmmov 0   ;;  %vm4376_vm1 = vcmask 523264  }
  0x26   :  { %186 = vmatmul.mubr.f32.gmra.mxu0 %v6654_v50  ;;  %481 = vmatprep.subr.mxu0 %v6659_v51  ;;  %v61_v55 = vld [vmem:[%s10417_s1 + $0x58] sm:$0xff]  ;;  %v6688_v56 = vld [vmem:[%s10416_s0 + $0x10] sm:$0xff]  ;;  %v6699_v58 = vld [vmem:[%s10419_s3 + $0x108] sm:$0xff] }
  0x27   :  { %482 = vmatpush1.msra.mxu0 %v6665_v52  ;;  %191 = vmatprep.mubr.f32.mxu0 %v10443_v4  ;;  %v6693_v57 = vld [vmem:[%s10419_s3 + $0x110] sm:$0xff]  ;;  %v6705_v59 = vld [vmem:[%s10419_s3 + $0xf8] sm:$0xff]  ;;  %v58_v61 = vld [vmem:[%s10417_s1 + $0x40] sm:$0xff] }
  0x28   :  { %483 = vmatprep.subr.mxu0 %v6671_v53  ;;  %5080 = vmatpush3.msra.mxu1 %v64_v49  ;;  %v6712_v60 = vld [vmem:[%s10419_s3 + $0xf0] sm:$0xff]  ;;  %v6722_v62 = vld [vmem:[%s10416_s0 + $0x18] sm:$0xff]  ;;  %v6727_v63 = vld [vmem:[%s10419_s3 + $0xe0] sm:$0xff] }
  0x29   :  { %484 = vmatpush1.msra.mxu0 %v6678_v54  ;;  %5081 = vmatprep.subr.mxu1 %v61_v55  ;;  %v6733_v0 = vld [vmem:[%s10419_s3 + $0xd8] sm:$0xff]  ;;  %v6739_v1 = vld [vmem:[%s10419_s3 + $0xc8] sm:$0xff]  ;;  %v6746_v2 = vld [vmem:[%s10419_s3 + $0xc0] sm:$0xff] }
  0x2a   :  { %192 = vmatmul.mubr.f32.gmra.mxu0 %v6688_v56  ;;  %485 = vmatprep.subr.mxu0 %v6693_v57  ;;  %v55_v3 = vld [vmem:[%s10417_s1 + $0x28] sm:$0xff]  ;;  %v6756_v5 = vld [vmem:[%s10416_s0 + $0x20] sm:$0xff]  ;;  %v6761_v6 = vld [vmem:[%s10419_s3 + $0xb0] sm:$0xff] }
  0x2b   :  { %486 = vmatpush1.msra.mxu0 %v6699_v58  ;;  %197 = vmatprep.mubr.f32.mxu0 %v10443_v4  ;;  %v6767_v7 = vld [vmem:[%s10419_s3 + $0xa8] sm:$0xff]  ;;  %v6773_v8 = vld [vmem:[%s10419_s3 + $0x98] sm:$0xff]  ;;  %v6780_v9 = vld [vmem:[%s10419_s3 + $0x90] sm:$0xff] }
  0x2c   :  { %487 = vmatprep.subr.mxu0 %v6705_v59  ;;  %5082 = vmatpush3.msra.mxu1 %v61_v55  ;;  %v52_v10 = vld [vmem:[%s10417_s1 + $0x10] sm:$0xff]  ;;  %v47_v11 = vld [vmem:[%s10416_s0 + $0x28] sm:$0xff]  ;;  %v6793_v12 = vld [vmem:[%s10419_s3 + $0x80] sm:$0xff] }
  0x2d   :  { %488 = vmatpush1.msra.mxu0 %v6712_v60  ;;  %5083 = vmatprep.subr.mxu1 %v58_v61  ;;  %v6799_v13 = vld [vmem:[%s10419_s3 + $0x78] sm:$0xff]  ;;  %v6805_v14 = vld [vmem:[%s10419_s3 + $0x68] sm:$0xff]  ;;  %v6811_v15 = vld [vmem:[%s10419_s3 + $0x60] sm:$0xff] }
  0x2e   :  { %198 = vmatmul.mubr.f32.gmra.mxu0 %v6722_v62  ;;  %489 = vmatprep.subr.mxu0 %v6727_v63  ;;  %v48_v16 = vld [vmem:[%s10416_s0 + $0x30] sm:$0xff]  ;;  %v6827_v18 = vld [vmem:[%s10419_s3 + $0x48] sm:$0xff]  ;;  %v6833_v19 = vld [vmem:[%s10419_s3 + $0x38] sm:$0xff] }
  0x2f   :  { %490 = vmatpush1.msra.mxu0 %v6733_v0  ;;  %203 = vmatprep.mubr.f32.mxu0 %v10443_v4  ;;  %v6821_v17 = vld [vmem:[%s10419_s3 + $0x50] sm:$0xff]  ;;  %v6845_v21 = vld [vmem:[%s10419_s3 + $0x178] sm:$0xff]  ;;  %v6855_v23 = vld [vmem:[%s10419_s3 + $0x20] sm:$0xff] }
  0x30   :  { %491 = vmatprep.subr.mxu0 %v6739_v1  ;;  %5084 = vmatpush3.msra.mxu1 %v58_v61  ;;  %v6840_v20 = vld [vmem:[%s10419_s3 + $0x30] sm:$0xff]  ;;  %v49_v22 = vld [vmem:[%s10416_s0 + $0x38] sm:$0xff]  ;;  %10699 = vst [vmem:[#allocation9_spill] sm:$0xff] %v6855_v23  ;;  %v6868_v25 = vld [vmem:[%s10419_s3 + $0x8] sm:$0xff] }
  0x31   :  { %492 = vmatpush1.msra.mxu0 %v6746_v2  ;;  %5085 = vmatprep.subr.mxu1 %v55_v3  ;;  %10698 = vst [vmem:[#allocation8_spill] sm:$0xff] %v6840_v20  ;;  %v6861_v24 = vld [vmem:[%s10419_s3 + $0x18] sm:$0xff]  ;;  %10701 = vst [vmem:[#allocation11_spill] sm:$0xff] %v6868_v25  ;;  %v6875_v26 = vld [vmem:[%s10419_s3] sm:$0xff] }
  0x32   :  { %204 = vmatmul.mubr.f32.gmra.mxu0 %v6756_v5  ;;  %493 = vmatprep.subr.mxu0 %v6761_v6  ;;  %10700 = vst [vmem:[#allocation10_spill] sm:$0xff] %v6861_v24  ;;  %10702 = vst [vmem:[#allocation12_spill] sm:$0xff] %v6875_v26  ;;  %v6880_v27 = vld [vmem:[%s10419_s3 + $0x160] sm:$0xff]  ;;  %v6889_v28 = vld [vmem:[%s10419_s3 + $0x148] sm:$0xff] }
  0x33   :  { %494 = vmatpush1.msra.mxu0 %v6767_v7  ;;  %209 = vmatprep.mubr.f32.mxu0 %v10443_v4  ;;  %v6898_v29 = vld [vmem:[%s10419_s3 + $0x130] sm:$0xff]  ;;  %v6906_v30 = vld [vmem:[%s10419_s3 + $0x118] sm:$0xff]  ;;  %v6915_v31 = vld [vmem:[%s10419_s3 + $0x100] sm:$0xff] }
  0x34   :  { %495 = vmatprep.subr.mxu0 %v6773_v8  ;;  %5086 = vmatpush3.msra.mxu1 %v55_v3  ;;  %v6923_v32 = vld [vmem:[%s10419_s3 + $0xe8] sm:$0xff]  ;;  %v6930_v33 = vld [vmem:[%s10419_s3 + $0xd0] sm:$0xff]  ;;  %v6937_v34 = vld [vmem:[%s10419_s3 + $0xb8] sm:$0xff] }
  0x35   :  { %496 = vmatpush1.msra.mxu0 %v6780_v9  ;;  %5087 = vmatprep.subr.mxu1 %v52_v10  ;;  %v6946_v35 = vld [vmem:[%s10419_s3 + $0xa0] sm:$0xff]  ;;  %v6953_v36 = vld [vmem:[%s10419_s3 + $0x88] sm:$0xff]  ;;  %v6960_v37 = vld [vmem:[%s10419_s3 + $0x70] sm:$0xff] }
  0x36   :  { %210 = vmatmul.mubr.f32.gmra.mxu0 %v47_v11  ;;  %497 = vmatprep.subr.mxu0 %v6793_v12  ;;  %v6967_v38 = vld [vmem:[%s10419_s3 + $0x58] sm:$0xff]  ;;  %v6974_v39 = vld [vmem:[%s10419_s3 + $0x40] sm:$0xff]  ;;  %v6981_v40 = vld [vmem:[%s10419_s3 + $0x28] sm:$0xff] }
  0x37   :  { %498 = vmatpush1.msra.mxu0 %v6799_v13  ;;  %215 = vmatprep.mubr.f32.mxu0 %v10443_v4  ;;  %10703 = vst [vmem:[#allocation13_spill] sm:$0xff] %v6974_v39  ;;  %10704 = vst [vmem:[#allocation14_spill] sm:$0xff] %v6981_v40  ;;  %v6988_v41 = vld [vmem:[%s10419_s3 + $0x10] sm:$0xff]  ;;  %v7005_v43 = vld [vmem:[%s10421_s5 + $0x168] sm:$0xff] }
  0x38   :  { %499 = vmatprep.subr.mxu0 %v6805_v14  ;;  %5088 = vmatpush3.msra.mxu1 %v52_v10  ;;  %10705 = vst [vmem:[#allocation15_spill] sm:$0xff] %v6988_v41  ;;  %v7000_v42 = vld [vmem:[%s10421_s5 + $0x170] sm:$0xff]  ;;  %10707 = vst [vmem:[#allocation17_spill] sm:$0xff] %v7005_v43  ;;  %v7010_v44 = vld [vmem:[%s10421_s5 + $0x178] sm:$0xff] }
  0x39   :  { %500 = vmatpush1.msra.mxu0 %v6811_v15  ;;  %5101 = vmatprep.subr.mxu1 %v10443_v4  ;;  %10706 = vst [vmem:[#allocation16_spill] sm:$0xff] %v7000_v42  ;;  %10708 = vst [vmem:[#allocation18_spill] sm:$0xff] %v7010_v44  ;;  %v7017_v49 = vld [vmem:[%s10421_s5 + $0x158] sm:$0xff]  ;;  %v7027_v55 = vld [vmem:[%s10421_s5 + $0x160] sm:$0xff] }
  0x3a   :  { %216 = vmatmul.mubr.f32.gmra.mxu0 %v48_v16  ;;  %501 = vmatprep.subr.mxu0 %v6821_v17  ;;  %10709 = vst [vmem:[#allocation19_spill] sm:$0xff] %v7017_v49  ;;  %10711 = vst [vmem:[#allocation21_spill] sm:$0xff] %v7027_v55  ;;  %v7044_v61 = vld [vmem:[%s10421_s5 + $0x138] sm:$0xff]  ;;  %v7056_v3 = vld [vmem:[%s10421_s5 + $0x128] sm:$0xff] }
  0x3b   :  { %502 = vmatpush1.msra.mxu0 %v6827_v18  ;;  %221 = vmatprep.mubr.f32.mxu0 %v10443_v4  ;;  %10713 = vst [vmem:[#allocation23_spill] sm:$0xff] %v7044_v61  ;;  %10715 = vst [vmem:[#allocation25_spill] sm:$0xff] %v7056_v3  ;;  %v7068_v10 = vld [vmem:[%s10421_s5 + $0x130] sm:$0xff] }
  0x3c   :  { %503 = vmatprep.subr.mxu0 %v6833_v19  ;;  %5090 = vmatmul.mubr.f32.vlgmr.msra.gmra.mxu1 %v6654_v50  ;;  %v7022_v50 = vld [vmem:[%s10421_s5 + $0x150] sm:$0xff]  ;;  %10717 = vst [vmem:[#allocation27_spill] sm:$0xff] %v7068_v10 }
  0x3d   :  { %504 = vmatpush1.msra.mxu0 %v6840_v20  ;;  %5102 = vmatpush3.msra.mxu1 %v6845_v21  ;;  %10710 = vst [vmem:[#allocation20_spill] sm:$0xff] %v7022_v50 }
  0x3e   :  { %222 = vmatmul.mubr.f32.gmra.mxu0 %v49_v22  ;;  %505 = vmatprep.subr.mxu0 %v6855_v23 }
  0x3f   :  { %506 = vmatpush1.msra.mxu0 %v6861_v24  ;;  %541 = vmatprep.mubr.f32.mxu0 %v10443_v4 }
  0x40   :  { %507 = vmatprep.subr.mxu0 %v6868_v25  ;;  %5103 = vmatprep.subr.mxu1 %v10443_v4 }
  0x41   :  { %508 = vmatpush1.msra.mxu0 %v6875_v26  ;;  %5104 = vmatpush3.msra.mxu1 %v6880_v27 }
  0x42   :  { %542 = vmatmul.mubr.f32.vlgmr.msra.gmra.mxu0 %v10443_v4  ;;  %5105 = vmatprep.subr.mxu1 %v10443_v4 }
  0x43   :  { %5106 = vmatpush3.msra.mxu1 %v6889_v28  ;;  %5092 = vmatprep.mubr.f32.mxu1 %v6688_v56  ;;  %v7034_v56 = vld [vmem:[%s10421_s5 + $0x140] sm:$0xff] }
  0x44   :  { %5107 = vmatprep.subr.mxu1 %v10443_v4  ;;  %5093 = vmatmul.mubr.f32.gmra.mxu1 %v6722_v62  ;;  %10712 = vst [vmem:[#allocation22_spill] sm:$0xff] %v7034_v56  ;;  %v7049_v62 = vld [vmem:[%s10421_s5 + $0x148] sm:$0xff] }
  0x45   :  { %5108 = vmatpush3.msra.mxu1 %v6898_v29  ;;  %5095 = vmatprep.mubr.f32.mxu1 %v6756_v5  ;;  %10714 = vst [vmem:[#allocation24_spill] sm:$0xff] %v7049_v62  ;;  %v7063_v5 = vld [vmem:[%s10421_s5 + $0x120] sm:$0xff] }
  0x46   :  { %5109 = vmatprep.subr.mxu1 %v10443_v4  ;;  %718 = vmatprep.mubr.f32.mxu0 %v10443_v4  ;;  %10716 = vst [vmem:[#allocation26_spill] sm:$0xff] %v7063_v5 }
  0x47   :  { %5110 = vmatpush3.msra.mxu1 %v6906_v30  ;;  %654 = vmatprep.subr.mxu0 %v7000_v42 }
  0x48   :  { %5111 = vmatprep.subr.mxu1 %v10443_v4  ;;  %5096 = vmatmul.mubr.f32.gmra.mxu1 %v47_v11  ;;  %v7075_v11 = vld [vmem:[%s10421_s5 + $0x110] sm:$0xff] }
  0x49   :  { %5112 = vmatpush3.msra.mxu1 %v6915_v31  ;;  %5098 = vmatprep.mubr.f32.mxu1 %v48_v16  ;;  %10718 = vst [vmem:[#allocation28_spill] sm:$0xff] %v7075_v11  ;;  %v7082_v16 = vld [vmem:[%s10421_s5 + $0x108] sm:$0xff] }
  0x4a   :  { %5113 = vmatprep.subr.mxu1 %v10443_v4  ;;  %655 = vmatpush1.msra.mxu0 %v7005_v43  ;;  %10719 = vst [vmem:[#allocation29_spill] sm:$0xff] %v7082_v16 }
  0x4b   :  { %5114 = vmatpush3.msra.mxu1 %v6923_v32  ;;  %656 = vmatprep.subr.mxu0 %v7017_v49 }
  0x4c   :  { %5115 = vmatprep.subr.mxu1 %v10443_v4  ;;  %5099 = vmatmul.mubr.f32.gmra.mxu1 %v49_v22  ;;  %v7087_v22 = vld [vmem:[%s10421_s5 + $0x118] sm:$0xff] }
  0x4d   :  { %5116 = vmatpush3.msra.mxu1 %v6930_v33  ;;  %5133 = vmatprep.mubr.msk.f32.mxu1 %vm6421_vm0, %v10443_v4  ;;  %10720 = vst [vmem:[#allocation30_spill] sm:$0xff] %v7087_v22 }
  0x4e   :  { %5117 = vmatprep.subr.mxu1 %v10443_v4  ;;  %657 = vmatpush1.msra.mxu0 %v7022_v50 }
  0x4f   :  { %5118 = vmatpush3.msra.mxu1 %v6937_v34  ;;  %658 = vmatprep.subr.mxu0 %v7034_v56 }
  0x50   :  { %5119 = vmatprep.subr.mxu1 %v10443_v4  ;;  %659 = vmatpush1.msra.mxu0 %v7044_v61 }
  0x51   :  { %5120 = vmatpush3.msra.mxu1 %v6946_v35  ;;  %660 = vmatprep.subr.mxu0 %v7056_v3  ;;  %v7159_v3 = vld [vmem:[%s10421_s5 + $0xb8] sm:$0xff] }
  0x52   :  { %5121 = vmatprep.subr.mxu1 %v10443_v4  ;;  %661 = vmatpush1.msra.mxu0 %v7063_v5  ;;  %v7154_v5 = vld [vmem:[%s10421_s5 + $0xa8] sm:$0xff]  ;;  %10733 = vst [vmem:[#allocation42_spill] sm:$0xff] %v7159_v3 }
  0x53   :  { %5122 = vmatpush3.msra.mxu1 %v6953_v36  ;;  %662 = vmatprep.subr.mxu0 %v7075_v11  ;;  %v7094_v11 = vld [vmem:[%s10421_s5 + $0xf8] sm:$0xff]  ;;  %10732 = vst [vmem:[#allocation41_spill] sm:$0xff] %v7154_v5 }
  0x54   :  { %5123 = vmatprep.subr.mxu1 %v10443_v4  ;;  %663 = vmatpush1.msra.mxu0 %v7082_v16  ;;  %10721 = vst [vmem:[#allocation31_spill] sm:$0xff] %v7094_v11  ;;  %v7106_v16 = vld [vmem:[%s10421_s5 + $0x100] sm:$0xff] }
  0x55   :  { %5124 = vmatpush3.msra.mxu1 %v6960_v37  ;;  %664 = vmatprep.subr.mxu0 %v7094_v11  ;;  %10723 = vst [vmem:[#allocation33_spill] sm:$0xff] %v7106_v16  ;;  %v7113_v11 = vld [vmem:[%s10421_s5 + $0xe0] sm:$0xff] }
  0x56   :  { %5125 = vmatprep.subr.mxu1 %v10443_v4  ;;  %10724 = vst [vmem:[#allocation34_spill] sm:$0xff] %v7113_v11 }
  0x57   :  { %5126 = vmatpush3.msra.mxu1 %v6967_v38 }
  0x58   :  { %5127 = vmatprep.subr.mxu1 %v10443_v4 }
  0x59   :  { %5128 = vmatpush3.msra.mxu1 %v6974_v39 }
  0x5a   :  { %5129 = vmatprep.subr.mxu1 %v10443_v4 }
  0x5b   :  { %5130 = vmatpush3.msra.mxu1 %v6981_v40 }
  0x5c   :  { %5131 = vmatprep.subr.mxu1 %v10443_v4 }
  0x5d   :  { %5132 = vmatpush3.msra.mxu1 %v6988_v41 }
  0x5e   :  { %5134 = vmatmul.mubr.f32.vlgmr.msra.gmra.mxu1 %v10443_v4  ;;  %5136 = vmatprep.subr.mxu1 %v10443_v4 }
  0x5f   :  { %5168 = vmatprep.mubr.msk.f32.mxu1 %vm6421_vm0, %v10443_v4  ;;  %5137 = vmatpush3.msra.mxu1 %v7010_v44 }
  0x60   :  { %5138 = vmatprep.subr.mxu1 %v10443_v4 }
  0x61   :  { %5139 = vmatpush3.msra.mxu1 %v7027_v55 }
  0x62   :  { %5140 = vmatprep.subr.mxu1 %v10443_v4 }
  0x63   :  { %5141 = vmatpush3.msra.mxu1 %v7049_v62  ;;  %v7173_v62 = vld [vmem:[%s10421_s5 + $0x90] sm:$0xff] }
  0x64   :  { %5142 = vmatprep.subr.mxu1 %v10443_v4  ;;  %10735 = vst [vmem:[#allocation44_spill] sm:$0xff] %v7173_v62 }
  0x65   :  { %5143 = vmatpush3.msra.mxu1 %v7068_v10  ;;  %v7101_v10 = vld [vmem:[%s10421_s5 + $0xf0] sm:$0xff] }
  0x66   :  { %5144 = vmatprep.subr.mxu1 %v10443_v4  ;;  %10722 = vst [vmem:[#allocation32_spill] sm:$0xff] %v7101_v10  ;;  %665 = vmatpush1.msra.mxu0 %v7101_v10  ;;  %v7125_v10 = vld [vmem:[%s10421_s5 + $0xe8] sm:$0xff] }
  0x67   :  { %5145 = vmatpush3.msra.mxu1 %v7087_v22  ;;  %666 = vmatprep.subr.mxu0 %v7113_v11  ;;  %v7120_v22 = vld [vmem:[%s10421_s5 + $0xd8] sm:$0xff]  ;;  %10726 = vst [vmem:[#allocation36_spill] sm:$0xff] %v7125_v10  ;;  %v7132_v11 = vld [vmem:[%s10421_s5 + $0xc8] sm:$0xff] }
  0x68   :  { %5146 = vmatprep.subr.mxu1 %v10443_v4  ;;  %10725 = vst [vmem:[#allocation35_spill] sm:$0xff] %v7120_v22  ;;  %667 = vmatpush1.msra.mxu0 %v7120_v22  ;;  %10727 = vst [vmem:[#allocation37_spill] sm:$0xff] %v7132_v11  ;;  %v10730_v22 = vmov 0.0  }
  0x69   :  { %5147 = vmatpush3.msra.mxu1 %v7106_v16  ;;  %v7142_v16 = vld [vmem:[%s10421_s5 + $0xd0] sm:$0xff]  ;;  %668 = vmatprep.subr.mxu0 %v7132_v11  ;;  %v7166_v11 = vld [vmem:[%s10421_s5 + $0x98] sm:$0xff] }
  0x6a   :  { %5148 = vmatprep.subr.mxu1 %v10443_v4  ;;  %v7137_v4 = vld [vmem:[%s10421_s5 + $0xc0] sm:$0xff]  ;;  %10729 = vst [vmem:[#allocation39_spill] sm:$0xff] %v7142_v16  ;;  %10734 = vst [vmem:[#allocation43_spill] sm:$0xff] %v7166_v11 }
  0x6b   :  { %5149 = vmatpush3.msra.mxu1 %v7125_v10  ;;  %10728 = vst [vmem:[#allocation38_spill] sm:$0xff] %v7137_v4  ;;  %v7149_v10 = vld [vmem:[%s10421_s5 + $0xb0] sm:$0xff]  ;;  %669 = vmatpush1.msra.mxu0 %v7137_v4  ;;  %v7178_v4 = vld [vmem:[%s10421_s5 + $0xa0] sm:$0xff] }
  0x6c   :  { %5150 = vmatprep.subr.mxu1 %v10730_v22  ;;  %10731 = vst [vmem:[#allocation40_spill] sm:$0xff] %v7149_v10  ;;  %670 = vmatprep.subr.mxu0 %v7149_v10  ;;  %10736 = vst [vmem:[#allocation45_spill] sm:$0xff] %v7178_v4  ;;  %v7185_v10 = vld [vmem:[%s10421_s5 + $0x80] sm:$0xff] }
  0x6d   :  { %5151 = vmatpush3.msra.mxu1 %v7142_v16  ;;  %671 = vmatpush1.msra.mxu0 %v7154_v5  ;;  %10737 = vst [vmem:[#allocation46_spill] sm:$0xff] %v7185_v10  ;;  %v7192_v16 = vld [vmem:[%s10421_s5 + $0x78] sm:$0xff]  ;;  %v7197_v5 = vld [vmem:[%s10421_s5 + $0x88] sm:$0xff] }
  0x6e   :  { %5152 = vmatprep.subr.mxu1 %v10730_v22  ;;  %672 = vmatprep.subr.mxu0 %v7166_v11  ;;  %10738 = vst [vmem:[#allocation47_spill] sm:$0xff] %v7192_v16  ;;  %10739 = vst [vmem:[#allocation48_spill] sm:$0xff] %v7197_v5  ;;  %v7204_v11 = vld [vmem:[%s10421_s5 + $0x68] sm:$0xff] }
  0x6f   :  { %5153 = vmatpush3.msra.mxu1 %v7159_v3  ;;  %673 = vmatpush1.msra.mxu0 %v7173_v62  ;;  %10740 = vst [vmem:[#allocation49_spill] sm:$0xff] %v7204_v11  ;;  %v7211_v3 = vld [vmem:[%s10421_s5 + $0x60] sm:$0xff]  ;;  %v7216_v62 = vld [vmem:[%s10421_s5 + $0x70] sm:$0xff] }
  0x70   :  { %5154 = vmatprep.subr.mxu1 %v10730_v22  ;;  %674 = vmatprep.subr.mxu0 %v7185_v10  ;;  %10741 = vst [vmem:[#allocation50_spill] sm:$0xff] %v7211_v3  ;;  %10742 = vst [vmem:[#allocation51_spill] sm:$0xff] %v7216_v62  ;;  %v7223_v10 = vld [vmem:[%s10421_s5 + $0x50] sm:$0xff] }
  0x71   :  { %5155 = vmatpush3.msra.mxu1 %v7178_v4  ;;  %675 = vmatpush1.msra.mxu0 %v7192_v16  ;;  %10743 = vst [vmem:[#allocation52_spill] sm:$0xff] %v7223_v10  ;;  %v7230_v4 = vld [vmem:[%s10421_s5 + $0x48] sm:$0xff]  ;;  %v7235_v16 = vld [vmem:[%s10421_s5 + $0x58] sm:$0xff] }
  0x72   :  { %5156 = vmatprep.subr.mxu1 %v10730_v22  ;;  %676 = vmatprep.subr.mxu0 %v7204_v11  ;;  %10744 = vst [vmem:[#allocation53_spill] sm:$0xff] %v7230_v4  ;;  %10745 = vst [vmem:[#allocation54_spill] sm:$0xff] %v7235_v16  ;;  %v7242_v11 = vld [vmem:[%s10421_s5 + $0x38] sm:$0xff] }
  0x73   :  { %5157 = vmatpush3.msra.mxu1 %v7197_v5  ;;  %677 = vmatpush1.msra.mxu0 %v7211_v3  ;;  %10746 = vst [vmem:[#allocation55_spill] sm:$0xff] %v7242_v11  ;;  %v7249_v5 = vld [vmem:[%s10421_s5 + $0x30] sm:$0xff]  ;;  %v7254_v3 = vld [vmem:[%s10421_s5 + $0x40] sm:$0xff] }
  0x74   :  { %5158 = vmatprep.subr.mxu1 %v10730_v22  ;;  %678 = vmatprep.subr.mxu0 %v7223_v10  ;;  %10747 = vst [vmem:[#allocation56_spill] sm:$0xff] %v7249_v5  ;;  %10748 = vst [vmem:[#allocation57_spill] sm:$0xff] %v7254_v3  ;;  %v7261_v10 = vld [vmem:[%s10421_s5 + $0x20] sm:$0xff] }
  0x75   :  { %5159 = vmatpush3.msra.mxu1 %v7216_v62  ;;  %679 = vmatpush1.msra.mxu0 %v7230_v4  ;;  %10749 = vst [vmem:[#allocation58_spill] sm:$0xff] %v7261_v10  ;;  %v7268_v62 = vld [vmem:[%s10421_s5 + $0x18] sm:$0xff]  ;;  %v7273_v4 = vld [vmem:[%s10421_s5 + $0x28] sm:$0xff] }
  0x76   :  { %5160 = vmatprep.subr.mxu1 %v10730_v22  ;;  %680 = vmatprep.subr.mxu0 %v7242_v11  ;;  %10750 = vst [vmem:[#allocation59_spill] sm:$0xff] %v7268_v62  ;;  %10751 = vst [vmem:[#allocation60_spill] sm:$0xff] %v7273_v4  ;;  %v7280_v11 = vld [vmem:[%s10421_s5 + $0x8] sm:$0xff] }
  0x77   :  { %5161 = vmatpush3.msra.mxu1 %v7235_v16  ;;  %681 = vmatpush1.msra.mxu0 %v7249_v5  ;;  %10752 = vst [vmem:[#allocation61_spill] sm:$0xff] %v7280_v11  ;;  %v7287_v16 = vld [vmem:[%s10421_s5] sm:$0xff]  ;;  %v7292_v5 = vld [vmem:[%s10421_s5 + $0x10] sm:$0xff] }
  0x78   :  { %5162 = vmatprep.subr.mxu1 %v10730_v22  ;;  %682 = vmatprep.subr.mxu0 %v7261_v10  ;;  %10753 = vst [vmem:[#allocation62_spill] sm:$0xff] %v7287_v16  ;;  %10754 = vst [vmem:[#allocation63_spill] sm:$0xff] %v7292_v5  ;;  %v100_v10 = vlaneseq }
  0x79   :  { %5163 = vmatpush3.msra.mxu1 %v7254_v3  ;;  %683 = vmatpush1.msra.mxu0 %v7268_v62 }
  0x7a   :  { %5164 = vmatprep.subr.mxu1 %v10730_v22  ;;  %684 = vmatprep.subr.mxu0 %v7280_v11  ;;  %v101_v3 = vshrl.u32 %v100_v10, 7 }
  0x7b   :  { %5165 = vmatpush3.msra.mxu1 %v7273_v4  ;;  %685 = vmatpush1.msra.mxu0 %v7287_v16  ;;  %v98_v4 = vld [vmem:[%s10418_s2] sm:$0x7] }
  0x7c   :  { %5166 = vmatprep.subr.mxu1 %v10730_v22  ;;  %804 = vmatprep.subr.mxu0 %v6627_v45  ;;  %v7302_v61 = vsub.s32 0, %v101_v3  ;;  %v7307_v11 = vsub.s32 1, %v101_v3 }
  0x7d   :  { %5167 = vmatpush3.msra.mxu1 %v7292_v5 }
  0x7e   :  { %5171 = vmatprep.subr.mxu1 %v10730_v22  ;;  %10755 = vst [vmem:[#allocation64_spill] sm:$0xff] %v7302_v61  ;;  %10756 = vst [vmem:[#allocation65_spill] sm:$0xff] %v7307_v11  ;;  %v103_v16 = vrot.slane %v98_v4, %v7302_v61  ;;  %v107_v5 = vrot.slane %v98_v4, %v7307_v11 }
  0xe2   :  { %v181_v62 = vpop.f32.mrf.mxu0 }
  0xe4   :  { %v183_v56 = vpop.f32.mrf.mxu0 }
  0xe6   :  { %v187_v55 = vpop.f32.mrf.mxu0 }
  0xe7   :  { %v7311_v45 = vadd.f32 %v187_v55, %v103_v16 }
  0xe8   :  { %v189_v50 = vpop.f32.mrf.mxu0 }
  0xe9   :  { %10757 = vst [vmem:[#allocation66_spill] sm:$0xff] %v7311_v45  ;;  %v7313_v49 = vadd.f32 %v189_v50, %v107_v5  ;;  %v7327_v50 = vsub.s32 2, %v101_v3 }
  0xea   :  { %v193_v10 = vpop.f32.mrf.mxu0 }
  0xeb   :  { %10758 = vst [vmem:[#allocation67_spill] sm:$0xff] %v7313_v49  ;;  %v7315_v44 = vadd.f32 %v193_v10, %v103_v16  ;;  %10765 = vst [vmem:[#allocation74_spill] sm:$0xff] %v7327_v50 }
  0xec   :  { %v195_v43 = vpop.f32.mrf.mxu0 }
  0xed   :  { %10759 = vst [vmem:[#allocation68_spill] sm:$0xff] %v7315_v44  ;;  %v7317_v42 = vadd.f32 %v195_v43, %v107_v5 }
  0xee   :  { %v199_v41 = vpop.f32.mrf.mxu0 }
  0xef   :  { %10760 = vst [vmem:[#allocation69_spill] sm:$0xff] %v7317_v42  ;;  %v7319_v26 = vadd.f32 %v199_v41, %v103_v16  ;;  %v111_v41 = vrot.slane %v98_v4, %v7327_v50 }
  0xf0   :  { %v201_v25 = vpop.f32.mrf.mxu0 }
  0xf1   :  { %10761 = vst [vmem:[#allocation70_spill] sm:$0xff] %v7319_v26  ;;  %v7321_v40 = vadd.f32 %v201_v25, %v107_v5 }
  0xf2   :  { %v205_v24 = vpop.f32.mrf.mxu0 }
  0xf3   :  { %10762 = vst [vmem:[#allocation71_spill] sm:$0xff] %v7321_v40  ;;  %v7323_v23 = vadd.f32 %v205_v24, %v103_v16  ;;  %v405_v24 = vld [vmem:[%s10420_s4] sm:$0x7] }
  0xf4   :  { %v207_v55 = vpop.f32.mrf.mxu0 }
  0xf5   :  { %10763 = vst [vmem:[#allocation72_spill] sm:$0xff] %v7323_v23  ;;  %v7325_v45 = vadd.f32 %v207_v55, %v107_v5  ;;  %v182_v23 = vadd.f32 %v181_v62, %v103_v16 }
  0xf6   :  { %v211_v49 = vpop.f32.mrf.mxu0 }
  0xf7   :  { %10764 = vst [vmem:[#allocation73_spill] sm:$0xff] %v7325_v45  ;;  %v7329_v10 = vadd.f32 %v211_v49, %v103_v16 }
  0xf8   :  { %v213_v44 = vpop.f32.mrf.mxu0 }
  0xf9   :  { %10766 = vst [vmem:[#allocation75_spill] sm:$0xff] %v7329_v10  ;;  %v7331_v43 = vadd.f32 %v213_v44, %v107_v5  ;;  %v7346_v44 = vrot.slane %v405_v24, %v7302_v61 }
  0xfa   :  { %v217_v26 = vpop.f32.mrf.mxu0 }
  0xfb   :  { %10767 = vst [vmem:[#allocation76_spill] sm:$0xff] %v7331_v43  ;;  %v7334_v42 = vadd.f32 %v217_v26, %v103_v16  ;;  %10772 = vst [vmem:[#allocation81_spill] sm:$0xff] %v7346_v44 }
  0xfc   :  { %v219_v25 = vpop.f32.mrf.mxu0  ;;  %v5091_v55 = vpop.f32.mrf.mxu1 }
  0xfd   :  { %10768 = vst [vmem:[#allocation77_spill] sm:$0xff] %v7334_v42  ;;  %v7339_v45 = vadd.f32 %v219_v25, %v107_v5  ;;  %v7341_v3 = vadd.f32 %v5091_v55, %v111_v41 }
  0xfe   :  { %v223_v49 = vpop.f32.mrf.mxu0  ;;  %v294_v42 = vpop.f32.mrf.mxu1 }
  0xff   :  { %10769 = vst [vmem:[#allocation78_spill] sm:$0xff] %v7339_v45  ;;  %10770 = vst [vmem:[#allocation79_spill] sm:$0xff] %v7341_v3  ;;  %v7343_v10 = vadd.f32 %v223_v49, %v103_v16  ;;  %v7356_v49 = vrot.slane %v405_v24, %v7307_v11 }
 0x100   :  { %v225_v4 = vpop.f32.mrf.mxu0 }
 0x101   :  { %10771 = vst [vmem:[#allocation80_spill] sm:$0xff] %v7343_v10  ;;  %v7348_v43 = vadd.f32 %v225_v4, %v107_v5 }
 0x102   :  { %v543_v26 = vpop.f32.mrf.mxu0 }
 0x103   :  { %10773 = vst [vmem:[#allocation82_spill] sm:$0xff] %v7348_v43  ;;  %v544_v40 = vadd.f32 %v543_v26, %v7346_v44 }
 0x104   :  { %v5094_v39 = vpop.f32.mrf.mxu1  ;;  %v545_v4 = vpop.f32.mrf.mxu0 }
 0x105   :  { %v618_v20 = vadd.f32 %v544_v40, %v182_v23  ;;  %v7351_v25 = vadd.f32 %v5094_v39, %v111_v41  ;;  %v546_v16 = vadd.f32 %v545_v4, %v7356_v49  ;;  %v184_v40 = vadd.f32 %v183_v56, %v107_v5 }
 0x106   :  { %v304_v55 = vpop.f32.mrf.mxu1 }
 0x107   :  { %10774 = vst [vmem:[#allocation83_spill] sm:$0xff] %v7351_v25  ;;  %v4565_v45 = vmul.f32 -1.442695, %v618_v20  ;;  %v7353_v3 = vadd.f32 %v304_v55, %v111_v41  ;;  %v619_v55 = vadd.f32 %v546_v16, %v184_v40 }
 0x108   :  { %v5097_v61 = vpop.f32.mrf.mxu1 }
 0x109   :  { %10775 = vst [vmem:[#allocation84_spill] sm:$0xff] %v7353_v3  ;;  %5998 = vpow2.f32 %v4565_v45  ;;  %v7358_v43 = vadd.f32 %v5097_v61, %v111_v41  ;;  %v4566_v11 = vmul.f32 -1.442695, %v619_v55  ;;  %v7368_v61 = vrot.slane %v405_v24, %v7327_v50  ;;  %v10802_v24 = vld [vmem:[#allocation30_spill] sm:$0xff]  ;;  %v10804_v55 = vld [vmem:[#allocation32_spill] sm:$0xff] }
 0x10a   :  { %v314_v10 = vpop.f32.mrf.mxu1  ;;  %v10816_v50 = vld [vmem:[#allocation44_spill] sm:$0xff] }
 0x10b   :  { %10776 = vst [vmem:[#allocation85_spill] sm:$0xff] %v7358_v43  ;;  %v7360_v62 = vadd.f32 %v314_v10, %v111_v41  ;;  %6000 = vpow2.f32 %v4566_v11 }
 0x10c   :  { %v5100_v23 = vpop.f32.mrf.mxu1 }
 0x10d   :  { %10777 = vst [vmem:[#allocation86_spill] sm:$0xff] %v7360_v62  ;;  %v7363_v39 = vadd.f32 %v5100_v23, %v111_v41  ;;  %v10818_v62 = vld [vmem:[#allocation46_spill] sm:$0xff] }
 0x10e   :  { %v324_v20 = vpop.f32.mrf.mxu1 }
 0x10f   :  { %10778 = vst [vmem:[#allocation87_spill] sm:$0xff] %v7363_v39  ;;  %v7365_v26 = vadd.f32 %v324_v20, %v111_v41  ;;  %v295_v39 = vadd.f32 %v294_v42, %v111_v41  ;;  %v10799_v42 = vld [vmem:[#allocation27_spill] sm:$0xff]  ;;  %v10801_v41 = vld [vmem:[#allocation29_spill] sm:$0xff] }
 0x111   :  { %10779 = vst [vmem:[#allocation88_spill] sm:$0xff] %v7365_v26  ;;  %v10817_v26 = vld [vmem:[#allocation45_spill] sm:$0xff] }
 0x116   :  { %v5999_v25 = vpop.eup %5998 }
 0x117   :  { %v626_v3 = vadd.f32 1.0, %v5999_v25 }
 0x118   :  { %v6001_v43 = vpop.eup %6000 }
 0x119   :  { %6002 = vrcp.f32 %v626_v3  ;;  %v627_v5 = vadd.f32 1.0, %v6001_v43  ;;  %v10800_v43 = vld [vmem:[#allocation28_spill] sm:$0xff] }
 0x11e   :  { %v614_v45 = vpop.f32.mrf.mxu1 }
 0x11f   :  { %v615_v4 = vadd.f32 %v614_v45, %v7368_v61  ;;  %v10805_v45 = vld [vmem:[#allocation33_spill] sm:$0xff] }
 0x120   :  { %v5135_v10 = vpop.f32.mrf.mxu1 }
 0x121   :  { %v10806_v10 = vld [vmem:[#allocation34_spill] sm:$0xff] }
 0x126   :  { %v6003_v23 = vpop.eup %6002 }
 0x127   :  { %v632_v56 = vmul.f32 %v6003_v23, %v615_v4  ;;  %v10807_v4 = vld [vmem:[#allocation35_spill] sm:$0xff]  ;;  %v10808_v23 = vld [vmem:[#allocation36_spill] sm:$0xff] }
 0x129   :  { %v633_v20 = vadd.f32 %v632_v56, %v295_v39  ;;  %v10803_v39 = vld [vmem:[#allocation31_spill] sm:$0xff]  ;;  %v10809_v56 = vld [vmem:[#allocation37_spill] sm:$0xff] }
 0x12b   :  { %6004 = vtanh.f32 %v633_v20  ;;  %v10811_v20 = vld [vmem:[#allocation39_spill] sm:$0xff] }
 0x12c   :  { %6006 = vrcp.f32 %v627_v5  ;;  %v10810_v5 = vld [vmem:[#allocation38_spill] sm:$0xff] }
 0x138   :  { %v6005_v16 = vpop.eup %6004 }
 0x139   :  { %v635_v40 = vsub.f32 0.0, %v6005_v16  ;;  %v6007_v25 = vpop.eup %6006 }
 0x13b   :  { %v636_v11 = vmul.f32 %v6007_v25, %v635_v40  ;;  %v10813_v40 = vld [vmem:[#allocation41_spill] sm:$0xff]  ;;  %v10814_v25 = vld [vmem:[#allocation42_spill] sm:$0xff] }
 0x13d   :  { %v7371_v3 = vadd.f32 %v6005_v16, %v636_v11  ;;  %v10812_v16 = vld [vmem:[#allocation40_spill] sm:$0xff]  ;;  %v10815_v11 = vld [vmem:[#allocation43_spill] sm:$0xff] }
 0x13f   :  { %719 = vmatmul.mubr.f32.vlgmr.msra.gmra.mxu0 %v7371_v3  ;;  %5169 = vmatmul.mubr.f32.vlgmr.msra.gmra.mxu1 %v7371_v3 }
 0x140   :  { %805 = vmatpush1.msra.mxu0 %v6632_v46  ;;  %5172 = vmatpush3.msra.mxu1 %v6845_v21  ;;  %v10780_v46 = vld [vmem:[#allocation8_spill] sm:$0xff] }
 0x141   :  { %806 = vmatprep.subr.mxu0 %v6637_v47  ;;  %5173 = vmatprep.subr.mxu1 %v10730_v22  ;;  %v10781_v47 = vld [vmem:[#allocation13_spill] sm:$0xff] }
 0x142   :  { %807 = vmatpush1.msra.mxu0 %v6644_v48  ;;  %5174 = vmatpush3.msra.mxu1 %v6880_v27  ;;  %v10782_v48 = vld [vmem:[#allocation9_spill] sm:$0xff] }
 0x143   :  { %808 = vmatprep.subr.mxu0 %v6659_v51  ;;  %5175 = vmatprep.subr.mxu1 %v10730_v22  ;;  %v10783_v51 = vld [vmem:[#allocation10_spill] sm:$0xff] }
 0x144   :  { %809 = vmatpush1.msra.mxu0 %v6665_v52  ;;  %5176 = vmatpush3.msra.mxu1 %v6889_v28  ;;  %v10784_v52 = vld [vmem:[#allocation14_spill] sm:$0xff] }
 0x145   :  { %810 = vmatprep.subr.mxu0 %v6671_v53  ;;  %5177 = vmatprep.subr.mxu1 %v10730_v22  ;;  %v10785_v53 = vld [vmem:[#allocation11_spill] sm:$0xff] }
 0x146   :  { %811 = vmatpush1.msra.mxu0 %v6678_v54  ;;  %5178 = vmatpush3.msra.mxu1 %v6898_v29  ;;  %v10786_v54 = vld [vmem:[#allocation12_spill] sm:$0xff] }
 0x147   :  { %812 = vmatprep.subr.mxu0 %v6693_v57  ;;  %5179 = vmatprep.subr.mxu1 %v10730_v22  ;;  %v10787_v57 = vld [vmem:[#allocation15_spill] sm:$0xff] }
 0x148   :  { %813 = vmatpush1.msra.mxu0 %v6699_v58  ;;  %5180 = vmatpush3.msra.mxu1 %v6906_v30  ;;  %v10788_v58 = vld [vmem:[#allocation16_spill] sm:$0xff] }
 0x149   :  { %814 = vmatprep.subr.mxu0 %v6705_v59  ;;  %5181 = vmatprep.subr.mxu1 %v10730_v22  ;;  %v10789_v59 = vld [vmem:[#allocation17_spill] sm:$0xff] }
 0x14a   :  { %815 = vmatpush1.msra.mxu0 %v6712_v60  ;;  %5182 = vmatpush3.msra.mxu1 %v6915_v31  ;;  %v10790_v60 = vld [vmem:[#allocation18_spill] sm:$0xff] }
 0x14b   :  { %816 = vmatprep.subr.mxu0 %v6727_v63  ;;  %5183 = vmatprep.subr.mxu1 %v10730_v22  ;;  %v10791_v63 = vld [vmem:[#allocation19_spill] sm:$0xff] }
 0x14c   :  { %817 = vmatpush1.msra.mxu0 %v6733_v0  ;;  %5184 = vmatpush3.msra.mxu1 %v6923_v32  ;;  %v10792_v0 = vld [vmem:[#allocation20_spill] sm:$0xff] }
 0x14d   :  { %818 = vmatprep.subr.mxu0 %v6739_v1  ;;  %5185 = vmatprep.subr.mxu1 %v10730_v22  ;;  %v10793_v1 = vld [vmem:[#allocation21_spill] sm:$0xff] }
 0x14e   :  { %819 = vmatpush1.msra.mxu0 %v6746_v2  ;;  %5186 = vmatpush3.msra.mxu1 %v6930_v33  ;;  %v10794_v2 = vld [vmem:[#allocation22_spill] sm:$0xff] }
 0x14f   :  { %820 = vmatprep.subr.mxu0 %v6761_v6  ;;  %5187 = vmatprep.subr.mxu1 %v10730_v22  ;;  %v10795_v6 = vld [vmem:[#allocation23_spill] sm:$0xff] }
 0x150   :  { %821 = vmatpush1.msra.mxu0 %v6767_v7  ;;  %5188 = vmatpush3.msra.mxu1 %v6937_v34  ;;  %v10796_v7 = vld [vmem:[#allocation24_spill] sm:$0xff] }
 0x151   :  { %822 = vmatprep.subr.mxu0 %v6773_v8  ;;  %5189 = vmatprep.subr.mxu1 %v10730_v22  ;;  %v10797_v8 = vld [vmem:[#allocation25_spill] sm:$0xff] }
 0x152   :  { %823 = vmatpush1.msra.mxu0 %v6780_v9  ;;  %5190 = vmatpush3.msra.mxu1 %v6946_v35  ;;  %v10798_v9 = vld [vmem:[#allocation26_spill] sm:$0xff] }
 0x153   :  { %824 = vmatprep.subr.mxu0 %v6793_v12  ;;  %5191 = vmatprep.subr.mxu1 %v10730_v22 }
 0x154   :  { %825 = vmatpush1.msra.mxu0 %v6799_v13  ;;  %5192 = vmatpush3.msra.mxu1 %v6953_v36 }
 0x155   :  { %826 = vmatprep.subr.mxu0 %v6805_v14  ;;  %5193 = vmatprep.subr.mxu1 %v10730_v22 }
 0x156   :  { %827 = vmatpush1.msra.mxu0 %v6811_v15  ;;  %5194 = vmatpush3.msra.mxu1 %v6960_v37 }
 0x157   :  { %828 = vmatprep.subr.mxu0 %v6821_v17  ;;  %5195 = vmatprep.subr.mxu1 %v10730_v22 }
 0x158   :  { %829 = vmatpush1.msra.mxu0 %v6827_v18  ;;  %5196 = vmatpush3.msra.mxu1 %v6967_v38 }
 0x159   :  { %830 = vmatprep.subr.mxu0 %v6833_v19  ;;  %5197 = vmatprep.subr.mxu1 %v10730_v22 }
 0x15a   :  { %831 = vmatpush1.msra.mxu0 %v10780_v46  ;;  %5198 = vmatpush3.msra.mxu1 %v10781_v47 }
 0x15b   :  { %832 = vmatprep.subr.mxu0 %v10782_v48  ;;  %5199 = vmatprep.subr.mxu1 %v10730_v22 }
 0x15c   :  { %833 = vmatpush1.msra.mxu0 %v10783_v51  ;;  %5200 = vmatpush3.msra.mxu1 %v10784_v52 }
 0x15d   :  { %834 = vmatprep.subr.mxu0 %v10785_v53  ;;  %5201 = vmatprep.subr.mxu1 %v10730_v22 }
 0x15e   :  { %835 = vmatpush1.msra.mxu0 %v10786_v54  ;;  %868 = vmatprep.mubr.f32.mxu0 %v10730_v22 }
 0x15f   :  { %5202 = vmatpush3.msra.mxu1 %v10787_v57  ;;  %5203 = vmatprep.mubr.msk.f32.mxu1 %vm6421_vm0, %v10730_v22 }
 0x160   :  { %869 = vmatmul.mubr.f32.vlgmr.msra.gmra.mxu0 %v7371_v3  ;;  %5204 = vmatmul.mubr.f32.vlgmr.msra.gmra.mxu1 %v7371_v3 }
 0x161   :  { %965 = vmatprep.subr.mxu0 %v10788_v58  ;;  %5206 = vmatprep.subr.mxu1 %v10730_v22 }
 0x162   :  { %966 = vmatpush1.msra.mxu0 %v10789_v59  ;;  %5207 = vmatpush3.msra.mxu1 %v10790_v60 }
 0x163   :  { %967 = vmatprep.subr.mxu0 %v10791_v63  ;;  %5208 = vmatprep.subr.mxu1 %v10730_v22 }
 0x164   :  { %968 = vmatpush1.msra.mxu0 %v10792_v0  ;;  %5209 = vmatpush3.msra.mxu1 %v10793_v1 }
 0x165   :  { %969 = vmatprep.subr.mxu0 %v10794_v2  ;;  %5210 = vmatprep.subr.mxu1 %v10730_v22 }
 0x166   :  { %970 = vmatpush1.msra.mxu0 %v10795_v6  ;;  %5211 = vmatpush3.msra.mxu1 %v10796_v7 }
 0x167   :  { %971 = vmatprep.subr.mxu0 %v10797_v8  ;;  %5212 = vmatprep.subr.mxu1 %v10730_v22 }
 0x168   :  { %972 = vmatpush1.msra.mxu0 %v10798_v9  ;;  %5213 = vmatpush3.msra.mxu1 %v10799_v42 }
 0x169   :  { %973 = vmatprep.subr.mxu0 %v10800_v43  ;;  %5214 = vmatprep.subr.mxu1 %v10730_v22 }
 0x16a   :  { %974 = vmatpush1.msra.mxu0 %v10801_v41  ;;  %5215 = vmatpush3.msra.mxu1 %v10802_v24 }
 0x16b   :  { %975 = vmatprep.subr.mxu0 %v10803_v39  ;;  %5216 = vmatprep.subr.mxu1 %v10730_v22 }
 0x16c   :  { %976 = vmatpush1.msra.mxu0 %v10804_v55  ;;  %5217 = vmatpush3.msra.mxu1 %v10805_v45  ;;  %v10841_v45 = vld [vmem:[#allocation67_spill] sm:$0xff] }
 0x16d   :  { %977 = vmatprep.subr.mxu0 %v10806_v10  ;;  %5218 = vmatprep.subr.mxu1 %v10730_v22 }
 0x16e   :  { %978 = vmatpush1.msra.mxu0 %v10807_v4  ;;  %5219 = vmatpush3.msra.mxu1 %v10808_v23 }
 0x16f   :  { %979 = vmatprep.subr.mxu0 %v10809_v56  ;;  %5220 = vmatprep.subr.mxu1 %v10730_v22  ;;  %v10840_v56 = vld [vmem:[#allocation66_spill] sm:$0xff] }
 0x170   :  { %980 = vmatpush1.msra.mxu0 %v10810_v5  ;;  %5221 = vmatpush3.msra.mxu1 %v10811_v20  ;;  %v10819_v20 = vld [vmem:[#allocation47_spill] sm:$0xff]  ;;  %v10821_v5 = vld [vmem:[#allocation49_spill] sm:$0xff] }
 0x171   :  { %981 = vmatprep.subr.mxu0 %v10812_v16  ;;  %5222 = vmatprep.subr.mxu1 %v10730_v22  ;;  %v10820_v16 = vld [vmem:[#allocation48_spill] sm:$0xff] }
 0x172   :  { %982 = vmatpush1.msra.mxu0 %v10813_v40  ;;  %5223 = vmatpush3.msra.mxu1 %v10814_v25  ;;  %v10822_v25 = vld [vmem:[#allocation50_spill] sm:$0xff]  ;;  %v10824_v40 = vld [vmem:[#allocation52_spill] sm:$0xff] }
 0x173   :  { %983 = vmatprep.subr.mxu0 %v10815_v11  ;;  %5224 = vmatprep.subr.mxu1 %v10730_v22  ;;  %v10823_v11 = vld [vmem:[#allocation51_spill] sm:$0xff] }
 0x174   :  { %984 = vmatpush1.msra.mxu0 %v10816_v50  ;;  %5225 = vmatpush3.msra.mxu1 %v10817_v26  ;;  %v10825_v26 = vld [vmem:[#allocation53_spill] sm:$0xff]  ;;  %v10827_v50 = vld [vmem:[#allocation55_spill] sm:$0xff] }
 0x175   :  { %985 = vmatprep.subr.mxu0 %v10818_v62  ;;  %5226 = vmatprep.subr.mxu1 %v10730_v22  ;;  %v10826_v62 = vld [vmem:[#allocation54_spill] sm:$0xff] }
 0x176   :  { %986 = vmatpush1.msra.mxu0 %v10819_v20  ;;  %5227 = vmatpush3.msra.mxu1 %v10820_v16  ;;  %v10828_v16 = vld [vmem:[#allocation56_spill] sm:$0xff]  ;;  %v10830_v20 = vld [vmem:[#allocation58_spill] sm:$0xff] }
 0x177   :  { %987 = vmatprep.subr.mxu0 %v10821_v5  ;;  %5228 = vmatprep.subr.mxu1 %v10730_v22  ;;  %v10829_v5 = vld [vmem:[#allocation57_spill] sm:$0xff] }
 0x178   :  { %988 = vmatpush1.msra.mxu0 %v10822_v25  ;;  %5229 = vmatpush3.msra.mxu1 %v10823_v11  ;;  %v10831_v11 = vld [vmem:[#allocation59_spill] sm:$0xff]  ;;  %v10833_v25 = vld [vmem:[#allocation61_spill] sm:$0xff] }
 0x179   :  { %989 = vmatprep.subr.mxu0 %v10824_v40  ;;  %5230 = vmatprep.subr.mxu1 %v10730_v22  ;;  %v10832_v40 = vld [vmem:[#allocation60_spill] sm:$0xff] }
 0x17a   :  { %990 = vmatpush1.msra.mxu0 %v10825_v26  ;;  %5231 = vmatpush3.msra.mxu1 %v10826_v62  ;;  %v10834_v62 = vld [vmem:[#allocation62_spill] sm:$0xff] }
 0x17b   :  { %991 = vmatprep.subr.mxu0 %v10827_v50  ;;  %5232 = vmatprep.subr.mxu1 %v10730_v22  ;;  %v10835_v50 = vld [vmem:[#allocation63_spill] sm:$0xff] }
 0x17c   :  { %992 = vmatpush1.msra.mxu0 %v10828_v16  ;;  %5233 = vmatpush3.msra.mxu1 %v10829_v5 }
 0x17d   :  { %993 = vmatprep.subr.mxu0 %v10830_v20  ;;  %5234 = vmatprep.subr.mxu1 %v10730_v22  ;;  %v10836_v20 = vld [vmem:[#allocation7_spill] sm:$0xff] }
 0x17e   :  { %994 = vmatpush1.msra.mxu0 %v10831_v11  ;;  %5235 = vmatpush3.msra.mxu1 %v10832_v40 }
 0x17f   :  { %995 = vmatprep.subr.mxu0 %v10833_v25  ;;  %5236 = vmatprep.subr.mxu1 %v10730_v22 }
 0x180   :  { %996 = vmatpush1.msra.mxu0 %v10834_v62  ;;  %5237 = vmatpush3.msra.mxu1 %v10835_v50 }
 0x181   :  { %1029 = vmatprep.mubr.f32.mxu0 %v10730_v22  ;;  %5238 = vmatprep.mubr.msk.f32.mxu1 %vm6421_vm0, %v10730_v22 }
 0x182   :  { %1115 = vmatprep.subr.mxu0 %v10836_v20  ;;  %5241 = vmatprep.subr.mxu1 %v10730_v22 }
 0x1ff   :  { %v7511_v11 = vpop.f32.mrf.mxu1  ;;  %v7513_v5 = vpop.f32.mrf.mxu0 }
 0x200   :  { %10837 = vst [vmem:[#allocation8_spill] sm:$0xff] %v7511_v11  ;;  %10838 = vst [vmem:[#allocation13_spill] sm:$0xff] %v7513_v5 }
 0x201   :  { %v5170_v40 = vpop.f32.mrf.mxu1  ;;  %v7515_v25 = vpop.f32.mrf.mxu0 }
 0x202   :  { %10839 = vst [vmem:[#allocation9_spill] sm:$0xff] %v7515_v25 }
 0x220   :  { %v870_v16 = vpop.f32.mrf.mxu0  ;;  %v941_v62 = vpop.f32.mrf.mxu1 }
 0x221   :  { %v871_v50 = vadd.f32 %v870_v16, %v7346_v44  ;;  %v942_v5 = vadd.f32 %v941_v62, %v7368_v61  ;;  %v7531_v62 = vld [vmem:[%s10419_s3 + $0x168] sm:$0xff] }
 0x222   :  { %v5205_v26 = vpop.f32.mrf.mxu1  ;;  %v872_v10 = vpop.f32.mrf.mxu0 }
 0x223   :  { %v945_v23 = vadd.f32 %v871_v50, %v10840_v56  ;;  %v873_v20 = vadd.f32 %v872_v10, %v7356_v49  ;;  %v10842_v26 = vld [vmem:[#allocation79_spill] sm:$0xff] }
 0x224   :  { %v7587_v56 = vld [vmem:[%s10419_s3 + $0x108] sm:$0xff] }
 0x225   :  { %v4567_v4 = vmul.f32 -1.442695, %v945_v23  ;;  %v946_v55 = vadd.f32 %v873_v20, %v10841_v45  ;;  %v7643_v20 = vld [vmem:[%s10419_s3 + $0xa8] sm:$0xff] }
 0x227   :  { %6008 = vpow2.f32 %v4567_v4  ;;  %v4568_v11 = vmul.f32 -1.442695, %v946_v55 }
 0x229   :  { %6010 = vpow2.f32 %v4568_v11  ;;  %v7629_v11 = vld [vmem:[%s10419_s3 + $0xc0] sm:$0xff] }
 0x234   :  { %v6009_v40 = vpop.eup %6008 }
 0x235   :  { %v953_v39 = vadd.f32 1.0, %v6009_v40  ;;  %v7657_v40 = vld [vmem:[%s10419_s3 + $0x90] sm:$0xff] }
 0x236   :  { %v6011_v25 = vpop.eup %6010 }
 0x237   :  { %6012 = vrcp.f32 %v953_v39  ;;  %v954_v50 = vadd.f32 1.0, %v6011_v25  ;;  %v7573_v39 = vld [vmem:[%s10419_s3 + $0x120] sm:$0xff]  ;;  %v7615_v25 = vld [vmem:[%s10419_s3 + $0xd8] sm:$0xff] }
 0x244   :  { %v6013_v24 = vpop.eup %6012 }
 0x245   :  { %v959_v16 = vmul.f32 %v6013_v24, %v942_v5  ;;  %v7559_v24 = vld [vmem:[%s10419_s3 + $0x138] sm:$0xff]  ;;  %v7601_v5 = vld [vmem:[%s10419_s3 + $0xf0] sm:$0xff] }
 0x247   :  { %v960_v44 = vadd.f32 %v959_v16, %v10842_v26  ;;  %v7760_v16 = vld [vmem:[%s10419_s3 + $0x170] sm:$0xff] }
 0x248   :  { %10877 = vst [vmem:[#allocation10_spill] sm:$0xff] %v7760_v16 }
 0x249   :  { %6014 = vtanh.f32 %v960_v44  ;;  %v7538_v44 = vld [vmem:[%s10419_s3 + $0x158] sm:$0xff] }
 0x24a   :  { %6016 = vrcp.f32 %v954_v50 }
 0x256   :  { %v6015_v4 = vpop.eup %6014 }
 0x257   :  { %v962_v10 = vsub.f32 %v7371_v3, %v6015_v4  ;;  %v6017_v23 = vpop.eup %6016  ;;  %v7545_v3 = vld [vmem:[%s10419_s3 + $0x150] sm:$0xff] }
 0x259   :  { %v963_v45 = vmul.f32 %v6017_v23, %v962_v10 }
 0x25b   :  { %v7524_v55 = vadd.f32 %v6015_v4, %v963_v45 }
 0x25d   :  { %1030 = vmatmul.mubr.f32.vlgmr.msra.gmra.mxu0 %v7524_v55  ;;  %5239 = vmatmul.mubr.f32.vlgmr.msra.gmra.mxu1 %v7524_v55 }
 0x25e   :  { %1116 = vmatpush1.msra.mxu0 %v7531_v62  ;;  %5242 = vmatpush3.msra.mxu1 %v6845_v21  ;;  %v7552_v21 = vld [vmem:[%s10419_s3 + $0x140] sm:$0xff] }
 0x25f   :  { %1117 = vmatprep.subr.mxu0 %v7538_v44  ;;  %5243 = vmatprep.subr.mxu1 %v10730_v22 }
 0x260   :  { %1118 = vmatpush1.msra.mxu0 %v7545_v3  ;;  %5244 = vmatpush3.msra.mxu1 %v6880_v27  ;;  %v7566_v27 = vld [vmem:[%s10419_s3 + $0x128] sm:$0xff] }
 0x261   :  { %1119 = vmatprep.subr.mxu0 %v7552_v21  ;;  %5245 = vmatprep.subr.mxu1 %v10730_v22 }
 0x262   :  { %1120 = vmatpush1.msra.mxu0 %v7559_v24  ;;  %5246 = vmatpush3.msra.mxu1 %v6889_v28  ;;  %v7580_v28 = vld [vmem:[%s10419_s3 + $0x110] sm:$0xff] }
 0x263   :  { %1121 = vmatprep.subr.mxu0 %v7566_v27  ;;  %5247 = vmatprep.subr.mxu1 %v10730_v22 }
 0x264   :  { %1122 = vmatpush1.msra.mxu0 %v7573_v39  ;;  %5248 = vmatpush3.msra.mxu1 %v6898_v29  ;;  %v7594_v29 = vld [vmem:[%s10419_s3 + $0xf8] sm:$0xff] }
 0x265   :  { %1123 = vmatprep.subr.mxu0 %v7580_v28  ;;  %5249 = vmatprep.subr.mxu1 %v10730_v22 }
 0x266   :  { %1124 = vmatpush1.msra.mxu0 %v7587_v56  ;;  %5250 = vmatpush3.msra.mxu1 %v6906_v30  ;;  %v7608_v30 = vld [vmem:[%s10419_s3 + $0xe0] sm:$0xff] }
 0x267   :  { %1125 = vmatprep.subr.mxu0 %v7594_v29  ;;  %5251 = vmatprep.subr.mxu1 %v10730_v22 }
 0x268   :  { %1126 = vmatpush1.msra.mxu0 %v7601_v5  ;;  %5252 = vmatpush3.msra.mxu1 %v6915_v31  ;;  %v7622_v31 = vld [vmem:[%s10419_s3 + $0xc8] sm:$0xff] }
 0x269   :  { %1127 = vmatprep.subr.mxu0 %v7608_v30  ;;  %5253 = vmatprep.subr.mxu1 %v10730_v22 }
 0x26a   :  { %1128 = vmatpush1.msra.mxu0 %v7615_v25  ;;  %5254 = vmatpush3.msra.mxu1 %v6923_v32  ;;  %v7636_v32 = vld [vmem:[%s10419_s3 + $0xb0] sm:$0xff] }
 0x26b   :  { %1129 = vmatprep.subr.mxu0 %v7622_v31  ;;  %5255 = vmatprep.subr.mxu1 %v10730_v22 }
 0x26c   :  { %1130 = vmatpush1.msra.mxu0 %v7629_v11  ;;  %5256 = vmatpush3.msra.mxu1 %v6930_v33  ;;  %v7650_v33 = vld [vmem:[%s10419_s3 + $0x98] sm:$0xff] }
 0x26d   :  { %1131 = vmatprep.subr.mxu0 %v7636_v32  ;;  %5257 = vmatprep.subr.mxu1 %v10730_v22 }
 0x26e   :  { %1132 = vmatpush1.msra.mxu0 %v7643_v20  ;;  %5258 = vmatpush3.msra.mxu1 %v6937_v34  ;;  %v10850_v34 = vld [vmem:[#allocation37_spill] sm:$0xff] }
 0x26f   :  { %1133 = vmatprep.subr.mxu0 %v7650_v33  ;;  %5259 = vmatprep.subr.mxu1 %v10730_v22 }
 0x270   :  { %1134 = vmatpush1.msra.mxu0 %v7657_v40  ;;  %5260 = vmatpush3.msra.mxu1 %v6946_v35  ;;  %v10851_v35 = vld [vmem:[#allocation38_spill] sm:$0xff] }
 0x271   :  { %1135 = vmatprep.subr.mxu0 %v6793_v12  ;;  %5261 = vmatprep.subr.mxu1 %v10730_v22  ;;  %v10843_v12 = vld [vmem:[#allocation30_spill] sm:$0xff] }
 0x272   :  { %1136 = vmatpush1.msra.mxu0 %v6799_v13  ;;  %5262 = vmatpush3.msra.mxu1 %v6953_v36  ;;  %v10844_v13 = vld [vmem:[#allocation31_spill] sm:$0xff] }
 0x273   :  { %1137 = vmatprep.subr.mxu0 %v6805_v14  ;;  %5263 = vmatprep.subr.mxu1 %v10730_v22  ;;  %v10845_v14 = vld [vmem:[#allocation32_spill] sm:$0xff]  ;;  %v10852_v36 = vld [vmem:[#allocation39_spill] sm:$0xff] }
 0x274   :  { %1138 = vmatpush1.msra.mxu0 %v6811_v15  ;;  %5264 = vmatpush3.msra.mxu1 %v6960_v37  ;;  %v10846_v15 = vld [vmem:[#allocation33_spill] sm:$0xff]  ;;  %v10853_v37 = vld [vmem:[#allocation40_spill] sm:$0xff] }
 0x275   :  { %1139 = vmatprep.subr.mxu0 %v6821_v17  ;;  %5265 = vmatprep.subr.mxu1 %v10730_v22  ;;  %v10847_v17 = vld [vmem:[#allocation34_spill] sm:$0xff] }
 0x276   :  { %1140 = vmatpush1.msra.mxu0 %v6827_v18  ;;  %5266 = vmatpush3.msra.mxu1 %v6967_v38  ;;  %v10848_v18 = vld [vmem:[#allocation35_spill] sm:$0xff]  ;;  %v10854_v38 = vld [vmem:[#allocation41_spill] sm:$0xff] }
 0x277   :  { %1141 = vmatprep.subr.mxu0 %v6833_v19  ;;  %5267 = vmatprep.subr.mxu1 %v10730_v22  ;;  %v10849_v19 = vld [vmem:[#allocation36_spill] sm:$0xff] }
 0x278   :  { %1142 = vmatpush1.msra.mxu0 %v10780_v46  ;;  %5268 = vmatpush3.msra.mxu1 %v10781_v47  ;;  %v10855_v46 = vld [vmem:[#allocation42_spill] sm:$0xff]  ;;  %v10856_v47 = vld [vmem:[#allocation43_spill] sm:$0xff] }
 0x279   :  { %1143 = vmatprep.subr.mxu0 %v10782_v48  ;;  %5269 = vmatprep.subr.mxu1 %v10730_v22  ;;  %v10857_v48 = vld [vmem:[#allocation44_spill] sm:$0xff] }
 0x27a   :  { %1144 = vmatpush1.msra.mxu0 %v10783_v51  ;;  %5270 = vmatpush3.msra.mxu1 %v10784_v52  ;;  %v10858_v51 = vld [vmem:[#allocation45_spill] sm:$0xff]  ;;  %v10859_v52 = vld [vmem:[#allocation46_spill] sm:$0xff] }
 0x27b   :  { %1145 = vmatprep.subr.mxu0 %v10785_v53  ;;  %5271 = vmatprep.subr.mxu1 %v10730_v22  ;;  %v10860_v53 = vld [vmem:[#allocation47_spill] sm:$0xff] }
 0x27c   :  { %1146 = vmatpush1.msra.mxu0 %v10786_v54  ;;  %1179 = vmatprep.mubr.f32.mxu0 %v10730_v22  ;;  %v10861_v54 = vld [vmem:[#allocation48_spill] sm:$0xff] }
 0x27d   :  { %5272 = vmatpush3.msra.mxu1 %v10787_v57  ;;  %5273 = vmatprep.mubr.msk.f32.mxu1 %vm6421_vm0, %v10730_v22  ;;  %v10862_v57 = vld [vmem:[#allocation49_spill] sm:$0xff] }
 0x27e   :  { %1180 = vmatmul.mubr.f32.vlgmr.msra.gmra.mxu0 %v7524_v55  ;;  %5274 = vmatmul.mubr.f32.vlgmr.msra.gmra.mxu1 %v7524_v55 }
 0x27f   :  { %1276 = vmatprep.subr.mxu0 %v10788_v58  ;;  %5276 = vmatprep.subr.mxu1 %v10730_v22  ;;  %v10863_v58 = vld [vmem:[#allocation50_spill] sm:$0xff] }
 0x280   :  { %1277 = vmatpush1.msra.mxu0 %v10789_v59  ;;  %5277 = vmatpush3.msra.mxu1 %v10790_v60  ;;  %v10864_v59 = vld [vmem:[#allocation51_spill] sm:$0xff]  ;;  %v10865_v60 = vld [vmem:[#allocation52_spill] sm:$0xff] }
 0x281   :  { %1278 = vmatprep.subr.mxu0 %v10791_v63  ;;  %5278 = vmatprep.subr.mxu1 %v10730_v22  ;;  %v10866_v63 = vld [vmem:[#allocation53_spill] sm:$0xff] }
 0x282   :  { %1279 = vmatpush1.msra.mxu0 %v10792_v0  ;;  %5279 = vmatpush3.msra.mxu1 %v10793_v1  ;;  %v10867_v0 = vld [vmem:[#allocation54_spill] sm:$0xff]  ;;  %v10868_v1 = vld [vmem:[#allocation55_spill] sm:$0xff] }
 0x283   :  { %1280 = vmatprep.subr.mxu0 %v10794_v2  ;;  %5280 = vmatprep.subr.mxu1 %v10730_v22  ;;  %v10869_v2 = vld [vmem:[#allocation56_spill] sm:$0xff] }
 0x284   :  { %1281 = vmatpush1.msra.mxu0 %v10795_v6  ;;  %5281 = vmatpush3.msra.mxu1 %v10796_v7  ;;  %v10870_v6 = vld [vmem:[#allocation57_spill] sm:$0xff]  ;;  %v10871_v7 = vld [vmem:[#allocation58_spill] sm:$0xff] }
 0x285   :  { %1282 = vmatprep.subr.mxu0 %v10797_v8  ;;  %5282 = vmatprep.subr.mxu1 %v10730_v22  ;;  %v10872_v8 = vld [vmem:[#allocation59_spill] sm:$0xff] }
 0x286   :  { %1283 = vmatpush1.msra.mxu0 %v10798_v9  ;;  %5283 = vmatpush3.msra.mxu1 %v10799_v42  ;;  %v10873_v9 = vld [vmem:[#allocation60_spill] sm:$0xff]  ;;  %v10874_v42 = vld [vmem:[#allocation61_spill] sm:$0xff] }
 0x287   :  { %1284 = vmatprep.subr.mxu0 %v10800_v43  ;;  %5284 = vmatprep.subr.mxu1 %v10730_v22  ;;  %v10875_v43 = vld [vmem:[#allocation62_spill] sm:$0xff] }
 0x288   :  { %1285 = vmatpush1.msra.mxu0 %v10801_v41  ;;  %5285 = vmatpush3.msra.mxu1 %v10843_v12  ;;  %v10876_v41 = vld [vmem:[#allocation63_spill] sm:$0xff]  ;;  %v10881_v12 = vld [vmem:[#allocation81_spill] sm:$0xff] }
 0x289   :  { %1286 = vmatprep.subr.mxu0 %v10844_v13  ;;  %5286 = vmatprep.subr.mxu1 %v10730_v22 }
 0x28a   :  { %1287 = vmatpush1.msra.mxu0 %v10845_v14  ;;  %5287 = vmatpush3.msra.mxu1 %v10846_v15  ;;  %v10882_v15 = vld [vmem:[#allocation68_spill] sm:$0xff] }
 0x28b   :  { %1288 = vmatprep.subr.mxu0 %v10847_v17  ;;  %5288 = vmatprep.subr.mxu1 %v10730_v22 }
 0x28c   :  { %1289 = vmatpush1.msra.mxu0 %v10848_v18  ;;  %5289 = vmatpush3.msra.mxu1 %v10849_v19 }
 0x28d   :  { %1290 = vmatprep.subr.mxu0 %v10850_v34  ;;  %5290 = vmatprep.subr.mxu1 %v10730_v22 }
 0x28e   :  { %1291 = vmatpush1.msra.mxu0 %v10851_v35  ;;  %5291 = vmatpush3.msra.mxu1 %v10852_v36  ;;  %v10883_v35 = vld [vmem:[#allocation69_spill] sm:$0xff] }
 0x28f   :  { %1292 = vmatprep.subr.mxu0 %v10853_v37  ;;  %5292 = vmatprep.subr.mxu1 %v10730_v22 }
 0x290   :  { %1293 = vmatpush1.msra.mxu0 %v10854_v38  ;;  %5293 = vmatpush3.msra.mxu1 %v10855_v46 }
 0x291   :  { %1294 = vmatprep.subr.mxu0 %v10856_v47  ;;  %5294 = vmatprep.subr.mxu1 %v10730_v22 }
 0x292   :  { %1295 = vmatpush1.msra.mxu0 %v10857_v48  ;;  %5295 = vmatpush3.msra.mxu1 %v10858_v51 }
 0x293   :  { %1296 = vmatprep.subr.mxu0 %v10859_v52  ;;  %5296 = vmatprep.subr.mxu1 %v10730_v22 }
 0x294   :  { %1297 = vmatpush1.msra.mxu0 %v10860_v53  ;;  %5297 = vmatpush3.msra.mxu1 %v10861_v54  ;;  %v10884_v53 = vld [vmem:[#allocation84_spill] sm:$0xff] }
 0x295   :  { %1298 = vmatprep.subr.mxu0 %v10862_v57  ;;  %5298 = vmatprep.subr.mxu1 %v10730_v22 }
 0x296   :  { %1299 = vmatpush1.msra.mxu0 %v10863_v58  ;;  %5299 = vmatpush3.msra.mxu1 %v10864_v59 }
 0x297   :  { %1300 = vmatprep.subr.mxu0 %v10865_v60  ;;  %5300 = vmatprep.subr.mxu1 %v10730_v22 }
 0x298   :  { %1301 = vmatpush1.msra.mxu0 %v10866_v63  ;;  %5301 = vmatpush3.msra.mxu1 %v10867_v0 }
 0x299   :  { %1302 = vmatprep.subr.mxu0 %v10868_v1  ;;  %5302 = vmatprep.subr.mxu1 %v10730_v22  ;;  %v7785_v1 = vld [vmem:[%s10419_s3 + $0x178] sm:$0xff] }
 0x29a   :  { %1303 = vmatpush1.msra.mxu0 %v10869_v2  ;;  %5303 = vmatpush3.msra.mxu1 %v10870_v6  ;;  %v7803_v2 = vld [vmem:[%s10419_s3 + $0x148] sm:$0xff]  ;;  %v7812_v6 = vld [vmem:[%s10419_s3 + $0x130] sm:$0xff] }
 0x29b   :  { %1304 = vmatprep.subr.mxu0 %v10871_v7  ;;  %5304 = vmatprep.subr.mxu1 %v10730_v22  ;;  %v7821_v7 = vld [vmem:[%s10419_s3 + $0x118] sm:$0xff] }
 0x29c   :  { %1305 = vmatpush1.msra.mxu0 %v10872_v8  ;;  %5305 = vmatpush3.msra.mxu1 %v10873_v9  ;;  %v7830_v8 = vld [vmem:[%s10419_s3 + $0x100] sm:$0xff]  ;;  %v7839_v9 = vld [vmem:[%s10419_s3 + $0xe8] sm:$0xff] }
 0x29d   :  { %1306 = vmatprep.subr.mxu0 %v10874_v42  ;;  %5306 = vmatprep.subr.mxu1 %v10730_v22  ;;  %v7848_v42 = vld [vmem:[%s10419_s3 + $0xd0] sm:$0xff] }
 0x29e   :  { %1307 = vmatpush1.msra.mxu0 %v10875_v43  ;;  %5307 = vmatpush3.msra.mxu1 %v10876_v41  ;;  %v7857_v43 = vld [vmem:[%s10419_s3 + $0xb8] sm:$0xff]  ;;  %v7866_v41 = vld [vmem:[%s10419_s3 + $0xa0] sm:$0xff] }
 0x29f   :  { %1340 = vmatprep.mubr.f32.mxu0 %v10730_v22  ;;  %5308 = vmatprep.mubr.msk.f32.mxu1 %vm6421_vm0, %v10730_v22 }
 0x2a0   :  { %1426 = vmatprep.subr.mxu0 %v7760_v16  ;;  %5311 = vmatprep.subr.mxu1 %v10730_v22 }
 0x31d   :  { %v7764_v26 = vpop.f32.mrf.mxu1  ;;  %v7766_v4 = vpop.f32.mrf.mxu0 }
 0x31e   :  { %10878 = vst [vmem:[#allocation14_spill] sm:$0xff] %v7764_v26  ;;  %10879 = vst [vmem:[#allocation11_spill] sm:$0xff] %v7766_v4  ;;  %v8042_v26 = vld [vmem:[%s10421_s5 + $0x148] sm:$0xff]  ;;  %v8055_v4 = vld [vmem:[%s10421_s5 + $0x120] sm:$0xff] }
 0x31f   :  { %v5240_v50 = vpop.f32.mrf.mxu1  ;;  %v7768_v10 = vpop.f32.mrf.mxu0  ;;  %10898 = vst [vmem:[#allocation28_spill] sm:$0xff] %v8042_v26  ;;  %10900 = vst [vmem:[#allocation7_spill] sm:$0xff] %v8055_v4 }
 0x320   :  { %10880 = vst [vmem:[#allocation12_spill] sm:$0xff] %v7768_v10  ;;  %v7872_v50 = vld [vmem:[%s10419_s3 + $0x80] sm:$0xff]  ;;  %v8048_v10 = vld [vmem:[%s10421_s5 + $0x128] sm:$0xff] }
 0x321   :  { %10899 = vst [vmem:[#allocation29_spill] sm:$0xff] %v8048_v10 }
 0x33e   :  { %v1181_v23 = vpop.f32.mrf.mxu0  ;;  %v1252_v45 = vpop.f32.mrf.mxu1 }
 0x33f   :  { %v1182_v13 = vadd.f32 %v1181_v23, %v10881_v12  ;;  %v1253_v48 = vadd.f32 %v1252_v45, %v7368_v61  ;;  %v7879_v23 = vld [vmem:[%s10419_s3 + $0x78] sm:$0xff]  ;;  %v7885_v45 = vld [vmem:[%s10419_s3 + $0x88] sm:$0xff] }
 0x340   :  { %v5275_v14 = vpop.f32.mrf.mxu1  ;;  %v1183_v19 = vpop.f32.mrf.mxu0 }
 0x341   :  { %v1256_v17 = vadd.f32 %v1182_v13, %v10882_v15  ;;  %v1184_v34 = vadd.f32 %v1183_v19, %v7356_v49  ;;  %v7891_v13 = vld [vmem:[%s10419_s3 + $0x68] sm:$0xff]  ;;  %v7898_v14 = vld [vmem:[%s10419_s3 + $0x60] sm:$0xff]  ;;  %v7904_v15 = vld [vmem:[%s10419_s3 + $0x70] sm:$0xff] }
 0x342   :  { %v7923_v19 = vld [vmem:[%s10419_s3 + $0x58] sm:$0xff] }
 0x343   :  { %v4569_v18 = vmul.f32 -1.442695, %v1256_v17  ;;  %v1257_v36 = vadd.f32 %v1184_v34, %v10883_v35  ;;  %v7910_v17 = vld [vmem:[%s10419_s3 + $0x50] sm:$0xff]  ;;  %v7929_v34 = vld [vmem:[%s10419_s3 + $0x38] sm:$0xff] }
 0x344   :  { %v7936_v35 = vld [vmem:[%s10419_s3 + $0x30] sm:$0xff] }
 0x345   :  { %6018 = vpow2.f32 %v4569_v18  ;;  %v4570_v37 = vmul.f32 -1.442695, %v1257_v36  ;;  %v7917_v18 = vld [vmem:[%s10419_s3 + $0x48] sm:$0xff]  ;;  %v7942_v36 = vld [vmem:[%s10419_s3 + $0x40] sm:$0xff] }
 0x347   :  { %6020 = vpow2.f32 %v4570_v37  ;;  %v7948_v37 = vld [vmem:[%s10419_s3 + $0x20] sm:$0xff] }
 0x352   :  { %v6019_v38 = vpop.eup %6018 }
 0x353   :  { %v1264_v46 = vadd.f32 1.0, %v6019_v38  ;;  %v7955_v38 = vld [vmem:[%s10419_s3 + $0x18] sm:$0xff] }
 0x354   :  { %v6021_v47 = vpop.eup %6020  ;;  %10885 = vst [vmem:[#allocation15_spill] sm:$0xff] %v7955_v38 }
 0x355   :  { %6022 = vrcp.f32 %v1264_v46  ;;  %v1265_v57 = vadd.f32 1.0, %v6021_v47  ;;  %v7961_v46 = vld [vmem:[%s10419_s3 + $0x28] sm:$0xff] }
 0x356   :  { %10886 = vst [vmem:[#allocation16_spill] sm:$0xff] %v7961_v46  ;;  %v7967_v47 = vld [vmem:[%s10419_s3 + $0x8] sm:$0xff] }
 0x357   :  { %10887 = vst [vmem:[#allocation17_spill] sm:$0xff] %v7967_v47 }
 0x362   :  { %v6023_v51 = vpop.eup %6022 }
 0x363   :  { %v1270_v52 = vmul.f32 %v6023_v51, %v1253_v48  ;;  %v7974_v48 = vld [vmem:[%s10419_s3] sm:$0xff]  ;;  %v7981_v51 = vld [vmem:[%s10419_s3 + $0x10] sm:$0xff] }
 0x364   :  { %10888 = vst [vmem:[#allocation18_spill] sm:$0xff] %v7974_v48  ;;  %10889 = vst [vmem:[#allocation19_spill] sm:$0xff] %v7981_v51 }
 0x365   :  { %v1271_v54 = vadd.f32 %v1270_v52, %v10884_v53  ;;  %v7991_v52 = vld [vmem:[%s10421_s5 + $0x170] sm:$0xff]  ;;  %v7998_v53 = vld [vmem:[%s10421_s5 + $0x168] sm:$0xff] }
 0x366   :  { %10890 = vst [vmem:[#allocation20_spill] sm:$0xff] %v7991_v52  ;;  %10891 = vst [vmem:[#allocation21_spill] sm:$0xff] %v7998_v53 }
 0x367   :  { %6024 = vtanh.f32 %v1271_v54  ;;  %v8004_v54 = vld [vmem:[%s10421_s5 + $0x178] sm:$0xff] }
 0x368   :  { %6026 = vrcp.f32 %v1265_v57  ;;  %10892 = vst [vmem:[#allocation22_spill] sm:$0xff] %v8004_v54  ;;  %v8010_v57 = vld [vmem:[%s10421_s5 + $0x158] sm:$0xff] }
 0x369   :  { %10893 = vst [vmem:[#allocation23_spill] sm:$0xff] %v8010_v57 }
 0x374   :  { %v6025_v58 = vpop.eup %6024 }
 0x375   :  { %v1273_v59 = vsub.f32 %v7524_v55, %v6025_v58  ;;  %v6027_v60 = vpop.eup %6026  ;;  %v7794_v55 = vld [vmem:[%s10419_s3 + $0x160] sm:$0xff] }
 0x377   :  { %v1274_v63 = vmul.f32 %v6027_v60, %v1273_v59  ;;  %v8023_v59 = vld [vmem:[%s10421_s5 + $0x160] sm:$0xff] }
 0x378   :  { %10895 = vst [vmem:[#allocation25_spill] sm:$0xff] %v8023_v59  ;;  %v8029_v60 = vld [vmem:[%s10421_s5 + $0x140] sm:$0xff] }
 0x379   :  { %v7777_v0 = vadd.f32 %v6025_v58, %v1274_v63  ;;  %v8017_v58 = vld [vmem:[%s10421_s5 + $0x150] sm:$0xff]  ;;  %10896 = vst [vmem:[#allocation26_spill] sm:$0xff] %v8029_v60  ;;  %v8036_v63 = vld [vmem:[%s10421_s5 + $0x138] sm:$0xff] }
 0x37a   :  { %10894 = vst [vmem:[#allocation24_spill] sm:$0xff] %v8017_v58  ;;  %10897 = vst [vmem:[#allocation27_spill] sm:$0xff] %v8036_v63 }
 0x37b   :  { %1341 = vmatmul.mubr.f32.vlgmr.msra.gmra.mxu0 %v7777_v0  ;;  %5309 = vmatmul.mubr.f32.vlgmr.msra.gmra.mxu1 %v7777_v0 }
 0x37c   :  { %1427 = vmatpush1.msra.mxu0 %v7531_v62  ;;  %5312 = vmatpush3.msra.mxu1 %v7785_v1 }
 0x37d   :  { %1428 = vmatprep.subr.mxu0 %v7538_v44  ;;  %5313 = vmatprep.subr.mxu1 %v10730_v22 }
 0x37e   :  { %1429 = vmatpush1.msra.mxu0 %v7545_v3  ;;  %5314 = vmatpush3.msra.mxu1 %v7794_v55 }
 0x37f   :  { %1430 = vmatprep.subr.mxu0 %v7552_v21  ;;  %5315 = vmatprep.subr.mxu1 %v10730_v22 }
 0x380   :  { %1431 = vmatpush1.msra.mxu0 %v7559_v24  ;;  %5316 = vmatpush3.msra.mxu1 %v7803_v2 }
 0x381   :  { %1432 = vmatprep.subr.mxu0 %v7566_v27  ;;  %5317 = vmatprep.subr.mxu1 %v10730_v22 }
 0x382   :  { %1433 = vmatpush1.msra.mxu0 %v7573_v39  ;;  %5318 = vmatpush3.msra.mxu1 %v7812_v6 }
 0x383   :  { %1434 = vmatprep.subr.mxu0 %v7580_v28  ;;  %5319 = vmatprep.subr.mxu1 %v10730_v22 }
 0x384   :  { %1435 = vmatpush1.msra.mxu0 %v7587_v56  ;;  %5320 = vmatpush3.msra.mxu1 %v7821_v7 }
 0x385   :  { %1436 = vmatprep.subr.mxu0 %v7594_v29  ;;  %5321 = vmatprep.subr.mxu1 %v10730_v22 }
 0x386   :  { %1437 = vmatpush1.msra.mxu0 %v7601_v5  ;;  %5322 = vmatpush3.msra.mxu1 %v7830_v8 }
 0x387   :  { %1438 = vmatprep.subr.mxu0 %v7608_v30  ;;  %5323 = vmatprep.subr.mxu1 %v10730_v22 }
 0x388   :  { %1439 = vmatpush1.msra.mxu0 %v7615_v25  ;;  %5324 = vmatpush3.msra.mxu1 %v7839_v9 }
 0x389   :  { %1440 = vmatprep.subr.mxu0 %v7622_v31  ;;  %5325 = vmatprep.subr.mxu1 %v10730_v22 }
 0x38a   :  { %1441 = vmatpush1.msra.mxu0 %v7629_v11  ;;  %5326 = vmatpush3.msra.mxu1 %v7848_v42 }
 0x38b   :  { %1442 = vmatprep.subr.mxu0 %v7636_v32  ;;  %5327 = vmatprep.subr.mxu1 %v10730_v22 }
 0x38c   :  { %1443 = vmatpush1.msra.mxu0 %v7643_v20  ;;  %5328 = vmatpush3.msra.mxu1 %v7857_v43 }
 0x38d   :  { %1444 = vmatprep.subr.mxu0 %v7650_v33  ;;  %5329 = vmatprep.subr.mxu1 %v10730_v22 }
 0x38e   :  { %1445 = vmatpush1.msra.mxu0 %v7657_v40  ;;  %5330 = vmatpush3.msra.mxu1 %v7866_v41 }
 0x38f   :  { %1446 = vmatprep.subr.mxu0 %v7872_v50  ;;  %5331 = vmatprep.subr.mxu1 %v10730_v22 }
 0x390   :  { %1447 = vmatpush1.msra.mxu0 %v7879_v23  ;;  %5332 = vmatpush3.msra.mxu1 %v7885_v45 }
 0x391   :  { %1448 = vmatprep.subr.mxu0 %v7891_v13  ;;  %5333 = vmatprep.subr.mxu1 %v10730_v22 }
 0x392   :  { %1449 = vmatpush1.msra.mxu0 %v7898_v14  ;;  %5334 = vmatpush3.msra.mxu1 %v7904_v15 }
 0x393   :  { %1450 = vmatprep.subr.mxu0 %v7910_v17  ;;  %5335 = vmatprep.subr.mxu1 %v10730_v22 }
 0x394   :  { %1451 = vmatpush1.msra.mxu0 %v7917_v18  ;;  %5336 = vmatpush3.msra.mxu1 %v7923_v19 }
 0x395   :  { %1452 = vmatprep.subr.mxu0 %v7929_v34  ;;  %5337 = vmatprep.subr.mxu1 %v10730_v22 }
 0x396   :  { %1453 = vmatpush1.msra.mxu0 %v7936_v35  ;;  %5338 = vmatpush3.msra.mxu1 %v7942_v36 }
 0x397   :  { %1454 = vmatprep.subr.mxu0 %v7948_v37  ;;  %5339 = vmatprep.subr.mxu1 %v10730_v22 }
 0x398   :  { %1455 = vmatpush1.msra.mxu0 %v7955_v38  ;;  %5340 = vmatpush3.msra.mxu1 %v7961_v46 }
 0x399   :  { %1456 = vmatprep.subr.mxu0 %v7967_v47  ;;  %5341 = vmatprep.subr.mxu1 %v10730_v22 }
 0x39a   :  { %1457 = vmatpush1.msra.mxu0 %v7974_v48  ;;  %1490 = vmatprep.mubr.f32.mxu0 %v10730_v22  ;;  %v10942_v48 = vld [vmem:[#allocation71_spill] sm:$0xff] }
 0x39b   :  { %5342 = vmatpush3.msra.mxu1 %v7981_v51  ;;  %5343 = vmatprep.mubr.msk.f32.mxu1 %vm6421_vm0, %v10730_v22 }
 0x39c   :  { %1491 = vmatmul.mubr.f32.vlgmr.msra.gmra.mxu0 %v7777_v0  ;;  %5344 = vmatmul.mubr.f32.vlgmr.msra.gmra.mxu1 %v7777_v0 }
 0x39d   :  { %1587 = vmatprep.subr.mxu0 %v7991_v52  ;;  %5346 = vmatprep.subr.mxu1 %v10730_v22 }
 0x39e   :  { %1588 = vmatpush1.msra.mxu0 %v7998_v53  ;;  %5347 = vmatpush3.msra.mxu1 %v8004_v54  ;;  %v10941_v54 = vld [vmem:[#allocation70_spill] sm:$0xff] }
 0x39f   :  { %1589 = vmatprep.subr.mxu0 %v8010_v57  ;;  %5348 = vmatprep.subr.mxu1 %v10730_v22 }
 0x3a0   :  { %1590 = vmatpush1.msra.mxu0 %v8017_v58  ;;  %5349 = vmatpush3.msra.mxu1 %v8023_v59 }
 0x3a1   :  { %1591 = vmatprep.subr.mxu0 %v8029_v60  ;;  %5350 = vmatprep.subr.mxu1 %v10730_v22 }
 0x3a2   :  { %1592 = vmatpush1.msra.mxu0 %v8036_v63  ;;  %5351 = vmatpush3.msra.mxu1 %v8042_v26  ;;  %v8061_v26 = vld [vmem:[%s10421_s5 + $0x130] sm:$0xff] }
 0x3a3   :  { %1593 = vmatprep.subr.mxu0 %v8048_v10  ;;  %5352 = vmatprep.subr.mxu1 %v10730_v22  ;;  %10901 = vst [vmem:[#allocation66_spill] sm:$0xff] %v8061_v26  ;;  %v8067_v10 = vld [vmem:[%s10421_s5 + $0x110] sm:$0xff] }
 0x3a4   :  { %1594 = vmatpush1.msra.mxu0 %v8055_v4  ;;  %5353 = vmatpush3.msra.mxu1 %v8061_v26  ;;  %10902 = vst [vmem:[#allocation67_spill] sm:$0xff] %v8067_v10  ;;  %v8074_v4 = vld [vmem:[%s10421_s5 + $0x108] sm:$0xff]  ;;  %v8080_v26 = vld [vmem:[%s10421_s5 + $0x118] sm:$0xff] }
 0x3a5   :  { %1595 = vmatprep.subr.mxu0 %v8067_v10  ;;  %5354 = vmatprep.subr.mxu1 %v10730_v22  ;;  %10903 = vst [vmem:[#allocation79_spill] sm:$0xff] %v8074_v4  ;;  %10904 = vst [vmem:[#allocation30_spill] sm:$0xff] %v8080_v26  ;;  %v8086_v10 = vld [vmem:[%s10421_s5 + $0xf8] sm:$0xff] }
 0x3a6   :  { %1596 = vmatpush1.msra.mxu0 %v8074_v4  ;;  %5355 = vmatpush3.msra.mxu1 %v8080_v26  ;;  %10905 = vst [vmem:[#allocation31_spill] sm:$0xff] %v8086_v10  ;;  %v8093_v4 = vld [vmem:[%s10421_s5 + $0xf0] sm:$0xff]  ;;  %v8099_v26 = vld [vmem:[%s10421_s5 + $0x100] sm:$0xff] }
 0x3a7   :  { %1597 = vmatprep.subr.mxu0 %v8086_v10  ;;  %5356 = vmatprep.subr.mxu1 %v10730_v22  ;;  %10906 = vst [vmem:[#allocation32_spill] sm:$0xff] %v8093_v4  ;;  %10907 = vst [vmem:[#allocation33_spill] sm:$0xff] %v8099_v26  ;;  %v8105_v10 = vld [vmem:[%s10421_s5 + $0xe0] sm:$0xff] }
 0x3a8   :  { %1598 = vmatpush1.msra.mxu0 %v8093_v4  ;;  %5357 = vmatpush3.msra.mxu1 %v8099_v26  ;;  %10908 = vst [vmem:[#allocation34_spill] sm:$0xff] %v8105_v10  ;;  %v8112_v4 = vld [vmem:[%s10421_s5 + $0xd8] sm:$0xff]  ;;  %v8118_v26 = vld [vmem:[%s10421_s5 + $0xe8] sm:$0xff] }
 0x3a9   :  { %1599 = vmatprep.subr.mxu0 %v8105_v10  ;;  %5358 = vmatprep.subr.mxu1 %v10730_v22  ;;  %10909 = vst [vmem:[#allocation35_spill] sm:$0xff] %v8112_v4  ;;  %10910 = vst [vmem:[#allocation36_spill] sm:$0xff] %v8118_v26  ;;  %v8124_v10 = vld [vmem:[%s10421_s5 + $0xc8] sm:$0xff] }
 0x3aa   :  { %1600 = vmatpush1.msra.mxu0 %v8112_v4  ;;  %5359 = vmatpush3.msra.mxu1 %v8118_v26  ;;  %10911 = vst [vmem:[#allocation37_spill] sm:$0xff] %v8124_v10  ;;  %v8131_v4 = vld [vmem:[%s10421_s5 + $0xc0] sm:$0xff]  ;;  %v8137_v26 = vld [vmem:[%s10421_s5 + $0xd0] sm:$0xff] }
 0x3ab   :  { %1601 = vmatprep.subr.mxu0 %v8124_v10  ;;  %5360 = vmatprep.subr.mxu1 %v10730_v22  ;;  %10912 = vst [vmem:[#allocation38_spill] sm:$0xff] %v8131_v4  ;;  %10913 = vst [vmem:[#allocation39_spill] sm:$0xff] %v8137_v26  ;;  %v8143_v10 = vld [vmem:[%s10421_s5 + $0xb0] sm:$0xff] }
 0x3ac   :  { %1602 = vmatpush1.msra.mxu0 %v8131_v4  ;;  %5361 = vmatpush3.msra.mxu1 %v8137_v26  ;;  %10914 = vst [vmem:[#allocation40_spill] sm:$0xff] %v8143_v10  ;;  %v8150_v4 = vld [vmem:[%s10421_s5 + $0xa8] sm:$0xff]  ;;  %v8156_v26 = vld [vmem:[%s10421_s5 + $0xb8] sm:$0xff] }
 0x3ad   :  { %1603 = vmatprep.subr.mxu0 %v8143_v10  ;;  %5362 = vmatprep.subr.mxu1 %v10730_v22  ;;  %10915 = vst [vmem:[#allocation41_spill] sm:$0xff] %v8150_v4  ;;  %10916 = vst [vmem:[#allocation42_spill] sm:$0xff] %v8156_v26  ;;  %v8162_v10 = vld [vmem:[%s10421_s5 + $0x98] sm:$0xff] }
 0x3ae   :  { %1604 = vmatpush1.msra.mxu0 %v8150_v4  ;;  %5363 = vmatpush3.msra.mxu1 %v8156_v26  ;;  %10917 = vst [vmem:[#allocation43_spill] sm:$0xff] %v8162_v10  ;;  %v8169_v4 = vld [vmem:[%s10421_s5 + $0x90] sm:$0xff]  ;;  %v8175_v26 = vld [vmem:[%s10421_s5 + $0xa0] sm:$0xff] }
 0x3af   :  { %1605 = vmatprep.subr.mxu0 %v8162_v10  ;;  %5364 = vmatprep.subr.mxu1 %v10730_v22  ;;  %10918 = vst [vmem:[#allocation44_spill] sm:$0xff] %v8169_v4  ;;  %10919 = vst [vmem:[#allocation45_spill] sm:$0xff] %v8175_v26  ;;  %v8181_v10 = vld [vmem:[%s10421_s5 + $0x80] sm:$0xff] }
 0x3b0   :  { %1606 = vmatpush1.msra.mxu0 %v8169_v4  ;;  %5365 = vmatpush3.msra.mxu1 %v8175_v26  ;;  %10920 = vst [vmem:[#allocation46_spill] sm:$0xff] %v8181_v10  ;;  %v8188_v4 = vld [vmem:[%s10421_s5 + $0x78] sm:$0xff]  ;;  %v8194_v26 = vld [vmem:[%s10421_s5 + $0x88] sm:$0xff] }
 0x3b1   :  { %1607 = vmatprep.subr.mxu0 %v8181_v10  ;;  %5366 = vmatprep.subr.mxu1 %v10730_v22  ;;  %10921 = vst [vmem:[#allocation47_spill] sm:$0xff] %v8188_v4  ;;  %10922 = vst [vmem:[#allocation48_spill] sm:$0xff] %v8194_v26  ;;  %v8200_v10 = vld [vmem:[%s10421_s5 + $0x68] sm:$0xff] }
 0x3b2   :  { %1608 = vmatpush1.msra.mxu0 %v8188_v4  ;;  %5367 = vmatpush3.msra.mxu1 %v8194_v26  ;;  %10923 = vst [vmem:[#allocation49_spill] sm:$0xff] %v8200_v10  ;;  %v8207_v4 = vld [vmem:[%s10421_s5 + $0x60] sm:$0xff]  ;;  %v8213_v26 = vld [vmem:[%s10421_s5 + $0x70] sm:$0xff] }
 0x3b3   :  { %1609 = vmatprep.subr.mxu0 %v8200_v10  ;;  %5368 = vmatprep.subr.mxu1 %v10730_v22  ;;  %10924 = vst [vmem:[#allocation50_spill] sm:$0xff] %v8207_v4  ;;  %10925 = vst [vmem:[#allocation51_spill] sm:$0xff] %v8213_v26  ;;  %v8219_v10 = vld [vmem:[%s10421_s5 + $0x50] sm:$0xff] }
 0x3b4   :  { %1610 = vmatpush1.msra.mxu0 %v8207_v4  ;;  %5369 = vmatpush3.msra.mxu1 %v8213_v26  ;;  %10926 = vst [vmem:[#allocation52_spill] sm:$0xff] %v8219_v10  ;;  %v8226_v4 = vld [vmem:[%s10421_s5 + $0x48] sm:$0xff]  ;;  %v8232_v26 = vld [vmem:[%s10421_s5 + $0x58] sm:$0xff] }
 0x3b5   :  { %1611 = vmatprep.subr.mxu0 %v8219_v10  ;;  %5370 = vmatprep.subr.mxu1 %v10730_v22  ;;  %10927 = vst [vmem:[#allocation53_spill] sm:$0xff] %v8226_v4  ;;  %10928 = vst [vmem:[#allocation54_spill] sm:$0xff] %v8232_v26  ;;  %v8238_v10 = vld [vmem:[%s10421_s5 + $0x38] sm:$0xff] }
 0x3b6   :  { %1612 = vmatpush1.msra.mxu0 %v8226_v4  ;;  %5371 = vmatpush3.msra.mxu1 %v8232_v26  ;;  %10929 = vst [vmem:[#allocation55_spill] sm:$0xff] %v8238_v10  ;;  %v8245_v4 = vld [vmem:[%s10421_s5 + $0x30] sm:$0xff]  ;;  %v8251_v26 = vld [vmem:[%s10421_s5 + $0x40] sm:$0xff] }
 0x3b7   :  { %1613 = vmatprep.subr.mxu0 %v8238_v10  ;;  %5372 = vmatprep.subr.mxu1 %v10730_v22  ;;  %10930 = vst [vmem:[#allocation56_spill] sm:$0xff] %v8245_v4  ;;  %10931 = vst [vmem:[#allocation57_spill] sm:$0xff] %v8251_v26  ;;  %v8257_v10 = vld [vmem:[%s10421_s5 + $0x20] sm:$0xff] }
 0x3b8   :  { %1614 = vmatpush1.msra.mxu0 %v8245_v4  ;;  %5373 = vmatpush3.msra.mxu1 %v8251_v26  ;;  %10932 = vst [vmem:[#allocation58_spill] sm:$0xff] %v8257_v10  ;;  %v8264_v4 = vld [vmem:[%s10421_s5 + $0x18] sm:$0xff]  ;;  %v8270_v26 = vld [vmem:[%s10421_s5 + $0x28] sm:$0xff] }
 0x3b9   :  { %1615 = vmatprep.subr.mxu0 %v8257_v10  ;;  %5374 = vmatprep.subr.mxu1 %v10730_v22  ;;  %10933 = vst [vmem:[#allocation59_spill] sm:$0xff] %v8264_v4  ;;  %10934 = vst [vmem:[#allocation60_spill] sm:$0xff] %v8270_v26  ;;  %v8276_v10 = vld [vmem:[%s10421_s5 + $0x8] sm:$0xff] }
 0x3ba   :  { %1616 = vmatpush1.msra.mxu0 %v8264_v4  ;;  %5375 = vmatpush3.msra.mxu1 %v8270_v26  ;;  %10935 = vst [vmem:[#allocation61_spill] sm:$0xff] %v8276_v10  ;;  %v8283_v4 = vld [vmem:[%s10421_s5] sm:$0xff]  ;;  %v8289_v26 = vld [vmem:[%s10421_s5 + $0x10] sm:$0xff] }
 0x3bb   :  { %1617 = vmatprep.subr.mxu0 %v8276_v10  ;;  %5376 = vmatprep.subr.mxu1 %v10730_v22  ;;  %10936 = vst [vmem:[#allocation62_spill] sm:$0xff] %v8283_v4  ;;  %10937 = vst [vmem:[#allocation63_spill] sm:$0xff] %v8289_v26 }
 0x3bc   :  { %1618 = vmatpush1.msra.mxu0 %v8283_v4  ;;  %5377 = vmatpush3.msra.mxu1 %v8289_v26 }
 0x3bd   :  { %1651 = vmatprep.mubr.f32.mxu0 %v10730_v22  ;;  %5378 = vmatprep.mubr.msk.f32.mxu1 %vm6421_vm0, %v10730_v22 }
 0x3be   :  { %1737 = vmatprep.subr.mxu0 %v7760_v16  ;;  %5381 = vmatprep.subr.mxu1 %v10730_v22 }
 0x43b   :  { %v8297_v10 = vpop.f32.mrf.mxu1  ;;  %v8299_v4 = vpop.f32.mrf.mxu0 }
 0x43c   :  { %10938 = vst [vmem:[#allocation68_spill] sm:$0xff] %v8297_v10  ;;  %10939 = vst [vmem:[#allocation69_spill] sm:$0xff] %v8299_v4 }
 0x43d   :  { %v5310_v63 = vpop.f32.mrf.mxu1  ;;  %v8301_v60 = vpop.f32.mrf.mxu0 }
 0x43e   :  { %10940 = vst [vmem:[#allocation84_spill] sm:$0xff] %v8301_v60 }
 0x45c   :  { %v1492_v59 = vpop.f32.mrf.mxu0  ;;  %v1563_v58 = vpop.f32.mrf.mxu1 }
 0x45d   :  { %v1493_v26 = vadd.f32 %v1492_v59, %v10881_v12  ;;  %v1564_v4 = vadd.f32 %v1563_v58, %v7368_v61  ;;  %v10952_v58 = vld [vmem:[#allocation23_spill] sm:$0xff] }
 0x45e   :  { %v5345_v57 = vpop.f32.mrf.mxu1  ;;  %v1494_v51 = vpop.f32.mrf.mxu0 }
 0x45f   :  { %v1567_v53 = vadd.f32 %v1493_v26, %v10941_v54  ;;  %v1495_v16 = vadd.f32 %v1494_v51, %v7356_v49  ;;  %v10943_v57 = vld [vmem:[#allocation83_spill] sm:$0xff]  ;;  %v10951_v54 = vld [vmem:[#allocation22_spill] sm:$0xff] }
 0x461   :  { %v4571_v52 = vmul.f32 -1.442695, %v1567_v53  ;;  %v1568_v47 = vadd.f32 %v1495_v16, %v10942_v48  ;;  %v10950_v48 = vld [vmem:[#allocation21_spill] sm:$0xff] }
 0x463   :  { %6028 = vpow2.f32 %v4571_v52  ;;  %v4572_v10 = vmul.f32 -1.442695, %v1568_v47 }
 0x465   :  { %6030 = vpow2.f32 %v4572_v10  ;;  %v10945_v10 = vld [vmem:[#allocation16_spill] sm:$0xff] }
 0x470   :  { %v6029_v63 = vpop.eup %6028 }
 0x471   :  { %v1575_v46 = vadd.f32 1.0, %v6029_v63  ;;  %v10954_v63 = vld [vmem:[#allocation25_spill] sm:$0xff] }
 0x472   :  { %v6031_v60 = vpop.eup %6030 }
 0x473   :  { %6032 = vrcp.f32 %v1575_v46  ;;  %v1576_v26 = vadd.f32 1.0, %v6031_v60  ;;  %v10949_v46 = vld [vmem:[#allocation20_spill] sm:$0xff] }
 0x474   :  { %v10953_v60 = vld [vmem:[#allocation24_spill] sm:$0xff] }
 0x480   :  { %v6033_v38 = vpop.eup %6032 }
 0x481   :  { %v1581_v59 = vmul.f32 %v6033_v38, %v1564_v4  ;;  %v10944_v4 = vld [vmem:[#allocation15_spill] sm:$0xff] }
 0x482   :  { %v10948_v38 = vld [vmem:[#allocation19_spill] sm:$0xff] }
 0x483   :  { %v1582_v12 = vadd.f32 %v1581_v59, %v10943_v57  ;;  %v10955_v59 = vld [vmem:[#allocation26_spill] sm:$0xff]  ;;  %v10956_v57 = vld [vmem:[#allocation27_spill] sm:$0xff] }
 0x485   :  { %6034 = vtanh.f32 %v1582_v12  ;;  %v10946_v12 = vld [vmem:[#allocation17_spill] sm:$0xff] }
 0x486   :  { %6036 = vrcp.f32 %v1576_v26  ;;  %v10957_v26 = vld [vmem:[#allocation28_spill] sm:$0xff] }
 0x492   :  { %v6035_v52 = vpop.eup %6034 }
 0x493   :  { %v1584_v51 = vsub.f32 %v7777_v0, %v6035_v52  ;;  %v6037_v53 = vpop.eup %6036  ;;  %v10947_v0 = vld [vmem:[#allocation18_spill] sm:$0xff] }
 0x495   :  { %v1585_v16 = vmul.f32 %v6037_v53, %v1584_v51  ;;  %v10959_v51 = vld [vmem:[#allocation7_spill] sm:$0xff]  ;;  %v10960_v53 = vld [vmem:[#allocation66_spill] sm:$0xff] }
 0x497   :  { %v8310_v47 = vadd.f32 %v6035_v52, %v1585_v16  ;;  %v10958_v52 = vld [vmem:[#allocation29_spill] sm:$0xff]  ;;  %v10961_v16 = vld [vmem:[#allocation67_spill] sm:$0xff] }
 0x499   :  { %1652 = vmatmul.mubr.f32.vlgmr.msra.gmra.mxu0 %v8310_v47  ;;  %5379 = vmatmul.mubr.f32.vlgmr.msra.gmra.mxu1 %v8310_v47 }
 0x49a   :  { %1738 = vmatpush1.msra.mxu0 %v7531_v62  ;;  %5382 = vmatpush3.msra.mxu1 %v7785_v1 }
 0x49b   :  { %1739 = vmatprep.subr.mxu0 %v7538_v44  ;;  %5383 = vmatprep.subr.mxu1 %v10730_v22 }
 0x49c   :  { %1740 = vmatpush1.msra.mxu0 %v7545_v3  ;;  %5384 = vmatpush3.msra.mxu1 %v7794_v55 }
 0x49d   :  { %1741 = vmatprep.subr.mxu0 %v7552_v21  ;;  %5385 = vmatprep.subr.mxu1 %v10730_v22 }
 0x49e   :  { %1742 = vmatpush1.msra.mxu0 %v7559_v24  ;;  %5386 = vmatpush3.msra.mxu1 %v7803_v2 }
 0x49f   :  { %1743 = vmatprep.subr.mxu0 %v7566_v27  ;;  %5387 = vmatprep.subr.mxu1 %v10730_v22 }
 0x4a0   :  { %1744 = vmatpush1.msra.mxu0 %v7573_v39  ;;  %5388 = vmatpush3.msra.mxu1 %v7812_v6 }
 0x4a1   :  { %1745 = vmatprep.subr.mxu0 %v7580_v28  ;;  %5389 = vmatprep.subr.mxu1 %v10730_v22 }
 0x4a2   :  { %1746 = vmatpush1.msra.mxu0 %v7587_v56  ;;  %5390 = vmatpush3.msra.mxu1 %v7821_v7 }
 0x4a3   :  { %1747 = vmatprep.subr.mxu0 %v7594_v29  ;;  %5391 = vmatprep.subr.mxu1 %v10730_v22 }
 0x4a4   :  { %1748 = vmatpush1.msra.mxu0 %v7601_v5  ;;  %5392 = vmatpush3.msra.mxu1 %v7830_v8 }
 0x4a5   :  { %1749 = vmatprep.subr.mxu0 %v7608_v30  ;;  %5393 = vmatprep.subr.mxu1 %v10730_v22 }
 0x4a6   :  { %1750 = vmatpush1.msra.mxu0 %v7615_v25  ;;  %5394 = vmatpush3.msra.mxu1 %v7839_v9 }
 0x4a7   :  { %1751 = vmatprep.subr.mxu0 %v7622_v31  ;;  %5395 = vmatprep.subr.mxu1 %v10730_v22 }
 0x4a8   :  { %1752 = vmatpush1.msra.mxu0 %v7629_v11  ;;  %5396 = vmatpush3.msra.mxu1 %v7848_v42 }
 0x4a9   :  { %1753 = vmatprep.subr.mxu0 %v7636_v32  ;;  %5397 = vmatprep.subr.mxu1 %v10730_v22 }
 0x4aa   :  { %1754 = vmatpush1.msra.mxu0 %v7643_v20  ;;  %5398 = vmatpush3.msra.mxu1 %v7857_v43 }
 0x4ab   :  { %1755 = vmatprep.subr.mxu0 %v7650_v33  ;;  %5399 = vmatprep.subr.mxu1 %v10730_v22 }
 0x4ac   :  { %1756 = vmatpush1.msra.mxu0 %v7657_v40  ;;  %5400 = vmatpush3.msra.mxu1 %v7866_v41 }
 0x4ad   :  { %1757 = vmatprep.subr.mxu0 %v7872_v50  ;;  %5401 = vmatprep.subr.mxu1 %v10730_v22 }
 0x4ae   :  { %1758 = vmatpush1.msra.mxu0 %v7879_v23  ;;  %5402 = vmatpush3.msra.mxu1 %v7885_v45 }
 0x4af   :  { %1759 = vmatprep.subr.mxu0 %v7891_v13  ;;  %5403 = vmatprep.subr.mxu1 %v10730_v22 }
 0x4b0   :  { %1760 = vmatpush1.msra.mxu0 %v7898_v14  ;;  %5404 = vmatpush3.msra.mxu1 %v7904_v15 }
 0x4b1   :  { %1761 = vmatprep.subr.mxu0 %v7910_v17  ;;  %5405 = vmatprep.subr.mxu1 %v10730_v22 }
 0x4b2   :  { %1762 = vmatpush1.msra.mxu0 %v7917_v18  ;;  %5406 = vmatpush3.msra.mxu1 %v7923_v19 }
 0x4b3   :  { %1763 = vmatprep.subr.mxu0 %v7929_v34  ;;  %5407 = vmatprep.subr.mxu1 %v10730_v22 }
 0x4b4   :  { %1764 = vmatpush1.msra.mxu0 %v7936_v35  ;;  %5408 = vmatpush3.msra.mxu1 %v7942_v36 }
 0x4b5   :  { %1765 = vmatprep.subr.mxu0 %v7948_v37  ;;  %5409 = vmatprep.subr.mxu1 %v10730_v22 }
 0x4b6   :  { %1766 = vmatpush1.msra.mxu0 %v10944_v4  ;;  %5410 = vmatpush3.msra.mxu1 %v10945_v10 }
 0x4b7   :  { %1767 = vmatprep.subr.mxu0 %v10946_v12  ;;  %5411 = vmatprep.subr.mxu1 %v10730_v22 }
 0x4b8   :  { %1768 = vmatpush1.msra.mxu0 %v10947_v0  ;;  %1801 = vmatprep.mubr.f32.mxu0 %v10730_v22  ;;  %v11003_v0 = vld [vmem:[#allocation73_spill] sm:$0xff] }
 0x4b9   :  { %5412 = vmatpush3.msra.mxu1 %v10948_v38  ;;  %5413 = vmatprep.mubr.msk.f32.mxu1 %vm6421_vm0, %v10730_v22 }
 0x4ba   :  { %1802 = vmatmul.mubr.f32.vlgmr.msra.gmra.mxu0 %v8310_v47  ;;  %5414 = vmatmul.mubr.f32.vlgmr.msra.gmra.mxu1 %v8310_v47 }
 0x4bb   :  { %1898 = vmatprep.subr.mxu0 %v10949_v46  ;;  %5416 = vmatprep.subr.mxu1 %v10730_v22 }
 0x4bc   :  { %1899 = vmatpush1.msra.mxu0 %v10950_v48  ;;  %5417 = vmatpush3.msra.mxu1 %v10951_v54  ;;  %v11002_v54 = vld [vmem:[#allocation72_spill] sm:$0xff] }
 0x4bd   :  { %1900 = vmatprep.subr.mxu0 %v10952_v58  ;;  %5418 = vmatprep.subr.mxu1 %v10730_v22 }
 0x4be   :  { %1901 = vmatpush1.msra.mxu0 %v10953_v60  ;;  %5419 = vmatpush3.msra.mxu1 %v10954_v63  ;;  %v10962_v63 = vld [vmem:[#allocation79_spill] sm:$0xff] }
 0x4bf   :  { %1902 = vmatprep.subr.mxu0 %v10955_v59  ;;  %5420 = vmatprep.subr.mxu1 %v10730_v22  ;;  %v10963_v59 = vld [vmem:[#allocation30_spill] sm:$0xff]  ;;  %v10964_v60 = vld [vmem:[#allocation31_spill] sm:$0xff] }
 0x4c0   :  { %1903 = vmatpush1.msra.mxu0 %v10956_v57  ;;  %5421 = vmatpush3.msra.mxu1 %v10957_v26  ;;  %v10965_v26 = vld [vmem:[#allocation32_spill] sm:$0xff]  ;;  %v10967_v57 = vld [vmem:[#allocation34_spill] sm:$0xff] }
 0x4c1   :  { %1904 = vmatprep.subr.mxu0 %v10958_v52  ;;  %5422 = vmatprep.subr.mxu1 %v10730_v22  ;;  %v10966_v52 = vld [vmem:[#allocation33_spill] sm:$0xff] }
 0x4c2   :  { %1905 = vmatpush1.msra.mxu0 %v10959_v51  ;;  %5423 = vmatpush3.msra.mxu1 %v10960_v53  ;;  %v10968_v53 = vld [vmem:[#allocation35_spill] sm:$0xff]  ;;  %v10970_v51 = vld [vmem:[#allocation37_spill] sm:$0xff] }
 0x4c3   :  { %1906 = vmatprep.subr.mxu0 %v10961_v16  ;;  %5424 = vmatprep.subr.mxu1 %v10730_v22  ;;  %v10969_v16 = vld [vmem:[#allocation36_spill] sm:$0xff] }
 0x4c4   :  { %1907 = vmatpush1.msra.mxu0 %v10962_v63  ;;  %5425 = vmatpush3.msra.mxu1 %v10963_v59  ;;  %v10971_v59 = vld [vmem:[#allocation38_spill] sm:$0xff]  ;;  %v10973_v63 = vld [vmem:[#allocation40_spill] sm:$0xff] }
 0x4c5   :  { %1908 = vmatprep.subr.mxu0 %v10964_v60  ;;  %5426 = vmatprep.subr.mxu1 %v10730_v22  ;;  %v10972_v60 = vld [vmem:[#allocation39_spill] sm:$0xff] }
 0x4c6   :  { %1909 = vmatpush1.msra.mxu0 %v10965_v26  ;;  %5427 = vmatpush3.msra.mxu1 %v10966_v52  ;;  %v10974_v52 = vld [vmem:[#allocation41_spill] sm:$0xff]  ;;  %v10976_v26 = vld [vmem:[#allocation43_spill] sm:$0xff] }
 0x4c7   :  { %1910 = vmatprep.subr.mxu0 %v10967_v57  ;;  %5428 = vmatprep.subr.mxu1 %v10730_v22  ;;  %v10975_v57 = vld [vmem:[#allocation42_spill] sm:$0xff] }
 0x4c8   :  { %1911 = vmatpush1.msra.mxu0 %v10968_v53  ;;  %5429 = vmatpush3.msra.mxu1 %v10969_v16  ;;  %v10977_v16 = vld [vmem:[#allocation44_spill] sm:$0xff]  ;;  %v10979_v53 = vld [vmem:[#allocation46_spill] sm:$0xff] }
 0x4c9   :  { %1912 = vmatprep.subr.mxu0 %v10970_v51  ;;  %5430 = vmatprep.subr.mxu1 %v10730_v22  ;;  %v10978_v51 = vld [vmem:[#allocation45_spill] sm:$0xff] }
 0x4ca   :  { %1913 = vmatpush1.msra.mxu0 %v10971_v59  ;;  %5431 = vmatpush3.msra.mxu1 %v10972_v60  ;;  %v10980_v60 = vld [vmem:[#allocation47_spill] sm:$0xff]  ;;  %v10982_v59 = vld [vmem:[#allocation49_spill] sm:$0xff] }
 0x4cb   :  { %1914 = vmatprep.subr.mxu0 %v10973_v63  ;;  %5432 = vmatprep.subr.mxu1 %v10730_v22  ;;  %v10981_v63 = vld [vmem:[#allocation48_spill] sm:$0xff] }
 0x4cc   :  { %1915 = vmatpush1.msra.mxu0 %v10974_v52  ;;  %5433 = vmatpush3.msra.mxu1 %v10975_v57  ;;  %v10983_v57 = vld [vmem:[#allocation50_spill] sm:$0xff]  ;;  %v10985_v52 = vld [vmem:[#allocation52_spill] sm:$0xff] }
 0x4cd   :  { %1916 = vmatprep.subr.mxu0 %v10976_v26  ;;  %5434 = vmatprep.subr.mxu1 %v10730_v22  ;;  %v10984_v26 = vld [vmem:[#allocation51_spill] sm:$0xff] }
 0x4ce   :  { %1917 = vmatpush1.msra.mxu0 %v10977_v16  ;;  %5435 = vmatpush3.msra.mxu1 %v10978_v51  ;;  %v10986_v51 = vld [vmem:[#allocation53_spill] sm:$0xff]  ;;  %v10988_v16 = vld [vmem:[#allocation55_spill] sm:$0xff] }
 0x4cf   :  { %1918 = vmatprep.subr.mxu0 %v10979_v53  ;;  %5436 = vmatprep.subr.mxu1 %v10730_v22  ;;  %v10987_v53 = vld [vmem:[#allocation54_spill] sm:$0xff] }
 0x4d0   :  { %1919 = vmatpush1.msra.mxu0 %v10980_v60  ;;  %5437 = vmatpush3.msra.mxu1 %v10981_v63  ;;  %v10989_v63 = vld [vmem:[#allocation56_spill] sm:$0xff]  ;;  %v10991_v60 = vld [vmem:[#allocation58_spill] sm:$0xff] }
 0x4d1   :  { %1920 = vmatprep.subr.mxu0 %v10982_v59  ;;  %5438 = vmatprep.subr.mxu1 %v10730_v22  ;;  %v10990_v59 = vld [vmem:[#allocation57_spill] sm:$0xff] }
 0x4d2   :  { %1921 = vmatpush1.msra.mxu0 %v10983_v57  ;;  %5439 = vmatpush3.msra.mxu1 %v10984_v26  ;;  %v10992_v26 = vld [vmem:[#allocation59_spill] sm:$0xff]  ;;  %v10994_v57 = vld [vmem:[#allocation61_spill] sm:$0xff] }
 0x4d3   :  { %1922 = vmatprep.subr.mxu0 %v10985_v52  ;;  %5440 = vmatprep.subr.mxu1 %v10730_v22  ;;  %v10993_v52 = vld [vmem:[#allocation60_spill] sm:$0xff] }
 0x4d4   :  { %1923 = vmatpush1.msra.mxu0 %v10986_v51  ;;  %5441 = vmatpush3.msra.mxu1 %v10987_v53  ;;  %v10995_v53 = vld [vmem:[#allocation62_spill] sm:$0xff]  ;;  %v11001_v51 = vld [vmem:[#allocation81_spill] sm:$0xff] }
 0x4d5   :  { %1924 = vmatprep.subr.mxu0 %v10988_v16  ;;  %5442 = vmatprep.subr.mxu1 %v10730_v22  ;;  %v10996_v16 = vld [vmem:[#allocation63_spill] sm:$0xff] }
 0x4d6   :  { %1925 = vmatpush1.msra.mxu0 %v10989_v63  ;;  %5443 = vmatpush3.msra.mxu1 %v10990_v59 }
 0x4d7   :  { %1926 = vmatprep.subr.mxu0 %v10991_v60  ;;  %5444 = vmatprep.subr.mxu1 %v10730_v22  ;;  %v10997_v60 = vld [vmem:[#allocation10_spill] sm:$0xff] }
 0x4d8   :  { %1927 = vmatpush1.msra.mxu0 %v10992_v26  ;;  %5445 = vmatpush3.msra.mxu1 %v10993_v52 }
 0x4d9   :  { %1928 = vmatprep.subr.mxu0 %v10994_v57  ;;  %5446 = vmatprep.subr.mxu1 %v10730_v22 }
 0x4da   :  { %1929 = vmatpush1.msra.mxu0 %v10995_v53  ;;  %5447 = vmatpush3.msra.mxu1 %v10996_v16 }
 0x4db   :  { %1962 = vmatprep.mubr.f32.mxu0 %v10730_v22  ;;  %5448 = vmatprep.mubr.msk.f32.mxu1 %vm6421_vm0, %v10730_v22 }
 0x4dc   :  { %2048 = vmatprep.subr.mxu0 %v10997_v60  ;;  %5451 = vmatprep.subr.mxu1 %v10730_v22 }
 0x559   :  { %v8450_v26 = vpop.f32.mrf.mxu1  ;;  %v8452_v59 = vpop.f32.mrf.mxu0 }
 0x55a   :  { %10998 = vst [vmem:[#allocation70_spill] sm:$0xff] %v8450_v26  ;;  %10999 = vst [vmem:[#allocation71_spill] sm:$0xff] %v8452_v59 }
 0x55b   :  { %v5380_v52 = vpop.f32.mrf.mxu1  ;;  %v8454_v57 = vpop.f32.mrf.mxu0 }
 0x55c   :  { %11000 = vst [vmem:[#allocation83_spill] sm:$0xff] %v8454_v57 }
 0x57a   :  { %v1803_v63 = vpop.f32.mrf.mxu0  ;;  %v1874_v53 = vpop.f32.mrf.mxu1 }
 0x57b   :  { %v1804_v16 = vadd.f32 %v1803_v63, %v11001_v51  ;;  %v1875_v59 = vadd.f32 %v1874_v53, %v7368_v61  ;;  %v11032_v53 = vld [vmem:[#allocation38_spill] sm:$0xff] }
 0x57c   :  { %v5415_v58 = vpop.f32.mrf.mxu1  ;;  %v1805_v38 = vpop.f32.mrf.mxu0 }
 0x57d   :  { %v1878_v48 = vadd.f32 %v1804_v16, %v11002_v54  ;;  %v1806_v60 = vadd.f32 %v1805_v38, %v7356_v49  ;;  %v11004_v58 = vld [vmem:[#allocation86_spill] sm:$0xff]  ;;  %v11033_v16 = vld [vmem:[#allocation39_spill] sm:$0xff] }
 0x57f   :  { %v4573_v46 = vmul.f32 -1.442695, %v1878_v48  ;;  %v1879_v12 = vadd.f32 %v1806_v60, %v11003_v0  ;;  %v11027_v60 = vld [vmem:[#allocation33_spill] sm:$0xff] }
 0x581   :  { %6038 = vpow2.f32 %v4573_v46  ;;  %v4574_v26 = vmul.f32 -1.442695, %v1879_v12 }
 0x583   :  { %6040 = vpow2.f32 %v4574_v26  ;;  %v11030_v26 = vld [vmem:[#allocation36_spill] sm:$0xff] }
 0x58e   :  { %v6039_v52 = vpop.eup %6038 }
 0x58f   :  { %v1886_v10 = vadd.f32 1.0, %v6039_v52  ;;  %v11034_v52 = vld [vmem:[#allocation40_spill] sm:$0xff] }
 0x590   :  { %v6041_v57 = vpop.eup %6040 }
 0x591   :  { %6042 = vrcp.f32 %v1886_v10  ;;  %v1887_v54 = vadd.f32 1.0, %v6041_v57  ;;  %v11026_v10 = vld [vmem:[#allocation32_spill] sm:$0xff]  ;;  %v11029_v57 = vld [vmem:[#allocation35_spill] sm:$0xff] }
 0x59e   :  { %v6043_v4 = vpop.eup %6042 }
 0x59f   :  { %v1892_v63 = vmul.f32 %v6043_v4, %v1875_v59  ;;  %v11025_v4 = vld [vmem:[#allocation31_spill] sm:$0xff]  ;;  %v11028_v59 = vld [vmem:[#allocation34_spill] sm:$0xff] }
 0x5a1   :  { %v1893_v51 = vadd.f32 %v1892_v63, %v11004_v58  ;;  %v11035_v63 = vld [vmem:[#allocation41_spill] sm:$0xff]  ;;  %v11036_v58 = vld [vmem:[#allocation42_spill] sm:$0xff] }
 0x5a3   :  { %6044 = vtanh.f32 %v1893_v51  ;;  %v11031_v51 = vld [vmem:[#allocation37_spill] sm:$0xff] }
 0x5a4   :  { %6046 = vrcp.f32 %v1887_v54  ;;  %v11037_v54 = vld [vmem:[#allocation43_spill] sm:$0xff] }
 0x5b0   :  { %v6045_v46 = vpop.eup %6044 }
 0x5b1   :  { %v1895_v38 = vsub.f32 %v8310_v47, %v6045_v46  ;;  %v6047_v48 = vpop.eup %6046  ;;  %v11024_v47 = vld [vmem:[#allocation30_spill] sm:$0xff] }
 0x5b3   :  { %v1896_v0 = vmul.f32 %v6047_v48, %v1895_v38  ;;  %v11039_v38 = vld [vmem:[#allocation45_spill] sm:$0xff]  ;;  %v11040_v48 = vld [vmem:[#allocation46_spill] sm:$0xff] }
 0x5b5   :  { %v8463_v12 = vadd.f32 %v6045_v46, %v1896_v0  ;;  %v11038_v46 = vld [vmem:[#allocation44_spill] sm:$0xff]  ;;  %v11041_v0 = vld [vmem:[#allocation47_spill] sm:$0xff] }
 0x5b7   :  { %1963 = vmatmul.mubr.f32.vlgmr.msra.gmra.mxu0 %v8463_v12  ;;  %5449 = vmatmul.mubr.f32.vlgmr.msra.gmra.mxu1 %v8463_v12 }
 0x5b8   :  { %2049 = vmatpush1.msra.mxu0 %v7531_v62  ;;  %5452 = vmatpush3.msra.mxu1 %v7785_v1  ;;  %v11005_v62 = vld [vmem:[#allocation15_spill] sm:$0xff] }
 0x5b9   :  { %2050 = vmatprep.subr.mxu0 %v7538_v44  ;;  %5453 = vmatprep.subr.mxu1 %v10730_v22  ;;  %v11006_v44 = vld [vmem:[#allocation16_spill] sm:$0xff] }
 0x5ba   :  { %2051 = vmatpush1.msra.mxu0 %v7545_v3  ;;  %5454 = vmatpush3.msra.mxu1 %v7794_v55  ;;  %v11007_v3 = vld [vmem:[#allocation17_spill] sm:$0xff] }
 0x5bb   :  { %2052 = vmatprep.subr.mxu0 %v7552_v21  ;;  %5455 = vmatprep.subr.mxu1 %v10730_v22  ;;  %v11008_v21 = vld [vmem:[#allocation18_spill] sm:$0xff] }
 0x5bc   :  { %2053 = vmatpush1.msra.mxu0 %v7559_v24  ;;  %5456 = vmatpush3.msra.mxu1 %v7803_v2  ;;  %v11009_v24 = vld [vmem:[#allocation19_spill] sm:$0xff] }
 0x5bd   :  { %2054 = vmatprep.subr.mxu0 %v7566_v27  ;;  %5457 = vmatprep.subr.mxu1 %v10730_v22  ;;  %v11010_v27 = vld [vmem:[#allocation20_spill] sm:$0xff] }
 0x5be   :  { %2055 = vmatpush1.msra.mxu0 %v7573_v39  ;;  %5458 = vmatpush3.msra.mxu1 %v7812_v6  ;;  %v11011_v39 = vld [vmem:[#allocation21_spill] sm:$0xff] }
 0x5bf   :  { %2056 = vmatprep.subr.mxu0 %v7580_v28  ;;  %5459 = vmatprep.subr.mxu1 %v10730_v22  ;;  %v11012_v28 = vld [vmem:[#allocation22_spill] sm:$0xff] }
 0x5c0   :  { %2057 = vmatpush1.msra.mxu0 %v7587_v56  ;;  %5460 = vmatpush3.msra.mxu1 %v7821_v7  ;;  %v11013_v56 = vld [vmem:[#allocation23_spill] sm:$0xff] }
 0x5c1   :  { %2058 = vmatprep.subr.mxu0 %v7594_v29  ;;  %5461 = vmatprep.subr.mxu1 %v10730_v22  ;;  %v11014_v29 = vld [vmem:[#allocation24_spill] sm:$0xff] }
 0x5c2   :  { %2059 = vmatpush1.msra.mxu0 %v7601_v5  ;;  %5462 = vmatpush3.msra.mxu1 %v7830_v8  ;;  %v11015_v5 = vld [vmem:[#allocation25_spill] sm:$0xff] }
 0x5c3   :  { %2060 = vmatprep.subr.mxu0 %v7608_v30  ;;  %5463 = vmatprep.subr.mxu1 %v10730_v22  ;;  %v11016_v30 = vld [vmem:[#allocation26_spill] sm:$0xff] }
 0x5c4   :  { %2061 = vmatpush1.msra.mxu0 %v7615_v25  ;;  %5464 = vmatpush3.msra.mxu1 %v7839_v9  ;;  %v11017_v25 = vld [vmem:[#allocation27_spill] sm:$0xff] }
 0x5c5   :  { %2062 = vmatprep.subr.mxu0 %v7622_v31  ;;  %5465 = vmatprep.subr.mxu1 %v10730_v22  ;;  %v11018_v31 = vld [vmem:[#allocation28_spill] sm:$0xff] }
 0x5c6   :  { %2063 = vmatpush1.msra.mxu0 %v7629_v11  ;;  %5466 = vmatpush3.msra.mxu1 %v7848_v42  ;;  %v11019_v11 = vld [vmem:[#allocation29_spill] sm:$0xff] }
 0x5c7   :  { %2064 = vmatprep.subr.mxu0 %v7636_v32  ;;  %5467 = vmatprep.subr.mxu1 %v10730_v22  ;;  %v11020_v32 = vld [vmem:[#allocation7_spill] sm:$0xff] }
 0x5c8   :  { %2065 = vmatpush1.msra.mxu0 %v7643_v20  ;;  %5468 = vmatpush3.msra.mxu1 %v7857_v43  ;;  %v11021_v20 = vld [vmem:[#allocation66_spill] sm:$0xff] }
 0x5c9   :  { %2066 = vmatprep.subr.mxu0 %v7650_v33  ;;  %5469 = vmatprep.subr.mxu1 %v10730_v22  ;;  %v11022_v33 = vld [vmem:[#allocation67_spill] sm:$0xff] }
 0x5ca   :  { %2067 = vmatpush1.msra.mxu0 %v7657_v40  ;;  %5470 = vmatpush3.msra.mxu1 %v7866_v41  ;;  %v11023_v40 = vld [vmem:[#allocation79_spill] sm:$0xff] }
 0x5cb   :  { %2068 = vmatprep.subr.mxu0 %v7872_v50  ;;  %5471 = vmatprep.subr.mxu1 %v10730_v22 }
 0x5cc   :  { %2069 = vmatpush1.msra.mxu0 %v7879_v23  ;;  %5472 = vmatpush3.msra.mxu1 %v7885_v45 }
 0x5cd   :  { %2070 = vmatprep.subr.mxu0 %v7891_v13  ;;  %5473 = vmatprep.subr.mxu1 %v10730_v22 }
 0x5ce   :  { %2071 = vmatpush1.msra.mxu0 %v7898_v14  ;;  %5474 = vmatpush3.msra.mxu1 %v7904_v15 }
 0x5cf   :  { %2072 = vmatprep.subr.mxu0 %v7910_v17  ;;  %5475 = vmatprep.subr.mxu1 %v10730_v22 }
 0x5d0   :  { %2073 = vmatpush1.msra.mxu0 %v7917_v18  ;;  %5476 = vmatpush3.msra.mxu1 %v7923_v19 }
 0x5d1   :  { %2074 = vmatprep.subr.mxu0 %v7929_v34  ;;  %5477 = vmatprep.subr.mxu1 %v10730_v22 }
 0x5d2   :  { %2075 = vmatpush1.msra.mxu0 %v7936_v35  ;;  %5478 = vmatpush3.msra.mxu1 %v7942_v36 }
 0x5d3   :  { %2076 = vmatprep.subr.mxu0 %v7948_v37  ;;  %5479 = vmatprep.subr.mxu1 %v10730_v22 }
 0x5d4   :  { %2077 = vmatpush1.msra.mxu0 %v11005_v62  ;;  %5480 = vmatpush3.msra.mxu1 %v11006_v44 }
 0x5d5   :  { %2078 = vmatprep.subr.mxu0 %v11007_v3  ;;  %5481 = vmatprep.subr.mxu1 %v10730_v22 }
 0x5d6   :  { %2079 = vmatpush1.msra.mxu0 %v11008_v21  ;;  %2112 = vmatprep.mubr.f32.mxu0 %v10730_v22 }
 0x5d7   :  { %5482 = vmatpush3.msra.mxu1 %v11009_v24  ;;  %5483 = vmatprep.mubr.msk.f32.mxu1 %vm6421_vm0, %v10730_v22 }
 0x5d8   :  { %2113 = vmatmul.mubr.f32.vlgmr.msra.gmra.mxu0 %v8463_v12  ;;  %5484 = vmatmul.mubr.f32.vlgmr.msra.gmra.mxu1 %v8463_v12 }
 0x5d9   :  { %2209 = vmatprep.subr.mxu0 %v11010_v27  ;;  %5486 = vmatprep.subr.mxu1 %v10730_v22 }
 0x5da   :  { %2210 = vmatpush1.msra.mxu0 %v11011_v39  ;;  %5487 = vmatpush3.msra.mxu1 %v11012_v28 }
 0x5db   :  { %2211 = vmatprep.subr.mxu0 %v11013_v56  ;;  %5488 = vmatprep.subr.mxu1 %v10730_v22 }
 0x5dc   :  { %2212 = vmatpush1.msra.mxu0 %v11014_v29  ;;  %5489 = vmatpush3.msra.mxu1 %v11015_v5 }
 0x5dd   :  { %2213 = vmatprep.subr.mxu0 %v11016_v30  ;;  %5490 = vmatprep.subr.mxu1 %v10730_v22 }
 0x5de   :  { %2214 = vmatpush1.msra.mxu0 %v11017_v25  ;;  %5491 = vmatpush3.msra.mxu1 %v11018_v31 }
 0x5df   :  { %2215 = vmatprep.subr.mxu0 %v11019_v11  ;;  %5492 = vmatprep.subr.mxu1 %v10730_v22 }
 0x5e0   :  { %2216 = vmatpush1.msra.mxu0 %v11020_v32  ;;  %5493 = vmatpush3.msra.mxu1 %v11021_v20 }
 0x5e1   :  { %2217 = vmatprep.subr.mxu0 %v11022_v33  ;;  %5494 = vmatprep.subr.mxu1 %v10730_v22 }
 0x5e2   :  { %2218 = vmatpush1.msra.mxu0 %v11023_v40  ;;  %5495 = vmatpush3.msra.mxu1 %v11024_v47 }
 0x5e3   :  { %2219 = vmatprep.subr.mxu0 %v11025_v4  ;;  %5496 = vmatprep.subr.mxu1 %v10730_v22 }
 0x5e4   :  { %2220 = vmatpush1.msra.mxu0 %v11026_v10  ;;  %5497 = vmatpush3.msra.mxu1 %v11027_v60  ;;  %v11064_v60 = vld [vmem:[#allocation76_spill] sm:$0xff] }
 0x5e5   :  { %2221 = vmatprep.subr.mxu0 %v11028_v59  ;;  %5498 = vmatprep.subr.mxu1 %v10730_v22 }
 0x5e6   :  { %2222 = vmatpush1.msra.mxu0 %v11029_v57  ;;  %5499 = vmatpush3.msra.mxu1 %v11030_v26 }
 0x5e7   :  { %2223 = vmatprep.subr.mxu0 %v11031_v51  ;;  %5500 = vmatprep.subr.mxu1 %v10730_v22  ;;  %v11063_v51 = vld [vmem:[#allocation75_spill] sm:$0xff] }
 0x5e8   :  { %2224 = vmatpush1.msra.mxu0 %v11032_v53  ;;  %5501 = vmatpush3.msra.mxu1 %v11033_v16  ;;  %v11043_v16 = vld [vmem:[#allocation49_spill] sm:$0xff] }
 0x5e9   :  { %2225 = vmatprep.subr.mxu0 %v11034_v52  ;;  %5502 = vmatprep.subr.mxu1 %v10730_v22  ;;  %v11042_v52 = vld [vmem:[#allocation48_spill] sm:$0xff] }
 0x5ea   :  { %2226 = vmatpush1.msra.mxu0 %v11035_v63  ;;  %5503 = vmatpush3.msra.mxu1 %v11036_v58  ;;  %v11044_v58 = vld [vmem:[#allocation50_spill] sm:$0xff]  ;;  %v11046_v63 = vld [vmem:[#allocation52_spill] sm:$0xff] }
 0x5eb   :  { %2227 = vmatprep.subr.mxu0 %v11037_v54  ;;  %5504 = vmatprep.subr.mxu1 %v10730_v22  ;;  %v11045_v54 = vld [vmem:[#allocation51_spill] sm:$0xff] }
 0x5ec   :  { %2228 = vmatpush1.msra.mxu0 %v11038_v46  ;;  %5505 = vmatpush3.msra.mxu1 %v11039_v38  ;;  %v11047_v38 = vld [vmem:[#allocation53_spill] sm:$0xff]  ;;  %v11049_v46 = vld [vmem:[#allocation55_spill] sm:$0xff] }
 0x5ed   :  { %2229 = vmatprep.subr.mxu0 %v11040_v48  ;;  %5506 = vmatprep.subr.mxu1 %v10730_v22  ;;  %v11048_v48 = vld [vmem:[#allocation54_spill] sm:$0xff] }
 0x5ee   :  { %2230 = vmatpush1.msra.mxu0 %v11041_v0  ;;  %5507 = vmatpush3.msra.mxu1 %v11042_v52  ;;  %v11050_v52 = vld [vmem:[#allocation56_spill] sm:$0xff]  ;;  %v11052_v0 = vld [vmem:[#allocation58_spill] sm:$0xff] }
 0x5ef   :  { %2231 = vmatprep.subr.mxu0 %v11043_v16  ;;  %5508 = vmatprep.subr.mxu1 %v10730_v22  ;;  %v11051_v16 = vld [vmem:[#allocation57_spill] sm:$0xff] }
 0x5f0   :  { %2232 = vmatpush1.msra.mxu0 %v11044_v58  ;;  %5509 = vmatpush3.msra.mxu1 %v11045_v54  ;;  %v11053_v54 = vld [vmem:[#allocation59_spill] sm:$0xff]  ;;  %v11055_v58 = vld [vmem:[#allocation61_spill] sm:$0xff] }
 0x5f1   :  { %2233 = vmatprep.subr.mxu0 %v11046_v63  ;;  %5510 = vmatprep.subr.mxu1 %v10730_v22  ;;  %v11054_v63 = vld [vmem:[#allocation60_spill] sm:$0xff] }
 0x5f2   :  { %2234 = vmatpush1.msra.mxu0 %v11047_v38  ;;  %5511 = vmatpush3.msra.mxu1 %v11048_v48  ;;  %v11056_v48 = vld [vmem:[#allocation62_spill] sm:$0xff]  ;;  %v11062_v38 = vld [vmem:[#allocation81_spill] sm:$0xff] }
 0x5f3   :  { %2235 = vmatprep.subr.mxu0 %v11049_v46  ;;  %5512 = vmatprep.subr.mxu1 %v10730_v22  ;;  %v11057_v46 = vld [vmem:[#allocation63_spill] sm:$0xff] }
 0x5f4   :  { %2236 = vmatpush1.msra.mxu0 %v11050_v52  ;;  %5513 = vmatpush3.msra.mxu1 %v11051_v16 }
 0x5f5   :  { %2237 = vmatprep.subr.mxu0 %v11052_v0  ;;  %5514 = vmatprep.subr.mxu1 %v10730_v22  ;;  %v11058_v0 = vld [vmem:[#allocation10_spill] sm:$0xff] }
 0x5f6   :  { %2238 = vmatpush1.msra.mxu0 %v11053_v54  ;;  %5515 = vmatpush3.msra.mxu1 %v11054_v63 }
 0x5f7   :  { %2239 = vmatprep.subr.mxu0 %v11055_v58  ;;  %5516 = vmatprep.subr.mxu1 %v10730_v22 }
 0x5f8   :  { %2240 = vmatpush1.msra.mxu0 %v11056_v48  ;;  %5517 = vmatpush3.msra.mxu1 %v11057_v46 }
 0x5f9   :  { %2273 = vmatprep.mubr.f32.mxu0 %v10730_v22  ;;  %5518 = vmatprep.mubr.msk.f32.mxu1 %vm6421_vm0, %v10730_v22 }
 0x5fa   :  { %2359 = vmatprep.subr.mxu0 %v11058_v0  ;;  %5521 = vmatprep.subr.mxu1 %v10730_v22 }
 0x677   :  { %v8603_v54 = vpop.f32.mrf.mxu1  ;;  %v8605_v16 = vpop.f32.mrf.mxu0 }
 0x678   :  { %11059 = vst [vmem:[#allocation72_spill] sm:$0xff] %v8603_v54  ;;  %11060 = vst [vmem:[#allocation73_spill] sm:$0xff] %v8605_v16 }
 0x679   :  { %v5450_v63 = vpop.f32.mrf.mxu1  ;;  %v8607_v58 = vpop.f32.mrf.mxu0 }
 0x67a   :  { %11061 = vst [vmem:[#allocation86_spill] sm:$0xff] %v8607_v58 }
 0x698   :  { %v2114_v52 = vpop.f32.mrf.mxu0  ;;  %v2185_v48 = vpop.f32.mrf.mxu1 }
 0x699   :  { %v2115_v46 = vadd.f32 %v2114_v52, %v11062_v38  ;;  %v2186_v16 = vadd.f32 %v2185_v48, %v7368_v61  ;;  %v8721_v48 = vld [vmem:[%s10419_s3 + $0xc0] sm:$0xff] }
 0x69a   :  { %v5485_v53 = vpop.f32.mrf.mxu1  ;;  %v2116_v59 = vpop.f32.mrf.mxu0 }
 0x69b   :  { %v2189_v26 = vadd.f32 %v2115_v46, %v11063_v51  ;;  %v2117_v0 = vadd.f32 %v2116_v59, %v7356_v49  ;;  %v11065_v53 = vld [vmem:[#allocation85_spill] sm:$0xff]  ;;  %v8693_v46 = vld [vmem:[%s10419_s3 + $0xf0] sm:$0xff] }
 0x69d   :  { %v4575_v57 = vmul.f32 -1.442695, %v2189_v26  ;;  %v2190_v10 = vadd.f32 %v2117_v0, %v11064_v60  ;;  %v8735_v0 = vld [vmem:[%s10419_s3 + $0xa8] sm:$0xff] }
 0x69f   :  { %6048 = vpow2.f32 %v4575_v57  ;;  %v4576_v54 = vmul.f32 -1.442695, %v2190_v10 }
 0x6a1   :  { %6050 = vpow2.f32 %v4576_v54  ;;  %v8679_v54 = vld [vmem:[%s10419_s3 + $0x108] sm:$0xff] }
 0x6ac   :  { %v6049_v63 = vpop.eup %6048 }
 0x6ad   :  { %v2197_v4 = vadd.f32 1.0, %v6049_v63  ;;  %v8749_v63 = vld [vmem:[%s10419_s3 + $0x90] sm:$0xff] }
 0x6ae   :  { %v6051_v58 = vpop.eup %6050 }
 0x6af   :  { %6052 = vrcp.f32 %v2197_v4  ;;  %v2198_v51 = vadd.f32 1.0, %v6051_v58  ;;  %v8637_v4 = vld [vmem:[%s10419_s3 + $0x150] sm:$0xff]  ;;  %v8665_v58 = vld [vmem:[%s10419_s3 + $0x120] sm:$0xff] }
 0x6bc   :  { %v6053_v47 = vpop.eup %6052 }
 0x6bd   :  { %v2203_v52 = vmul.f32 %v6053_v47, %v2186_v16  ;;  %v8623_v47 = vld [vmem:[%s10419_s3 + $0x168] sm:$0xff]  ;;  %v8651_v16 = vld [vmem:[%s10419_s3 + $0x138] sm:$0xff] }
 0x6bf   :  { %v2204_v38 = vadd.f32 %v2203_v52, %v11065_v53  ;;  %v6273_v52 = vld [vmem:[%s10419_s3 + $0x170] sm:$0xff] }
 0x6c1   :  { %6054 = vtanh.f32 %v2204_v38  ;;  %v8707_v38 = vld [vmem:[%s10419_s3 + $0xd8] sm:$0xff] }
 0x6c2   :  { %6056 = vrcp.f32 %v2198_v51 }
 0x6ce   :  { %v6055_v57 = vpop.eup %6054 }
 0x6cf   :  { %v2206_v59 = vsub.f32 %v8463_v12, %v6055_v57  ;;  %v6057_v26 = vpop.eup %6056  ;;  %v8630_v12 = vld [vmem:[%s10419_s3 + $0x158] sm:$0xff] }
 0x6d1   :  { %v2207_v60 = vmul.f32 %v6057_v26, %v2206_v59 }
 0x6d3   :  { %v8616_v10 = vadd.f32 %v6055_v57, %v2207_v60 }
 0x6d5   :  { %2274 = vmatmul.mubr.f32.vlgmr.msra.gmra.mxu0 %v8616_v10  ;;  %5519 = vmatmul.mubr.f32.vlgmr.msra.gmra.mxu1 %v8616_v10 }
 0x6d6   :  { %2360 = vmatpush1.msra.mxu0 %v8623_v47  ;;  %5522 = vmatpush3.msra.mxu1 %v7785_v1  ;;  %v8644_v1 = vld [vmem:[%s10419_s3 + $0x140] sm:$0xff] }
 0x6d7   :  { %2361 = vmatprep.subr.mxu0 %v8630_v12  ;;  %5523 = vmatprep.subr.mxu1 %v10730_v22 }
 0x6d8   :  { %2362 = vmatpush1.msra.mxu0 %v8637_v4  ;;  %5524 = vmatpush3.msra.mxu1 %v7794_v55  ;;  %v8658_v55 = vld [vmem:[%s10419_s3 + $0x128] sm:$0xff] }
 0x6d9   :  { %2363 = vmatprep.subr.mxu0 %v8644_v1  ;;  %5525 = vmatprep.subr.mxu1 %v10730_v22 }
 0x6da   :  { %2364 = vmatpush1.msra.mxu0 %v8651_v16  ;;  %5526 = vmatpush3.msra.mxu1 %v7803_v2  ;;  %v8672_v2 = vld [vmem:[%s10419_s3 + $0x110] sm:$0xff] }
 0x6db   :  { %2365 = vmatprep.subr.mxu0 %v8658_v55  ;;  %5527 = vmatprep.subr.mxu1 %v10730_v22 }
 0x6dc   :  { %2366 = vmatpush1.msra.mxu0 %v8665_v58  ;;  %5528 = vmatpush3.msra.mxu1 %v7812_v6  ;;  %v8686_v6 = vld [vmem:[%s10419_s3 + $0xf8] sm:$0xff] }
 0x6dd   :  { %2367 = vmatprep.subr.mxu0 %v8672_v2  ;;  %5529 = vmatprep.subr.mxu1 %v10730_v22 }
 0x6de   :  { %2368 = vmatpush1.msra.mxu0 %v8679_v54  ;;  %5530 = vmatpush3.msra.mxu1 %v7821_v7  ;;  %v8700_v7 = vld [vmem:[%s10419_s3 + $0xe0] sm:$0xff] }
 0x6df   :  { %2369 = vmatprep.subr.mxu0 %v8686_v6  ;;  %5531 = vmatprep.subr.mxu1 %v10730_v22 }
 0x6e0   :  { %2370 = vmatpush1.msra.mxu0 %v8693_v46  ;;  %5532 = vmatpush3.msra.mxu1 %v7830_v8  ;;  %v8714_v8 = vld [vmem:[%s10419_s3 + $0xc8] sm:$0xff] }
 0x6e1   :  { %2371 = vmatprep.subr.mxu0 %v8700_v7  ;;  %5533 = vmatprep.subr.mxu1 %v10730_v22 }
 0x6e2   :  { %2372 = vmatpush1.msra.mxu0 %v8707_v38  ;;  %5534 = vmatpush3.msra.mxu1 %v7839_v9  ;;  %v8728_v9 = vld [vmem:[%s10419_s3 + $0xb0] sm:$0xff] }
 0x6e3   :  { %2373 = vmatprep.subr.mxu0 %v8714_v8  ;;  %5535 = vmatprep.subr.mxu1 %v10730_v22 }
 0x6e4   :  { %2374 = vmatpush1.msra.mxu0 %v8721_v48  ;;  %5536 = vmatpush3.msra.mxu1 %v7848_v42  ;;  %v8742_v42 = vld [vmem:[%s10419_s3 + $0x98] sm:$0xff] }
 0x6e5   :  { %2375 = vmatprep.subr.mxu0 %v8728_v9  ;;  %5537 = vmatprep.subr.mxu1 %v10730_v22 }
 0x6e6   :  { %2376 = vmatpush1.msra.mxu0 %v8735_v0  ;;  %5538 = vmatpush3.msra.mxu1 %v7857_v43  ;;  %v11066_v43 = vld [vmem:[#allocation30_spill] sm:$0xff] }
 0x6e7   :  { %2377 = vmatprep.subr.mxu0 %v8742_v42  ;;  %5539 = vmatprep.subr.mxu1 %v10730_v22 }
 0x6e8   :  { %2378 = vmatpush1.msra.mxu0 %v8749_v63  ;;  %5540 = vmatpush3.msra.mxu1 %v7866_v41  ;;  %v11067_v41 = vld [vmem:[#allocation31_spill] sm:$0xff] }
 0x6e9   :  { %2379 = vmatprep.subr.mxu0 %v7872_v50  ;;  %5541 = vmatprep.subr.mxu1 %v10730_v22  ;;  %v11068_v50 = vld [vmem:[#allocation32_spill] sm:$0xff] }
 0x6ea   :  { %2380 = vmatpush1.msra.mxu0 %v7879_v23  ;;  %5542 = vmatpush3.msra.mxu1 %v7885_v45  ;;  %v11069_v23 = vld [vmem:[#allocation33_spill] sm:$0xff]  ;;  %v11070_v45 = vld [vmem:[#allocation34_spill] sm:$0xff] }
 0x6eb   :  { %2381 = vmatprep.subr.mxu0 %v7891_v13  ;;  %5543 = vmatprep.subr.mxu1 %v10730_v22  ;;  %v11071_v13 = vld [vmem:[#allocation35_spill] sm:$0xff] }
 0x6ec   :  { %2382 = vmatpush1.msra.mxu0 %v7898_v14  ;;  %5544 = vmatpush3.msra.mxu1 %v7904_v15  ;;  %v11072_v14 = vld [vmem:[#allocation36_spill] sm:$0xff]  ;;  %v11073_v15 = vld [vmem:[#allocation37_spill] sm:$0xff] }
 0x6ed   :  { %2383 = vmatprep.subr.mxu0 %v7910_v17  ;;  %5545 = vmatprep.subr.mxu1 %v10730_v22  ;;  %v11074_v17 = vld [vmem:[#allocation38_spill] sm:$0xff] }
 0x6ee   :  { %2384 = vmatpush1.msra.mxu0 %v7917_v18  ;;  %5546 = vmatpush3.msra.mxu1 %v7923_v19  ;;  %v11075_v18 = vld [vmem:[#allocation39_spill] sm:$0xff]  ;;  %v11076_v19 = vld [vmem:[#allocation40_spill] sm:$0xff] }
 0x6ef   :  { %2385 = vmatprep.subr.mxu0 %v7929_v34  ;;  %5547 = vmatprep.subr.mxu1 %v10730_v22  ;;  %v11077_v34 = vld [vmem:[#allocation41_spill] sm:$0xff] }
 0x6f0   :  { %2386 = vmatpush1.msra.mxu0 %v7936_v35  ;;  %5548 = vmatpush3.msra.mxu1 %v7942_v36  ;;  %v11078_v35 = vld [vmem:[#allocation42_spill] sm:$0xff]  ;;  %v11079_v36 = vld [vmem:[#allocation43_spill] sm:$0xff] }
 0x6f1   :  { %2387 = vmatprep.subr.mxu0 %v7948_v37  ;;  %5549 = vmatprep.subr.mxu1 %v10730_v22  ;;  %v11080_v37 = vld [vmem:[#allocation44_spill] sm:$0xff] }
 0x6f2   :  { %2388 = vmatpush1.msra.mxu0 %v11005_v62  ;;  %5550 = vmatpush3.msra.mxu1 %v11006_v44  ;;  %v11081_v62 = vld [vmem:[#allocation45_spill] sm:$0xff]  ;;  %v11082_v44 = vld [vmem:[#allocation46_spill] sm:$0xff] }
 0x6f3   :  { %2389 = vmatprep.subr.mxu0 %v11007_v3  ;;  %5551 = vmatprep.subr.mxu1 %v10730_v22  ;;  %v11083_v3 = vld [vmem:[#allocation47_spill] sm:$0xff] }
 0x6f4   :  { %2390 = vmatpush1.msra.mxu0 %v11008_v21  ;;  %2423 = vmatprep.mubr.f32.mxu0 %v10730_v22  ;;  %v11084_v21 = vld [vmem:[#allocation48_spill] sm:$0xff] }
 0x6f5   :  { %5552 = vmatpush3.msra.mxu1 %v11009_v24  ;;  %5553 = vmatprep.mubr.msk.f32.mxu1 %vm6421_vm0, %v10730_v22  ;;  %v11085_v24 = vld [vmem:[#allocation49_spill] sm:$0xff] }
 0x6f6   :  { %2424 = vmatmul.mubr.f32.vlgmr.msra.gmra.mxu0 %v8616_v10  ;;  %5554 = vmatmul.mubr.f32.vlgmr.msra.gmra.mxu1 %v8616_v10 }
 0x6f7   :  { %2520 = vmatprep.subr.mxu0 %v11010_v27  ;;  %5556 = vmatprep.subr.mxu1 %v10730_v22  ;;  %v11086_v27 = vld [vmem:[#allocation50_spill] sm:$0xff] }
 0x6f8   :  { %2521 = vmatpush1.msra.mxu0 %v11011_v39  ;;  %5557 = vmatpush3.msra.mxu1 %v11012_v28  ;;  %v11087_v39 = vld [vmem:[#allocation51_spill] sm:$0xff]  ;;  %v11088_v28 = vld [vmem:[#allocation52_spill] sm:$0xff] }
 0x6f9   :  { %2522 = vmatprep.subr.mxu0 %v11013_v56  ;;  %5558 = vmatprep.subr.mxu1 %v10730_v22  ;;  %v11089_v56 = vld [vmem:[#allocation53_spill] sm:$0xff] }
 0x6fa   :  { %2523 = vmatpush1.msra.mxu0 %v11014_v29  ;;  %5559 = vmatpush3.msra.mxu1 %v11015_v5  ;;  %v11090_v29 = vld [vmem:[#allocation54_spill] sm:$0xff]  ;;  %v11091_v5 = vld [vmem:[#allocation55_spill] sm:$0xff] }
 0x6fb   :  { %2524 = vmatprep.subr.mxu0 %v11016_v30  ;;  %5560 = vmatprep.subr.mxu1 %v10730_v22  ;;  %v11092_v30 = vld [vmem:[#allocation56_spill] sm:$0xff] }
 0x6fc   :  { %2525 = vmatpush1.msra.mxu0 %v11017_v25  ;;  %5561 = vmatpush3.msra.mxu1 %v11018_v31  ;;  %v11093_v25 = vld [vmem:[#allocation57_spill] sm:$0xff]  ;;  %v11094_v31 = vld [vmem:[#allocation58_spill] sm:$0xff] }
 0x6fd   :  { %2526 = vmatprep.subr.mxu0 %v11019_v11  ;;  %5562 = vmatprep.subr.mxu1 %v10730_v22  ;;  %v11095_v11 = vld [vmem:[#allocation59_spill] sm:$0xff] }
 0x6fe   :  { %2527 = vmatpush1.msra.mxu0 %v11020_v32  ;;  %5563 = vmatpush3.msra.mxu1 %v11021_v20  ;;  %v11096_v32 = vld [vmem:[#allocation60_spill] sm:$0xff]  ;;  %v11097_v20 = vld [vmem:[#allocation61_spill] sm:$0xff] }
 0x6ff   :  { %2528 = vmatprep.subr.mxu0 %v11022_v33  ;;  %5564 = vmatprep.subr.mxu1 %v10730_v22  ;;  %v11098_v33 = vld [vmem:[#allocation62_spill] sm:$0xff] }
 0x700   :  { %2529 = vmatpush1.msra.mxu0 %v11023_v40  ;;  %5565 = vmatpush3.msra.mxu1 %v11066_v43  ;;  %v11099_v40 = vld [vmem:[#allocation63_spill] sm:$0xff]  ;;  %v11103_v43 = vld [vmem:[#allocation81_spill] sm:$0xff] }
 0x701   :  { %2530 = vmatprep.subr.mxu0 %v11067_v41  ;;  %5566 = vmatprep.subr.mxu1 %v10730_v22 }
 0x702   :  { %2531 = vmatpush1.msra.mxu0 %v11068_v50  ;;  %5567 = vmatpush3.msra.mxu1 %v11069_v23  ;;  %v11104_v23 = vld [vmem:[#allocation77_spill] sm:$0xff] }
 0x703   :  { %2532 = vmatprep.subr.mxu0 %v11070_v45  ;;  %5568 = vmatprep.subr.mxu1 %v10730_v22 }
 0x704   :  { %2533 = vmatpush1.msra.mxu0 %v11071_v13  ;;  %5569 = vmatpush3.msra.mxu1 %v11072_v14 }
 0x705   :  { %2534 = vmatprep.subr.mxu0 %v11073_v15  ;;  %5570 = vmatprep.subr.mxu1 %v10730_v22 }
 0x706   :  { %2535 = vmatpush1.msra.mxu0 %v11074_v17  ;;  %5571 = vmatpush3.msra.mxu1 %v11075_v18  ;;  %v11105_v17 = vld [vmem:[#allocation78_spill] sm:$0xff] }
 0x707   :  { %2536 = vmatprep.subr.mxu0 %v11076_v19  ;;  %5572 = vmatprep.subr.mxu1 %v10730_v22 }
 0x708   :  { %2537 = vmatpush1.msra.mxu0 %v11077_v34  ;;  %5573 = vmatpush3.msra.mxu1 %v11078_v35 }
 0x709   :  { %2538 = vmatprep.subr.mxu0 %v11079_v36  ;;  %5574 = vmatprep.subr.mxu1 %v10730_v22 }
 0x70a   :  { %2539 = vmatpush1.msra.mxu0 %v11080_v37  ;;  %5575 = vmatpush3.msra.mxu1 %v11081_v62 }
 0x70b   :  { %2540 = vmatprep.subr.mxu0 %v11082_v44  ;;  %5576 = vmatprep.subr.mxu1 %v10730_v22 }
 0x70c   :  { %2541 = vmatpush1.msra.mxu0 %v11083_v3  ;;  %5577 = vmatpush3.msra.mxu1 %v11084_v21  ;;  %v11106_v3 = vld [vmem:[#allocation88_spill] sm:$0xff] }
 0x70d   :  { %2542 = vmatprep.subr.mxu0 %v11085_v24  ;;  %5578 = vmatprep.subr.mxu1 %v10730_v22 }
 0x70e   :  { %2543 = vmatpush1.msra.mxu0 %v11086_v27  ;;  %5579 = vmatpush3.msra.mxu1 %v11087_v39 }
 0x70f   :  { %2544 = vmatprep.subr.mxu0 %v11088_v28  ;;  %5580 = vmatprep.subr.mxu1 %v10730_v22 }
 0x710   :  { %2545 = vmatpush1.msra.mxu0 %v11089_v56  ;;  %5581 = vmatpush3.msra.mxu1 %v11090_v29 }
 0x711   :  { %2546 = vmatprep.subr.mxu0 %v11091_v5  ;;  %5582 = vmatprep.subr.mxu1 %v10730_v22  ;;  %v6274_v5 = vld [vmem:[%s10419_s3 + $0x178] sm:$0xff] }
 0x712   :  { %2547 = vmatpush1.msra.mxu0 %v11092_v30  ;;  %5583 = vmatpush3.msra.mxu1 %v11093_v25  ;;  %v6295_v30 = vld [vmem:[%s10419_s3 + $0x40] sm:$0xff] }
 0x713   :  { %2548 = vmatprep.subr.mxu0 %v11094_v31  ;;  %5584 = vmatprep.subr.mxu1 %v10730_v22  ;;  %v6296_v25 = vld [vmem:[%s10419_s3 + $0x20] sm:$0xff]  ;;  %v6297_v31 = vld [vmem:[%s10419_s3 + $0x18] sm:$0xff] }
 0x714   :  { %2549 = vmatpush1.msra.mxu0 %v11095_v11  ;;  %5585 = vmatpush3.msra.mxu1 %v11096_v32  ;;  %v6298_v11 = vld [vmem:[%s10419_s3 + $0x28] sm:$0xff] }
 0x715   :  { %2550 = vmatprep.subr.mxu0 %v11097_v20  ;;  %5586 = vmatprep.subr.mxu1 %v10730_v22  ;;  %v6299_v32 = vld [vmem:[%s10419_s3 + $0x8] sm:$0xff]  ;;  %v6300_v20 = vld [vmem:[%s10419_s3] sm:$0xff] }
 0x716   :  { %2551 = vmatpush1.msra.mxu0 %v11098_v33  ;;  %5587 = vmatpush3.msra.mxu1 %v11099_v40  ;;  %v6301_v33 = vld [vmem:[%s10419_s3 + $0x10] sm:$0xff] }
 0x717   :  { %2584 = vmatprep.mubr.f32.mxu0 %v10730_v22  ;;  %5588 = vmatprep.mubr.msk.f32.mxu1 %vm6421_vm0, %v10730_v22  ;;  %v6302_v40 = vld [vmem:[%s10421_s5 + $0x170] sm:$0xff] }
 0x718   :  { %2670 = vmatprep.subr.mxu0 %v6273_v52  ;;  %5591 = vmatprep.subr.mxu1 %v10730_v22  ;;  %v6303_v52 = vld [vmem:[%s10421_s5 + $0x168] sm:$0xff] }
 0x795   :  { %v8853_v53 = vpop.f32.mrf.mxu1  ;;  %v8855_v57 = vpop.f32.mrf.mxu0 }
 0x796   :  { %11100 = vst [vmem:[#allocation15_spill] sm:$0xff] %v8853_v53  ;;  %11101 = vst [vmem:[#allocation16_spill] sm:$0xff] %v8855_v57  ;;  %v11129_v57 = vld [vmem:[#allocation65_spill] sm:$0xff] }
 0x797   :  { %v5520_v51 = vpop.f32.mrf.mxu1  ;;  %v8857_v59 = vpop.f32.mrf.mxu0 }
 0x798   :  { %11102 = vst [vmem:[#allocation17_spill] sm:$0xff] %v8857_v59  ;;  %v6304_v51 = vld [vmem:[%s10421_s5 + $0x178] sm:$0xff] }
 0x7b6   :  { %v2425_v26 = vpop.f32.mrf.mxu0  ;;  %v2496_v60 = vpop.f32.mrf.mxu1 }
 0x7b7   :  { %v2426_v41 = vadd.f32 %v2425_v26, %v11103_v43  ;;  %v2497_v37 = vadd.f32 %v2496_v60, %v7368_v61  ;;  %v6305_v26 = vld [vmem:[%s10421_s5 + $0x158] sm:$0xff]  ;;  %v6306_v60 = vld [vmem:[%s10421_s5 + $0x150] sm:$0xff] }
 0x7b8   :  { %v5555_v50 = vpop.f32.mrf.mxu1  ;;  %v2427_v14 = vpop.f32.mrf.mxu0 }
 0x7b9   :  { %v2500_v45 = vadd.f32 %v2426_v41, %v11104_v23  ;;  %v2428_v15 = vadd.f32 %v2427_v14, %v7356_v49  ;;  %v6307_v41 = vld [vmem:[%s10421_s5 + $0x160] sm:$0xff]  ;;  %v6309_v23 = vld [vmem:[%s10421_s5 + $0x138] sm:$0xff] }
 0x7ba   :  { %v6308_v50 = vld [vmem:[%s10421_s5 + $0x140] sm:$0xff] }
 0x7bb   :  { %v4577_v13 = vmul.f32 -1.442695, %v2500_v45  ;;  %v2501_v18 = vadd.f32 %v2428_v15, %v11105_v17  ;;  %v6310_v45 = vld [vmem:[%s10421_s5 + $0x148] sm:$0xff]  ;;  %v6312_v14 = vld [vmem:[%s10421_s5 + $0x120] sm:$0xff]  ;;  %v6313_v15 = vld [vmem:[%s10421_s5 + $0x130] sm:$0xff] }
 0x7bc   :  { %v6314_v17 = vld [vmem:[%s10421_s5 + $0x110] sm:$0xff] }
 0x7bd   :  { %6058 = vpow2.f32 %v4577_v13  ;;  %v4578_v19 = vmul.f32 -1.442695, %v2501_v18  ;;  %v6311_v13 = vld [vmem:[%s10421_s5 + $0x128] sm:$0xff] }
 0x7be   :  { %v6315_v18 = vld [vmem:[%s10421_s5 + $0x108] sm:$0xff] }
 0x7bf   :  { %6060 = vpow2.f32 %v4578_v19  ;;  %v6316_v19 = vld [vmem:[%s10421_s5 + $0x118] sm:$0xff] }
 0x7ca   :  { %v6059_v34 = vpop.eup %6058 }
 0x7cb   :  { %v2508_v35 = vadd.f32 1.0, %v6059_v34  ;;  %v6317_v34 = vld [vmem:[%s10421_s5 + $0xf8] sm:$0xff] }
 0x7cc   :  { %v6061_v36 = vpop.eup %6060 }
 0x7cd   :  { %6062 = vrcp.f32 %v2508_v35  ;;  %v2509_v24 = vadd.f32 1.0, %v6061_v36  ;;  %v6318_v35 = vld [vmem:[%s10421_s5 + $0xf0] sm:$0xff]  ;;  %v6319_v36 = vld [vmem:[%s10421_s5 + $0x100] sm:$0xff] }
 0x7da   :  { %v6063_v62 = vpop.eup %6062 }
 0x7db   :  { %v2514_v44 = vmul.f32 %v6063_v62, %v2497_v37  ;;  %v6320_v37 = vld [vmem:[%s10421_s5 + $0xe0] sm:$0xff]  ;;  %v6321_v62 = vld [vmem:[%s10421_s5 + $0xd8] sm:$0xff] }
 0x7dd   :  { %v2515_v21 = vadd.f32 %v2514_v44, %v11106_v3  ;;  %v6322_v44 = vld [vmem:[%s10421_s5 + $0xe8] sm:$0xff] }
 0x7de   :  { %v6323_v3 = vld [vmem:[%s10421_s5 + $0xc8] sm:$0xff] }
 0x7df   :  { %6064 = vtanh.f32 %v2515_v21  ;;  %v6324_v21 = vld [vmem:[%s10421_s5 + $0xc0] sm:$0xff] }
 0x7e0   :  { %6066 = vrcp.f32 %v2509_v24  ;;  %v6325_v24 = vld [vmem:[%s10421_s5 + $0xd0] sm:$0xff] }
 0x7ec   :  { %v6065_v27 = vpop.eup %6064 }
 0x7ed   :  { %v2517_v39 = vsub.f32 %v8616_v10, %v6065_v27  ;;  %v6067_v28 = vpop.eup %6066  ;;  %v6275_v10 = vld [vmem:[%s10419_s3 + $0x160] sm:$0xff] }
 0x7ef   :  { %v2518_v56 = vmul.f32 %v6067_v28, %v2517_v39  ;;  %v6327_v39 = vld [vmem:[%s10421_s5 + $0xa8] sm:$0xff]  ;;  %v6328_v28 = vld [vmem:[%s10421_s5 + $0xb8] sm:$0xff] }
 0x7f1   :  { %v8866_v29 = vadd.f32 %v6065_v27, %v2518_v56  ;;  %v6326_v27 = vld [vmem:[%s10421_s5 + $0xb0] sm:$0xff]  ;;  %v6329_v56 = vld [vmem:[%s10421_s5 + $0x98] sm:$0xff] }
 0x7f3   :  { %2585 = vmatmul.mubr.f32.vlgmr.msra.gmra.mxu0 %v8866_v29  ;;  %5589 = vmatmul.mubr.f32.vlgmr.msra.gmra.mxu1 %v8866_v29 }
 0x7f4   :  { %2671 = vmatpush1.msra.mxu0 %v8623_v47  ;;  %5592 = vmatpush3.msra.mxu1 %v6274_v5  ;;  %v6276_v47 = vld [vmem:[%s10419_s3 + $0x148] sm:$0xff]  ;;  %v6330_v5 = vld [vmem:[%s10421_s5 + $0x90] sm:$0xff] }
 0x7f5   :  { %2672 = vmatprep.subr.mxu0 %v8630_v12  ;;  %5593 = vmatprep.subr.mxu1 %v10730_v22  ;;  %v6277_v12 = vld [vmem:[%s10419_s3 + $0x130] sm:$0xff] }
 0x7f6   :  { %2673 = vmatpush1.msra.mxu0 %v8637_v4  ;;  %5594 = vmatpush3.msra.mxu1 %v6275_v10  ;;  %v6278_v4 = vld [vmem:[%s10419_s3 + $0x118] sm:$0xff]  ;;  %v6331_v10 = vld [vmem:[%s10421_s5 + $0xa0] sm:$0xff] }
 0x7f7   :  { %2674 = vmatprep.subr.mxu0 %v8644_v1  ;;  %5595 = vmatprep.subr.mxu1 %v10730_v22  ;;  %v6279_v1 = vld [vmem:[%s10419_s3 + $0x100] sm:$0xff] }
 0x7f8   :  { %2675 = vmatpush1.msra.mxu0 %v8651_v16  ;;  %5596 = vmatpush3.msra.mxu1 %v6276_v47  ;;  %v6280_v16 = vld [vmem:[%s10419_s3 + $0xe8] sm:$0xff]  ;;  %v6332_v47 = vld [vmem:[%s10421_s5 + $0x80] sm:$0xff] }
 0x7f9   :  { %2676 = vmatprep.subr.mxu0 %v8658_v55  ;;  %5597 = vmatprep.subr.mxu1 %v10730_v22  ;;  %v6281_v55 = vld [vmem:[%s10419_s3 + $0xd0] sm:$0xff] }
 0x7fa   :  { %2677 = vmatpush1.msra.mxu0 %v8665_v58  ;;  %5598 = vmatpush3.msra.mxu1 %v6277_v12  ;;  %v6282_v58 = vld [vmem:[%s10419_s3 + $0xb8] sm:$0xff] }
 0x7fb   :  { %2678 = vmatprep.subr.mxu0 %v8672_v2  ;;  %5599 = vmatprep.subr.mxu1 %v10730_v22  ;;  %v6283_v2 = vld [vmem:[%s10419_s3 + $0xa0] sm:$0xff]  ;;  %v6333_v12 = vld [vmem:[%s10421_s5 + $0x78] sm:$0xff] }
 0x7fc   :  { %2679 = vmatpush1.msra.mxu0 %v8679_v54  ;;  %5600 = vmatpush3.msra.mxu1 %v6278_v4  ;;  %v6284_v54 = vld [vmem:[%s10419_s3 + $0x80] sm:$0xff]  ;;  %v6334_v4 = vld [vmem:[%s10421_s5 + $0x88] sm:$0xff] }
 0x7fd   :  { %2680 = vmatprep.subr.mxu0 %v8686_v6  ;;  %5601 = vmatprep.subr.mxu1 %v10730_v22  ;;  %v6285_v6 = vld [vmem:[%s10419_s3 + $0x78] sm:$0xff] }
 0x7fe   :  { %2681 = vmatpush1.msra.mxu0 %v8693_v46  ;;  %5602 = vmatpush3.msra.mxu1 %v6279_v1  ;;  %v6286_v46 = vld [vmem:[%s10419_s3 + $0x88] sm:$0xff] }
 0x7ff   :  { %2682 = vmatprep.subr.mxu0 %v8700_v7  ;;  %5603 = vmatprep.subr.mxu1 %v10730_v22  ;;  %v6287_v7 = vld [vmem:[%s10419_s3 + $0x68] sm:$0xff] }
 0x800   :  { %2683 = vmatpush1.msra.mxu0 %v8707_v38  ;;  %5604 = vmatpush3.msra.mxu1 %v6280_v16  ;;  %v6288_v38 = vld [vmem:[%s10419_s3 + $0x60] sm:$0xff]  ;;  %v6335_v1 = vld [vmem:[%s10421_s5 + $0x68] sm:$0xff] }
 0x801   :  { %2684 = vmatprep.subr.mxu0 %v8714_v8  ;;  %5605 = vmatprep.subr.mxu1 %v10730_v22  ;;  %v6289_v8 = vld [vmem:[%s10419_s3 + $0x70] sm:$0xff]  ;;  %v6336_v16 = vld [vmem:[%s10421_s5 + $0x60] sm:$0xff] }
 0x802   :  { %2685 = vmatpush1.msra.mxu0 %v8721_v48  ;;  %5606 = vmatpush3.msra.mxu1 %v6281_v55  ;;  %v6290_v48 = vld [vmem:[%s10419_s3 + $0x50] sm:$0xff] }
 0x803   :  { %2686 = vmatprep.subr.mxu0 %v8728_v9  ;;  %5607 = vmatprep.subr.mxu1 %v10730_v22  ;;  %v6291_v9 = vld [vmem:[%s10419_s3 + $0x48] sm:$0xff]  ;;  %v6337_v55 = vld [vmem:[%s10421_s5 + $0x70] sm:$0xff] }
 0x804   :  { %2687 = vmatpush1.msra.mxu0 %v8735_v0  ;;  %5608 = vmatpush3.msra.mxu1 %v6282_v58  ;;  %v6292_v0 = vld [vmem:[%s10419_s3 + $0x58] sm:$0xff]  ;;  %v6338_v58 = vld [vmem:[%s10421_s5 + $0x50] sm:$0xff] }
 0x805   :  { %2688 = vmatprep.subr.mxu0 %v8742_v42  ;;  %5609 = vmatprep.subr.mxu1 %v10730_v22  ;;  %v6293_v42 = vld [vmem:[%s10419_s3 + $0x38] sm:$0xff] }
 0x806   :  { %2689 = vmatpush1.msra.mxu0 %v8749_v63  ;;  %5610 = vmatpush3.msra.mxu1 %v6283_v2  ;;  %v6294_v63 = vld [vmem:[%s10419_s3 + $0x30] sm:$0xff]  ;;  %v6339_v2 = vld [vmem:[%s10421_s5 + $0x48] sm:$0xff] }
 0x807   :  { %2690 = vmatprep.subr.mxu0 %v6284_v54  ;;  %5611 = vmatprep.subr.mxu1 %v10730_v22  ;;  %v6340_v54 = vld [vmem:[%s10421_s5 + $0x58] sm:$0xff] }
 0x808   :  { %2691 = vmatpush1.msra.mxu0 %v6285_v6  ;;  %5612 = vmatpush3.msra.mxu1 %v6286_v46  ;;  %v6341_v6 = vld [vmem:[%s10421_s5 + $0x38] sm:$0xff]  ;;  %v6342_v46 = vld [vmem:[%s10421_s5 + $0x30] sm:$0xff] }
 0x809   :  { %2692 = vmatprep.subr.mxu0 %v6287_v7  ;;  %5613 = vmatprep.subr.mxu1 %v10730_v22  ;;  %v6343_v7 = vld [vmem:[%s10421_s5 + $0x40] sm:$0xff] }
 0x80a   :  { %2693 = vmatpush1.msra.mxu0 %v6288_v38  ;;  %5614 = vmatpush3.msra.mxu1 %v6289_v8  ;;  %v6344_v38 = vld [vmem:[%s10421_s5 + $0x20] sm:$0xff]  ;;  %v6345_v8 = vld [vmem:[%s10421_s5 + $0x18] sm:$0xff] }
 0x80b   :  { %2694 = vmatprep.subr.mxu0 %v6290_v48  ;;  %5615 = vmatprep.subr.mxu1 %v10730_v22  ;;  %v6346_v48 = vld [vmem:[%s10421_s5 + $0x28] sm:$0xff] }
 0x80c   :  { %2695 = vmatpush1.msra.mxu0 %v6291_v9  ;;  %5616 = vmatpush3.msra.mxu1 %v6292_v0  ;;  %v6347_v9 = vld [vmem:[%s10421_s5 + $0x8] sm:$0xff]  ;;  %v6348_v0 = vld [vmem:[%s10421_s5] sm:$0xff] }
 0x80d   :  { %2696 = vmatprep.subr.mxu0 %v6293_v42  ;;  %5617 = vmatprep.subr.mxu1 %v10730_v22  ;;  %v6349_v42 = vld [vmem:[%s10421_s5 + $0x10] sm:$0xff] }
 0x80e   :  { %2697 = vmatpush1.msra.mxu0 %v6294_v63  ;;  %5618 = vmatpush3.msra.mxu1 %v6295_v30  ;;  %v9160_v63 = vld [vmem:[%s10423_s7 + $0x170] sm:$0xff] }
 0x80f   :  { %2698 = vmatprep.subr.mxu0 %v6296_v25  ;;  %5619 = vmatprep.subr.mxu1 %v10730_v22  ;;  %11107 = vst [vmem:[#allocation18_spill] sm:$0xff] %v9160_v63 }
 0x810   :  { %2699 = vmatpush1.msra.mxu0 %v6297_v31  ;;  %5620 = vmatpush3.msra.mxu1 %v6298_v11 }
 0x811   :  { %2700 = vmatprep.subr.mxu0 %v6299_v32  ;;  %5621 = vmatprep.subr.mxu1 %v10730_v22 }
 0x812   :  { %2701 = vmatpush1.msra.mxu0 %v6300_v20  ;;  %2734 = vmatprep.mubr.f32.mxu0 %v10730_v22 }
 0x813   :  { %5622 = vmatpush3.msra.mxu1 %v6301_v33  ;;  %5623 = vmatprep.mubr.msk.f32.mxu1 %vm6421_vm0, %v10730_v22 }
 0x814   :  { %2735 = vmatmul.mubr.f32.vlgmr.msra.gmra.mxu0 %v8866_v29  ;;  %5624 = vmatmul.mubr.f32.vlgmr.msra.gmra.mxu1 %v8866_v29 }
 0x815   :  { %2831 = vmatprep.subr.mxu0 %v6302_v40  ;;  %5626 = vmatprep.subr.mxu1 %v10730_v22 }
 0x816   :  { %2832 = vmatpush1.msra.mxu0 %v6303_v52  ;;  %5627 = vmatpush3.msra.mxu1 %v6304_v51  ;;  %v11111_v52 = vld [vmem:[#allocation80_spill] sm:$0xff] }
 0x817   :  { %2833 = vmatprep.subr.mxu0 %v6305_v26  ;;  %5628 = vmatprep.subr.mxu1 %v10730_v22 }
 0x818   :  { %2834 = vmatpush1.msra.mxu0 %v6306_v60  ;;  %5629 = vmatpush3.msra.mxu1 %v6307_v41 }
 0x819   :  { %2835 = vmatprep.subr.mxu0 %v6308_v50  ;;  %5630 = vmatprep.subr.mxu1 %v10730_v22  ;;  %v11112_v50 = vld [vmem:[#allocation82_spill] sm:$0xff] }
 0x81a   :  { %2836 = vmatpush1.msra.mxu0 %v6309_v23  ;;  %5631 = vmatpush3.msra.mxu1 %v6310_v45 }
 0x81b   :  { %2837 = vmatprep.subr.mxu0 %v6311_v13  ;;  %5632 = vmatprep.subr.mxu1 %v10730_v22 }
 0x81c   :  { %2838 = vmatpush1.msra.mxu0 %v6312_v14  ;;  %5633 = vmatpush3.msra.mxu1 %v6313_v15 }
 0x81d   :  { %2839 = vmatprep.subr.mxu0 %v6314_v17  ;;  %5634 = vmatprep.subr.mxu1 %v10730_v22 }
 0x81e   :  { %2840 = vmatpush1.msra.mxu0 %v6315_v18  ;;  %5635 = vmatpush3.msra.mxu1 %v6316_v19  ;;  %v11113_v19 = vld [vmem:[#allocation87_spill] sm:$0xff] }
 0x81f   :  { %2841 = vmatprep.subr.mxu0 %v6317_v34  ;;  %5636 = vmatprep.subr.mxu1 %v10730_v22 }
 0x820   :  { %2842 = vmatpush1.msra.mxu0 %v6318_v35  ;;  %5637 = vmatpush3.msra.mxu1 %v6319_v36 }
 0x821   :  { %2843 = vmatprep.subr.mxu0 %v6320_v37  ;;  %5638 = vmatprep.subr.mxu1 %v10730_v22 }
 0x822   :  { %2844 = vmatpush1.msra.mxu0 %v6321_v62  ;;  %5639 = vmatpush3.msra.mxu1 %v6322_v44 }
 0x823   :  { %2845 = vmatprep.subr.mxu0 %v6323_v3  ;;  %5640 = vmatprep.subr.mxu1 %v10730_v22  ;;  %v9179_v3 = vld [vmem:[%s10423_s7 + $0x168] sm:$0xff] }
 0x824   :  { %2846 = vmatpush1.msra.mxu0 %v6324_v21  ;;  %5641 = vmatpush3.msra.mxu1 %v6325_v24  ;;  %v9189_v21 = vld [vmem:[%s10423_s7 + $0x178] sm:$0xff]  ;;  %v9200_v24 = vld [vmem:[%s10423_s7 + $0x140] sm:$0xff] }
 0x825   :  { %2847 = vmatprep.subr.mxu0 %v6326_v27  ;;  %5642 = vmatprep.subr.mxu1 %v10730_v22  ;;  %v9206_v27 = vld [vmem:[%s10423_s7 + $0x160] sm:$0xff] }
 0x826   :  { %2848 = vmatpush1.msra.mxu0 %v6327_v39  ;;  %5643 = vmatpush3.msra.mxu1 %v6328_v28  ;;  %v9212_v39 = vld [vmem:[%s10423_s7 + $0x138] sm:$0xff]  ;;  %v9219_v28 = vld [vmem:[%s10423_s7 + $0x128] sm:$0xff] }
 0x827   :  { %2849 = vmatprep.subr.mxu0 %v6329_v56  ;;  %5644 = vmatprep.subr.mxu1 %v10730_v22  ;;  %v9225_v56 = vld [vmem:[%s10423_s7 + $0x148] sm:$0xff] }
 0x828   :  { %2850 = vmatpush1.msra.mxu0 %v6330_v5  ;;  %5645 = vmatpush3.msra.mxu1 %v6331_v10  ;;  %v9231_v5 = vld [vmem:[%s10423_s7 + $0x120] sm:$0xff]  ;;  %v9238_v10 = vld [vmem:[%s10423_s7 + $0x110] sm:$0xff] }
 0x829   :  { %2851 = vmatprep.subr.mxu0 %v6332_v47  ;;  %5646 = vmatprep.subr.mxu1 %v10730_v22  ;;  %v9244_v47 = vld [vmem:[%s10423_s7 + $0x130] sm:$0xff] }
 0x82a   :  { %2852 = vmatpush1.msra.mxu0 %v6333_v12  ;;  %5647 = vmatpush3.msra.mxu1 %v6334_v4  ;;  %v9250_v12 = vld [vmem:[%s10423_s7 + $0x108] sm:$0xff]  ;;  %v9257_v4 = vld [vmem:[%s10423_s7 + $0xf8] sm:$0xff] }
 0x82b   :  { %2853 = vmatprep.subr.mxu0 %v6335_v1  ;;  %5648 = vmatprep.subr.mxu1 %v10730_v22  ;;  %v9263_v1 = vld [vmem:[%s10423_s7 + $0x118] sm:$0xff] }
 0x82c   :  { %2854 = vmatpush1.msra.mxu0 %v6336_v16  ;;  %5649 = vmatpush3.msra.mxu1 %v6337_v55  ;;  %v9269_v16 = vld [vmem:[%s10423_s7 + $0xf0] sm:$0xff]  ;;  %v9276_v55 = vld [vmem:[%s10423_s7 + $0xe0] sm:$0xff] }
 0x82d   :  { %2855 = vmatprep.subr.mxu0 %v6338_v58  ;;  %5650 = vmatprep.subr.mxu1 %v10730_v22  ;;  %v9282_v58 = vld [vmem:[%s10423_s7 + $0x100] sm:$0xff] }
 0x82e   :  { %2856 = vmatpush1.msra.mxu0 %v6339_v2  ;;  %5651 = vmatpush3.msra.mxu1 %v6340_v54  ;;  %v9288_v2 = vld [vmem:[%s10423_s7 + $0xd8] sm:$0xff]  ;;  %v9295_v54 = vld [vmem:[%s10423_s7 + $0xc8] sm:$0xff] }
 0x82f   :  { %2857 = vmatprep.subr.mxu0 %v6341_v6  ;;  %5652 = vmatprep.subr.mxu1 %v10730_v22  ;;  %v9301_v6 = vld [vmem:[%s10423_s7 + $0xe8] sm:$0xff] }
 0x830   :  { %2858 = vmatpush1.msra.mxu0 %v6342_v46  ;;  %5653 = vmatpush3.msra.mxu1 %v6343_v7  ;;  %v9307_v46 = vld [vmem:[%s10423_s7 + $0xc0] sm:$0xff]  ;;  %v9314_v7 = vld [vmem:[%s10423_s7 + $0xb0] sm:$0xff] }
 0x831   :  { %2859 = vmatprep.subr.mxu0 %v6344_v38  ;;  %5654 = vmatprep.subr.mxu1 %v10730_v22  ;;  %v9320_v38 = vld [vmem:[%s10423_s7 + $0xd0] sm:$0xff] }
 0x832   :  { %2860 = vmatpush1.msra.mxu0 %v6345_v8  ;;  %5655 = vmatpush3.msra.mxu1 %v6346_v48  ;;  %v9326_v8 = vld [vmem:[%s10423_s7 + $0xa8] sm:$0xff]  ;;  %v9333_v48 = vld [vmem:[%s10423_s7 + $0x98] sm:$0xff] }
 0x833   :  { %2861 = vmatprep.subr.mxu0 %v6347_v9  ;;  %5656 = vmatprep.subr.mxu1 %v10730_v22  ;;  %v9339_v9 = vld [vmem:[%s10423_s7 + $0xb8] sm:$0xff] }
 0x834   :  { %2862 = vmatpush1.msra.mxu0 %v6348_v0  ;;  %2895 = vmatprep.mubr.f32.mxu0 %v10730_v22  ;;  %v9345_v0 = vld [vmem:[%s10423_s7 + $0x90] sm:$0xff] }
 0x835   :  { %5657 = vmatpush3.msra.mxu1 %v6349_v42  ;;  %5658 = vmatprep.mubr.msk.f32.mxu1 %vm6421_vm0, %v10730_v22  ;;  %v9352_v42 = vld [vmem:[%s10423_s7 + $0x80] sm:$0xff] }
 0x836   :  { %5661 = vmatprep.subr.mxu1 %v10730_v22  ;;  %3043 = vmatprep.subr.mxu0 %v9160_v63 }
 0x8b3   :  { %v9163_v30 = vpop.f32.mrf.mxu1  ;;  %v9165_v31 = vpop.f32.mrf.mxu0 }
 0x8b4   :  { %11108 = vst [vmem:[#allocation19_spill] sm:$0xff] %v9163_v30  ;;  %11109 = vst [vmem:[#allocation20_spill] sm:$0xff] %v9165_v31 }
 0x8b5   :  { %v5590_v25 = vpop.f32.mrf.mxu1  ;;  %v9167_v11 = vpop.f32.mrf.mxu0 }
 0x8b6   :  { %11110 = vst [vmem:[#allocation21_spill] sm:$0xff] %v9167_v11  ;;  %v9358_v25 = vld [vmem:[%s10423_s7 + $0xa0] sm:$0xff] }
 0x8d4   :  { %v2736_v32 = vpop.f32.mrf.mxu0  ;;  %v2807_v20 = vpop.f32.mrf.mxu1 }
 0x8d5   :  { %v2737_v33 = vadd.f32 %v2736_v32, %v11103_v43  ;;  %v2808_v17 = vadd.f32 %v2807_v20, %v7368_v61  ;;  %v9184_v61 = vld [vmem:[%s10423_s7 + $0x158] sm:$0xff]  ;;  %v9371_v20 = vld [vmem:[%s10423_s7 + $0x68] sm:$0xff] }
 0x8d6   :  { %v5625_v40 = vpop.f32.mrf.mxu1  ;;  %v2738_v60 = vpop.f32.mrf.mxu0  ;;  %v9364_v32 = vld [vmem:[%s10423_s7 + $0x78] sm:$0xff] }
 0x8d7   :  { %v2811_v51 = vadd.f32 %v2737_v33, %v11111_v52  ;;  %v2739_v41 = vadd.f32 %v2738_v60, %v7356_v49  ;;  %v9377_v33 = vld [vmem:[%s10423_s7 + $0x88] sm:$0xff]  ;;  %v9383_v40 = vld [vmem:[%s10423_s7 + $0x60] sm:$0xff]  ;;  %v9390_v52 = vld [vmem:[%s10423_s7 + $0x50] sm:$0xff] }
 0x8d8   :  { %v9409_v60 = vld [vmem:[%s10423_s7 + $0x38] sm:$0xff] }
 0x8d9   :  { %v4579_v26 = vmul.f32 -1.442695, %v2811_v51  ;;  %v2812_v23 = vadd.f32 %v2739_v41, %v11112_v50  ;;  %v9396_v51 = vld [vmem:[%s10423_s7 + $0x70] sm:$0xff]  ;;  %v9415_v41 = vld [vmem:[%s10423_s7 + $0x58] sm:$0xff] }
 0x8da   :  { %v9421_v50 = vld [vmem:[%s10423_s7 + $0x30] sm:$0xff] }
 0x8db   :  { %6068 = vpow2.f32 %v4579_v26  ;;  %v4580_v45 = vmul.f32 -1.442695, %v2812_v23  ;;  %v9402_v26 = vld [vmem:[%s10423_s7 + $0x48] sm:$0xff]  ;;  %11114 = vst [vmem:[#allocation22_spill] sm:$0xff] %v9421_v50  ;;  %v9428_v23 = vld [vmem:[%s10423_s7 + $0x20] sm:$0xff] }
 0x8dc   :  { %11115 = vst [vmem:[#allocation23_spill] sm:$0xff] %v9428_v23 }
 0x8dd   :  { %6070 = vpow2.f32 %v4580_v45  ;;  %v9434_v45 = vld [vmem:[%s10423_s7 + $0x40] sm:$0xff] }
 0x8de   :  { %11116 = vst [vmem:[#allocation24_spill] sm:$0xff] %v9434_v45 }
 0x8e8   :  { %v6069_v13 = vpop.eup %6068 }
 0x8e9   :  { %v2819_v14 = vadd.f32 1.0, %v6069_v13  ;;  %v9440_v13 = vld [vmem:[%s10423_s7 + $0x18] sm:$0xff] }
 0x8ea   :  { %v6071_v15 = vpop.eup %6070  ;;  %11117 = vst [vmem:[#allocation25_spill] sm:$0xff] %v9440_v13 }
 0x8eb   :  { %6072 = vrcp.f32 %v2819_v14  ;;  %v2820_v35 = vadd.f32 1.0, %v6071_v15  ;;  %v9447_v14 = vld [vmem:[%s10423_s7 + $0x8] sm:$0xff] }
 0x8ec   :  { %11118 = vst [vmem:[#allocation26_spill] sm:$0xff] %v9447_v14  ;;  %v9453_v15 = vld [vmem:[%s10423_s7 + $0x28] sm:$0xff] }
 0x8ed   :  { %11119 = vst [vmem:[#allocation27_spill] sm:$0xff] %v9453_v15 }
 0x8f8   :  { %v6073_v18 = vpop.eup %6072 }
 0x8f9   :  { %v2825_v43 = vmul.f32 %v6073_v18, %v2808_v17  ;;  %v9459_v17 = vld [vmem:[%s10423_s7] sm:$0xff]  ;;  %v9467_v18 = vld [vmem:[%s10423_s7 + $0x10] sm:$0xff] }
 0x8fa   :  { %11120 = vst [vmem:[#allocation28_spill] sm:$0xff] %v9459_v17  ;;  %11121 = vst [vmem:[#allocation29_spill] sm:$0xff] %v9467_v18 }
 0x8fb   :  { %v2826_v34 = vadd.f32 %v2825_v43, %v11113_v19 }
 0x8fd   :  { %6074 = vtanh.f32 %v2826_v34  ;;  %v454_v34 = vld [vmem:[%s10422_s6] sm:$0x7]  ;;  %s6422_s6 = smov [#allocation4]  }
 0x8fe   :  { %6076 = vrcp.f32 %v2820_v35 }
 0x90a   :  { %v6075_v36 = vpop.eup %6074 }
 0x90b   :  { %v2828_v49 = vsub.f32 %v8866_v29, %v6075_v36  ;;  %v6077_v37 = vpop.eup %6076  ;;  %v9194_v29 = vld [vmem:[%s10423_s7 + $0x150] sm:$0xff] }
 0x90d   :  { %v2829_v62 = vmul.f32 %v6077_v37, %v2828_v49  ;;  %v11124_v49 = vld [vmem:[#allocation64_spill] sm:$0xff] }
 0x90e   :  { %v9558_v37 = vrot.slane %v454_v34, %v11124_v49 }
 0x90f   :  { %v2830_v44 = vadd.f32 %v6075_v36, %v2829_v62  ;;  %v3023_v36 = vld [vmem:[%s10424_s8] sm:$0x7] }
 0x910   :  { %11125 = vst [vmem:[#allocation67_spill] sm:$0xff] %v9558_v37  ;;  %v9561_v62 = vrot.slane %v3023_v36, %v11124_v49  ;;  %v9572_v49 = vrot.slane %v454_v34, %v11129_v57 }
 0x911   :  { %2896 = vmatmul.mubr.f32.vlgmr.msra.gmra.mxu0 %v2830_v44  ;;  %5659 = vmatmul.mubr.f32.vlgmr.msra.gmra.mxu1 %v2830_v44 }
 0x912   :  { %3044 = vmatpush1.msra.mxu0 %v9179_v3  ;;  %3107 = vmatprep.mubr.f32.mxu0 %v10730_v22  ;;  %11126 = vst [vmem:[#allocation79_spill] sm:$0xff] %v9561_v62 }
 0x913   :  { %3045 = vmatprep.subr.mxu0 %v9184_v61  ;;  %5662 = vmatpush3.msra.mxu1 %v9189_v21 }
 0x914   :  { %3046 = vmatpush1.msra.mxu0 %v9194_v29  ;;  %5663 = vmatprep.subr.mxu1 %v10730_v22 }
 0x915   :  { %3047 = vmatprep.subr.mxu0 %v9200_v24  ;;  %5664 = vmatpush3.msra.mxu1 %v9206_v27 }
 0x916   :  { %3048 = vmatpush1.msra.mxu0 %v9212_v39  ;;  %5665 = vmatprep.subr.mxu1 %v10730_v22 }
 0x917   :  { %3049 = vmatprep.subr.mxu0 %v9219_v28  ;;  %5666 = vmatpush3.msra.mxu1 %v9225_v56 }
 0x918   :  { %3050 = vmatpush1.msra.mxu0 %v9231_v5  ;;  %5667 = vmatprep.subr.mxu1 %v10730_v22 }
 0x919   :  { %3051 = vmatprep.subr.mxu0 %v9238_v10  ;;  %5668 = vmatpush3.msra.mxu1 %v9244_v47 }
 0x91a   :  { %3052 = vmatpush1.msra.mxu0 %v9250_v12  ;;  %5669 = vmatprep.subr.mxu1 %v10730_v22 }
 0x91b   :  { %3053 = vmatprep.subr.mxu0 %v9257_v4  ;;  %5670 = vmatpush3.msra.mxu1 %v9263_v1 }
 0x91c   :  { %3054 = vmatpush1.msra.mxu0 %v9269_v16  ;;  %5671 = vmatprep.subr.mxu1 %v10730_v22 }
 0x91d   :  { %3055 = vmatprep.subr.mxu0 %v9276_v55  ;;  %5672 = vmatpush3.msra.mxu1 %v9282_v58 }
 0x91e   :  { %3056 = vmatpush1.msra.mxu0 %v9288_v2  ;;  %5673 = vmatprep.subr.mxu1 %v10730_v22 }
 0x91f   :  { %3057 = vmatprep.subr.mxu0 %v9295_v54  ;;  %5674 = vmatpush3.msra.mxu1 %v9301_v6 }
 0x920   :  { %3058 = vmatpush1.msra.mxu0 %v9307_v46  ;;  %5675 = vmatprep.subr.mxu1 %v10730_v22 }
 0x921   :  { %3059 = vmatprep.subr.mxu0 %v9314_v7  ;;  %5676 = vmatpush3.msra.mxu1 %v9320_v38 }
 0x922   :  { %3060 = vmatpush1.msra.mxu0 %v9326_v8  ;;  %5677 = vmatprep.subr.mxu1 %v10730_v22 }
 0x923   :  { %3061 = vmatprep.subr.mxu0 %v9333_v48  ;;  %5678 = vmatpush3.msra.mxu1 %v9339_v9 }
 0x924   :  { %3062 = vmatpush1.msra.mxu0 %v9345_v0  ;;  %5679 = vmatprep.subr.mxu1 %v10730_v22 }
 0x925   :  { %3063 = vmatprep.subr.mxu0 %v9352_v42  ;;  %5680 = vmatpush3.msra.mxu1 %v9358_v25 }
 0x926   :  { %3064 = vmatpush1.msra.mxu0 %v9364_v32  ;;  %5681 = vmatprep.subr.mxu1 %v10730_v22 }
 0x927   :  { %3065 = vmatprep.subr.mxu0 %v9371_v20  ;;  %5682 = vmatpush3.msra.mxu1 %v9377_v33 }
 0x928   :  { %3066 = vmatpush1.msra.mxu0 %v9383_v40  ;;  %5683 = vmatprep.subr.mxu1 %v10730_v22 }
 0x929   :  { %3067 = vmatprep.subr.mxu0 %v9390_v52  ;;  %5684 = vmatpush3.msra.mxu1 %v9396_v51 }
 0x92a   :  { %3068 = vmatpush1.msra.mxu0 %v9402_v26  ;;  %5685 = vmatprep.subr.mxu1 %v10730_v22 }
 0x92b   :  { %3069 = vmatprep.subr.mxu0 %v9409_v60  ;;  %5686 = vmatpush3.msra.mxu1 %v9415_v41 }
 0x92c   :  { %3070 = vmatpush1.msra.mxu0 %v9421_v50  ;;  %5687 = vmatprep.subr.mxu1 %v10730_v22 }
 0x92d   :  { %3071 = vmatprep.subr.mxu0 %v9428_v23  ;;  %5688 = vmatpush3.msra.mxu1 %v9434_v45 }
 0x92e   :  { %3072 = vmatpush1.msra.mxu0 %v9440_v13  ;;  %5689 = vmatprep.subr.mxu1 %v10730_v22 }
 0x92f   :  { %3073 = vmatprep.subr.mxu0 %v9447_v14  ;;  %5690 = vmatpush3.msra.mxu1 %v9453_v15 }
 0x930   :  { %3074 = vmatpush1.msra.mxu0 %v9459_v17  ;;  %5691 = vmatprep.subr.mxu1 %v10730_v22 }
 0x931   :  { %3108 = vmatmul.mubr.f32.vlgmr.msra.gmra.mxu0 %v10730_v22  ;;  %5692 = vmatpush3.msra.mxu1 %v9467_v18 }
 0x932   :  { %5693 = vmatprep.mubr.msk.f32.mxu1 %vm6421_vm0, %v10730_v22  ;;  %3208 = vmatprep.subr.mxu0 %v9160_v63 }
 0x933   :  { %5694 = vmatmul.mubr.f32.vlgmr.msra.gmra.mxu1 %v10730_v22  ;;  %5696 = vmatprep.subr.mxu1 %v10730_v22 }
 0x934   :  { %3209 = vmatpush1.msra.mxu0 %v9179_v3  ;;  %5697 = vmatpush3.msra.mxu1 %v9189_v21 }
 0x935   :  { %3210 = vmatprep.subr.mxu0 %v9184_v61  ;;  %5698 = vmatprep.subr.mxu1 %v10730_v22 }
 0x936   :  { %3211 = vmatpush1.msra.mxu0 %v9194_v29  ;;  %5699 = vmatpush3.msra.mxu1 %v9206_v27 }
 0x937   :  { %3212 = vmatprep.subr.mxu0 %v9200_v24  ;;  %5700 = vmatprep.subr.mxu1 %v10730_v22 }
 0x938   :  { %3213 = vmatpush1.msra.mxu0 %v9212_v39  ;;  %5701 = vmatpush3.msra.mxu1 %v9225_v56 }
 0x939   :  { %3214 = vmatprep.subr.mxu0 %v9219_v28  ;;  %5702 = vmatprep.subr.mxu1 %v10730_v22 }
 0x93a   :  { %3215 = vmatpush1.msra.mxu0 %v9231_v5  ;;  %5703 = vmatpush3.msra.mxu1 %v9244_v47 }
 0x93b   :  { %3216 = vmatprep.subr.mxu0 %v9238_v10  ;;  %5704 = vmatprep.subr.mxu1 %v10730_v22 }
 0x93c   :  { %3217 = vmatpush1.msra.mxu0 %v9250_v12  ;;  %5705 = vmatpush3.msra.mxu1 %v9263_v1 }
 0x93d   :  { %3218 = vmatprep.subr.mxu0 %v9257_v4  ;;  %5706 = vmatprep.subr.mxu1 %v10730_v22 }
 0x93e   :  { %3219 = vmatpush1.msra.mxu0 %v9269_v16  ;;  %5707 = vmatpush3.msra.mxu1 %v9282_v58 }
 0x93f   :  { %3220 = vmatprep.subr.mxu0 %v9276_v55  ;;  %5708 = vmatprep.subr.mxu1 %v10730_v22 }
 0x940   :  { %3221 = vmatpush1.msra.mxu0 %v9288_v2  ;;  %5709 = vmatpush3.msra.mxu1 %v9301_v6 }
 0x941   :  { %3222 = vmatprep.subr.mxu0 %v9295_v54  ;;  %5710 = vmatprep.subr.mxu1 %v10730_v22 }
 0x942   :  { %3223 = vmatpush1.msra.mxu0 %v9307_v46  ;;  %5711 = vmatpush3.msra.mxu1 %v9320_v38 }
 0x943   :  { %3224 = vmatprep.subr.mxu0 %v9314_v7  ;;  %5712 = vmatprep.subr.mxu1 %v10730_v22 }
 0x944   :  { %3225 = vmatpush1.msra.mxu0 %v9326_v8  ;;  %5713 = vmatpush3.msra.mxu1 %v9339_v9 }
 0x945   :  { %3226 = vmatprep.subr.mxu0 %v9333_v48  ;;  %5714 = vmatprep.subr.mxu1 %v10730_v22 }
 0x946   :  { %3227 = vmatpush1.msra.mxu0 %v9345_v0  ;;  %5715 = vmatpush3.msra.mxu1 %v9358_v25 }
 0x947   :  { %3228 = vmatprep.subr.mxu0 %v9352_v42  ;;  %5716 = vmatprep.subr.mxu1 %v10730_v22 }
 0x948   :  { %3229 = vmatpush1.msra.mxu0 %v9364_v32  ;;  %5717 = vmatpush3.msra.mxu1 %v9377_v33 }
 0x949   :  { %3230 = vmatprep.subr.mxu0 %v9371_v20  ;;  %5718 = vmatprep.subr.mxu1 %v10730_v22 }
 0x94a   :  { %3231 = vmatpush1.msra.mxu0 %v9383_v40  ;;  %5719 = vmatpush3.msra.mxu1 %v9396_v51 }
 0x94b   :  { %3232 = vmatprep.subr.mxu0 %v9390_v52  ;;  %5720 = vmatprep.subr.mxu1 %v10730_v22 }
 0x94c   :  { %3233 = vmatpush1.msra.mxu0 %v9402_v26  ;;  %5721 = vmatpush3.msra.mxu1 %v9415_v41 }
 0x94d   :  { %3234 = vmatprep.subr.mxu0 %v9409_v60  ;;  %5722 = vmatprep.subr.mxu1 %v10730_v22 }
 0x94e   :  { %3235 = vmatpush1.msra.mxu0 %v9421_v50  ;;  %5723 = vmatpush3.msra.mxu1 %v9434_v45 }
 0x94f   :  { %3236 = vmatprep.subr.mxu0 %v9428_v23  ;;  %5724 = vmatprep.subr.mxu1 %v10730_v22 }
 0x950   :  { %3237 = vmatpush1.msra.mxu0 %v9440_v13  ;;  %5725 = vmatpush3.msra.mxu1 %v9453_v15 }
 0x951   :  { %3238 = vmatprep.subr.mxu0 %v9447_v14  ;;  %5726 = vmatprep.subr.mxu1 %v10730_v22 }
 0x952   :  { %3239 = vmatpush1.msra.mxu0 %v9459_v17  ;;  %3272 = vmatprep.mubr.f32.mxu0 %v10730_v22  ;;  %v11131_v17 = vld [vmem:[#allocation9_spill] sm:$0xff] }
 0x953   :  { %5727 = vmatpush3.msra.mxu1 %v9467_v18  ;;  %5728 = vmatprep.mubr.msk.f32.mxu1 %vm6421_vm0, %v10730_v22  ;;  %v723_v14 = vadd.f32 %v11131_v17, %v9572_v49 }
 0x954   :  { %3374 = vmatprep.subr.mxu0 %v9160_v63  ;;  %5731 = vmatprep.subr.mxu1 %v10730_v22  ;;  %v9569_v63 = vrot.slane %v3023_v36, %v11129_v57 }
 0x956   :  { %11130 = vst [vmem:[#allocation75_spill] sm:$0xff] %v9569_v63 }
 0x9d1   :  { %v9547_v43 = vpop.f32.mrf.mxu1  ;;  %v9552_v35 = vpop.f32.mrf.mxu0 }
 0x9d2   :  { %11122 = vst [vmem:[#allocation7_spill] sm:$0xff] %v9547_v43  ;;  %11123 = vst [vmem:[#allocation66_spill] sm:$0xff] %v9552_v35 }
 0x9d3   :  { %v5660_v19 = vpop.f32.mrf.mxu1  ;;  %v9563_v44 = vpop.f32.mrf.mxu0 }
 0x9d4   :  { %11127 = vst [vmem:[#allocation10_spill] sm:$0xff] %v9563_v44  ;;  %v11128_v19 = vld [vmem:[#allocation13_spill] sm:$0xff] }
 0x9d5   :  { %v721_v30 = vadd.f32 %v11128_v19, %v9558_v37 }
 0x9f1   :  { %v3109_v43 = vpop.f32.mrf.mxu0 }
 0x9f2   :  { %v3110_v11 = vadd.f32 %v3109_v43, %v9561_v62 }
 0x9f3   :  { %v3180_v31 = vpop.f32.mrf.mxu1  ;;  %v3111_v18 = vpop.f32.mrf.mxu0 }
 0x9f4   :  { %v3184_v35 = vadd.f32 %v3110_v11, %v721_v30  ;;  %v3112_v44 = vadd.f32 %v3111_v18, %v9569_v63  ;;  %v11133_v18 = vld [vmem:[#allocation8_spill] sm:$0xff] }
 0x9f5   :  { %v5695_v53 = vpop.f32.mrf.mxu1 }
 0x9f6   :  { %v4581_v59 = vmul.f32 -1.442695, %v3184_v35  ;;  %v3185_v19 = vadd.f32 %v3112_v44, %v723_v14  ;;  %v11132_v53 = vld [vmem:[#allocation74_spill] sm:$0xff] }
 0x9f7   :  { %v9578_v30 = vrot.slane %v3023_v36, %v11132_v53 }
 0x9f8   :  { %6078 = vpow2.f32 %v4581_v59  ;;  %v4582_v37 = vmul.f32 -1.442695, %v3185_v19  ;;  %v9581_v59 = vrot.slane %v454_v34, %v11132_v53  ;;  %v11137_v34 = vld [vmem:[#allocation29_spill] sm:$0xff]  ;;  %v11138_v53 = vld [vmem:[#allocation18_spill] sm:$0xff] }
 0x9f9   :  { %v3181_v57 = vadd.f32 %v3180_v31, %v9578_v30  ;;  %v11136_v31 = vld [vmem:[#allocation28_spill] sm:$0xff] }
 0x9fa   :  { %6080 = vpow2.f32 %v4582_v37  ;;  %v792_v63 = vadd.f32 %v11133_v18, %v9581_v59  ;;  %v11140_v18 = vld [vmem:[#allocation11_spill] sm:$0xff] }
 0xa05   :  { %v6079_v43 = vpop.eup %6078 }
 0xa06   :  { %v3192_v62 = vadd.f32 1.0, %v6079_v43 }
 0xa07   :  { %v6081_v11 = vpop.eup %6080 }
 0xa08   :  { %6082 = vrcp.f32 %v3192_v62  ;;  %v3193_v14 = vadd.f32 1.0, %v6081_v11 }
 0xa15   :  { %v6083_v35 = vpop.eup %6082 }
 0xa16   :  { %v3198_v17 = vmul.f32 %v6083_v35, %v3181_v57  ;;  %v11139_v35 = vld [vmem:[#allocation67_spill] sm:$0xff] }
 0xa18   :  { %v3199_v44 = vadd.f32 %v3198_v17, %v792_v63  ;;  %v11135_v63 = vld [vmem:[#allocation26_spill] sm:$0xff]  ;;  %v1032_v17 = vadd.f32 %v11140_v18, %v11139_v35 }
 0xa1a   :  { %6084 = vtanh.f32 %v3199_v44 }
 0xa1b   :  { %6086 = vrcp.f32 %v3193_v14  ;;  %v11141_v14 = vld [vmem:[#allocation79_spill] sm:$0xff] }
 0xa27   :  { %v6085_v37 = vpop.eup %6084 }
 0xa28   :  { %v3201_v62 = vsub.f32 0.0, %v6085_v37  ;;  %v6087_v19 = vpop.eup %6086 }
 0xa2a   :  { %v3202_v36 = vmul.f32 %v6087_v19, %v3201_v62 }
 0xa2c   :  { %v9586_v43 = vadd.f32 %v6085_v37, %v3202_v36 }
 0xa2e   :  { %11134 = vst [vmem:[#allocation76_spill] sm:$0xff] %v9586_v43  ;;  %3273 = vmatmul.mubr.f32.vlgmr.msra.gmra.mxu0 %v9586_v43  ;;  %5729 = vmatmul.mubr.f32.vlgmr.msra.gmra.mxu1 %v9586_v43 }
 0xa2f   :  { %3375 = vmatpush1.msra.mxu0 %v9179_v3  ;;  %5732 = vmatpush3.msra.mxu1 %v9189_v21 }
 0xa30   :  { %3376 = vmatprep.subr.mxu0 %v9184_v61  ;;  %5733 = vmatprep.subr.mxu1 %v10730_v22 }
 0xa31   :  { %3377 = vmatpush1.msra.mxu0 %v9194_v29  ;;  %5734 = vmatpush3.msra.mxu1 %v9206_v27 }
 0xa32   :  { %3378 = vmatprep.subr.mxu0 %v9200_v24  ;;  %5735 = vmatprep.subr.mxu1 %v10730_v22 }
 0xa33   :  { %3379 = vmatpush1.msra.mxu0 %v9212_v39  ;;  %5736 = vmatpush3.msra.mxu1 %v9225_v56 }
 0xa34   :  { %3380 = vmatprep.subr.mxu0 %v9219_v28  ;;  %5737 = vmatprep.subr.mxu1 %v10730_v22 }
 0xa35   :  { %3381 = vmatpush1.msra.mxu0 %v9231_v5  ;;  %5738 = vmatpush3.msra.mxu1 %v9244_v47 }
 0xa36   :  { %3382 = vmatprep.subr.mxu0 %v9238_v10  ;;  %5739 = vmatprep.subr.mxu1 %v10730_v22 }
 0xa37   :  { %3383 = vmatpush1.msra.mxu0 %v9250_v12  ;;  %5740 = vmatpush3.msra.mxu1 %v9263_v1 }
 0xa38   :  { %3384 = vmatprep.subr.mxu0 %v9257_v4  ;;  %5741 = vmatprep.subr.mxu1 %v10730_v22 }
 0xa39   :  { %3385 = vmatpush1.msra.mxu0 %v9269_v16  ;;  %5742 = vmatpush3.msra.mxu1 %v9282_v58 }
 0xa3a   :  { %3386 = vmatprep.subr.mxu0 %v9276_v55  ;;  %5743 = vmatprep.subr.mxu1 %v10730_v22 }
 0xa3b   :  { %3387 = vmatpush1.msra.mxu0 %v9288_v2  ;;  %5744 = vmatpush3.msra.mxu1 %v9301_v6 }
 0xa3c   :  { %3388 = vmatprep.subr.mxu0 %v9295_v54  ;;  %5745 = vmatprep.subr.mxu1 %v10730_v22 }
 0xa3d   :  { %3389 = vmatpush1.msra.mxu0 %v9307_v46  ;;  %5746 = vmatpush3.msra.mxu1 %v9320_v38 }
 0xa3e   :  { %3390 = vmatprep.subr.mxu0 %v9314_v7  ;;  %5747 = vmatprep.subr.mxu1 %v10730_v22 }
 0xa3f   :  { %3391 = vmatpush1.msra.mxu0 %v9326_v8  ;;  %5748 = vmatpush3.msra.mxu1 %v9339_v9 }
 0xa40   :  { %3392 = vmatprep.subr.mxu0 %v9333_v48  ;;  %5749 = vmatprep.subr.mxu1 %v10730_v22 }
 0xa41   :  { %3393 = vmatpush1.msra.mxu0 %v9345_v0  ;;  %5750 = vmatpush3.msra.mxu1 %v9358_v25 }
 0xa42   :  { %3394 = vmatprep.subr.mxu0 %v9352_v42  ;;  %5751 = vmatprep.subr.mxu1 %v10730_v22 }
 0xa43   :  { %3395 = vmatpush1.msra.mxu0 %v9364_v32  ;;  %5752 = vmatpush3.msra.mxu1 %v9377_v33 }
 0xa44   :  { %3396 = vmatprep.subr.mxu0 %v9371_v20  ;;  %5753 = vmatprep.subr.mxu1 %v10730_v22 }
 0xa45   :  { %3397 = vmatpush1.msra.mxu0 %v9383_v40  ;;  %5754 = vmatpush3.msra.mxu1 %v9396_v51 }
 0xa46   :  { %3398 = vmatprep.subr.mxu0 %v9390_v52  ;;  %5755 = vmatprep.subr.mxu1 %v10730_v22 }
 0xa47   :  { %3399 = vmatpush1.msra.mxu0 %v9402_v26  ;;  %5756 = vmatpush3.msra.mxu1 %v9415_v41 }
 0xa48   :  { %3400 = vmatprep.subr.mxu0 %v9409_v60  ;;  %5757 = vmatprep.subr.mxu1 %v10730_v22 }
 0xa49   :  { %3401 = vmatpush1.msra.mxu0 %v9421_v50  ;;  %5758 = vmatpush3.msra.mxu1 %v9434_v45 }
 0xa4a   :  { %3402 = vmatprep.subr.mxu0 %v9428_v23  ;;  %5759 = vmatprep.subr.mxu1 %v10730_v22 }
 0xa4b   :  { %3403 = vmatpush1.msra.mxu0 %v9440_v13  ;;  %5760 = vmatpush3.msra.mxu1 %v9453_v15 }
 0xa4c   :  { %3404 = vmatprep.subr.mxu0 %v11135_v63  ;;  %5761 = vmatprep.subr.mxu1 %v10730_v22  ;;  %v11143_v63 = vld [vmem:[#allocation12_spill] sm:$0xff] }
 0xa4d   :  { %3405 = vmatpush1.msra.mxu0 %v11136_v31  ;;  %3438 = vmatprep.mubr.f32.mxu0 %v10730_v22  ;;  %v1034_v15 = vadd.f32 %v11143_v63, %v9572_v49 }
 0xa4e   :  { %5762 = vmatpush3.msra.mxu1 %v11137_v34  ;;  %5763 = vmatprep.mubr.msk.f32.mxu1 %vm6421_vm0, %v10730_v22  ;;  %v11142_v34 = vld [vmem:[#allocation75_spill] sm:$0xff] }
 0xa4f   :  { %3540 = vmatprep.subr.mxu0 %v11138_v53  ;;  %5766 = vmatprep.subr.mxu1 %v10730_v22 }
 0xaee   :  { %v3274_v57 = vpop.f32.mrf.mxu0  ;;  %v3345_v11 = vpop.f32.mrf.mxu1 }
 0xaef   :  { %v3275_v44 = vadd.f32 %v3274_v57, %v11141_v14  ;;  %v3346_v18 = vadd.f32 %v3345_v11, %v9578_v30  ;;  %v11150_v11 = vld [vmem:[#allocation27_spill] sm:$0xff] }
 0xaf0   :  { %v5730_v37 = vpop.f32.mrf.mxu1  ;;  %v3276_v36 = vpop.f32.mrf.mxu0 }
 0xaf1   :  { %v3349_v62 = vadd.f32 %v3275_v44, %v1032_v17  ;;  %v3277_v31 = vadd.f32 %v3276_v36, %v11142_v34  ;;  %v11144_v17 = vld [vmem:[#allocation14_spill] sm:$0xff] }
 0xaf2   :  { %v1103_v44 = vadd.f32 %v11144_v17, %v9581_v59  ;;  %v11153_v17 = vld [vmem:[#allocation29_spill] sm:$0xff] }
 0xaf3   :  { %v4583_v19 = vmul.f32 -1.442695, %v3349_v62  ;;  %v3350_v53 = vadd.f32 %v3277_v31, %v1034_v15 }
 0xaf5   :  { %6088 = vpow2.f32 %v4583_v19  ;;  %v4584_v13 = vmul.f32 -1.442695, %v3350_v53  ;;  %v11149_v53 = vld [vmem:[#allocation25_spill] sm:$0xff] }
 0xaf7   :  { %6090 = vpow2.f32 %v4584_v13  ;;  %v11148_v13 = vld [vmem:[#allocation23_spill] sm:$0xff] }
 0xb02   :  { %v6089_v23 = vpop.eup %6088 }
 0xb03   :  { %v3357_v45 = vadd.f32 1.0, %v6089_v23 }
 0xb04   :  { %v6091_v50 = vpop.eup %6090 }
 0xb05   :  { %6092 = vrcp.f32 %v3357_v45  ;;  %v3358_v19 = vadd.f32 1.0, %v6091_v50  ;;  %v11146_v50 = vld [vmem:[#allocation22_spill] sm:$0xff]  ;;  %v11147_v45 = vld [vmem:[#allocation24_spill] sm:$0xff] }
 0xb12   :  { %v6093_v57 = vpop.eup %6092 }
 0xb13   :  { %v3363_v37 = vmul.f32 %v6093_v57, %v3346_v18  ;;  %v11151_v18 = vld [vmem:[#allocation26_spill] sm:$0xff]  ;;  %v11152_v57 = vld [vmem:[#allocation28_spill] sm:$0xff] }
 0xb15   :  { %v3364_v62 = vadd.f32 %v3363_v37, %v1103_v44  ;;  %v11154_v44 = vld [vmem:[#allocation18_spill] sm:$0xff] }
 0xb17   :  { %6094 = vtanh.f32 %v3364_v62 }
 0xb18   :  { %6096 = vrcp.f32 %v3358_v19  ;;  %v11155_v19 = vld [vmem:[#allocation69_spill] sm:$0xff] }
 0xb24   :  { %v6095_v36 = vpop.eup %6094 }
 0xb25   :  { %v3366_v15 = vsub.f32 %v9586_v43, %v6095_v36  ;;  %v6097_v63 = vpop.eup %6096 }
 0xb27   :  { %v3367_v31 = vmul.f32 %v6097_v63, %v3366_v15 }
 0xb29   :  { %v9667_v23 = vadd.f32 %v6095_v36, %v3367_v31  ;;  %v1343_v36 = vadd.f32 %v11155_v19, %v11139_v35 }
 0xb2b   :  { %11145 = vst [vmem:[#allocation85_spill] sm:$0xff] %v9667_v23  ;;  %3439 = vmatmul.mubr.f32.vlgmr.msra.gmra.mxu0 %v9667_v23  ;;  %5764 = vmatmul.mubr.f32.vlgmr.msra.gmra.mxu1 %v9667_v23 }
 0xb2c   :  { %3541 = vmatpush1.msra.mxu0 %v9179_v3  ;;  %5767 = vmatpush3.msra.mxu1 %v9189_v21 }
 0xb2d   :  { %3542 = vmatprep.subr.mxu0 %v9184_v61  ;;  %5768 = vmatprep.subr.mxu1 %v10730_v22 }
 0xb2e   :  { %3543 = vmatpush1.msra.mxu0 %v9194_v29  ;;  %5769 = vmatpush3.msra.mxu1 %v9206_v27 }
 0xb2f   :  { %3544 = vmatprep.subr.mxu0 %v9200_v24  ;;  %5770 = vmatprep.subr.mxu1 %v10730_v22 }
 0xb30   :  { %3545 = vmatpush1.msra.mxu0 %v9212_v39  ;;  %5771 = vmatpush3.msra.mxu1 %v9225_v56 }
 0xb31   :  { %3546 = vmatprep.subr.mxu0 %v9219_v28  ;;  %5772 = vmatprep.subr.mxu1 %v10730_v22 }
 0xb32   :  { %3547 = vmatpush1.msra.mxu0 %v9231_v5  ;;  %5773 = vmatpush3.msra.mxu1 %v9244_v47 }
 0xb33   :  { %3548 = vmatprep.subr.mxu0 %v9238_v10  ;;  %5774 = vmatprep.subr.mxu1 %v10730_v22 }
 0xb34   :  { %3549 = vmatpush1.msra.mxu0 %v9250_v12  ;;  %5775 = vmatpush3.msra.mxu1 %v9263_v1 }
 0xb35   :  { %3550 = vmatprep.subr.mxu0 %v9257_v4  ;;  %5776 = vmatprep.subr.mxu1 %v10730_v22 }
 0xb36   :  { %3551 = vmatpush1.msra.mxu0 %v9269_v16  ;;  %5777 = vmatpush3.msra.mxu1 %v9282_v58 }
 0xb37   :  { %3552 = vmatprep.subr.mxu0 %v9276_v55  ;;  %5778 = vmatprep.subr.mxu1 %v10730_v22 }
 0xb38   :  { %3553 = vmatpush1.msra.mxu0 %v9288_v2  ;;  %5779 = vmatpush3.msra.mxu1 %v9301_v6 }
 0xb39   :  { %3554 = vmatprep.subr.mxu0 %v9295_v54  ;;  %5780 = vmatprep.subr.mxu1 %v10730_v22 }
 0xb3a   :  { %3555 = vmatpush1.msra.mxu0 %v9307_v46  ;;  %5781 = vmatpush3.msra.mxu1 %v9320_v38 }
 0xb3b   :  { %3556 = vmatprep.subr.mxu0 %v9314_v7  ;;  %5782 = vmatprep.subr.mxu1 %v10730_v22 }
 0xb3c   :  { %3557 = vmatpush1.msra.mxu0 %v9326_v8  ;;  %5783 = vmatpush3.msra.mxu1 %v9339_v9 }
 0xb3d   :  { %3558 = vmatprep.subr.mxu0 %v9333_v48  ;;  %5784 = vmatprep.subr.mxu1 %v10730_v22 }
 0xb3e   :  { %3559 = vmatpush1.msra.mxu0 %v9345_v0  ;;  %5785 = vmatpush3.msra.mxu1 %v9358_v25 }
 0xb3f   :  { %3560 = vmatprep.subr.mxu0 %v9352_v42  ;;  %5786 = vmatprep.subr.mxu1 %v10730_v22 }
 0xb40   :  { %3561 = vmatpush1.msra.mxu0 %v9364_v32  ;;  %5787 = vmatpush3.msra.mxu1 %v9377_v33 }
 0xb41   :  { %3562 = vmatprep.subr.mxu0 %v9371_v20  ;;  %5788 = vmatprep.subr.mxu1 %v10730_v22 }
 0xb42   :  { %3563 = vmatpush1.msra.mxu0 %v9383_v40  ;;  %5789 = vmatpush3.msra.mxu1 %v9396_v51 }
 0xb43   :  { %3564 = vmatprep.subr.mxu0 %v9390_v52  ;;  %5790 = vmatprep.subr.mxu1 %v10730_v22 }
 0xb44   :  { %3565 = vmatpush1.msra.mxu0 %v9402_v26  ;;  %5791 = vmatpush3.msra.mxu1 %v9415_v41 }
 0xb45   :  { %3566 = vmatprep.subr.mxu0 %v9409_v60  ;;  %5792 = vmatprep.subr.mxu1 %v10730_v22 }
 0xb46   :  { %3567 = vmatpush1.msra.mxu0 %v11146_v50  ;;  %5793 = vmatpush3.msra.mxu1 %v11147_v45 }
 0xb47   :  { %3568 = vmatprep.subr.mxu0 %v11148_v13  ;;  %5794 = vmatprep.subr.mxu1 %v10730_v22 }
 0xb48   :  { %3569 = vmatpush1.msra.mxu0 %v11149_v53  ;;  %5795 = vmatpush3.msra.mxu1 %v11150_v11 }
 0xb49   :  { %3570 = vmatprep.subr.mxu0 %v11151_v18  ;;  %5796 = vmatprep.subr.mxu1 %v10730_v22  ;;  %v11156_v18 = vld [vmem:[#allocation84_spill] sm:$0xff] }
 0xb4a   :  { %3571 = vmatpush1.msra.mxu0 %v11152_v57  ;;  %3604 = vmatprep.mubr.f32.mxu0 %v10730_v22  ;;  %v1345_v11 = vadd.f32 %v11156_v18, %v9572_v49 }
 0xb4b   :  { %5797 = vmatpush3.msra.mxu1 %v11153_v17  ;;  %5798 = vmatprep.mubr.msk.f32.mxu1 %vm6421_vm0, %v10730_v22 }
 0xb4c   :  { %3706 = vmatprep.subr.mxu0 %v11154_v44  ;;  %5801 = vmatprep.subr.mxu1 %v10730_v22 }
 0xbeb   :  { %v3440_v37 = vpop.f32.mrf.mxu0  ;;  %v3511_v62 = vpop.f32.mrf.mxu1 }
 0xbec   :  { %v3441_v15 = vadd.f32 %v3440_v37, %v11141_v14  ;;  %v3512_v19 = vadd.f32 %v3511_v62, %v9578_v30 }
 0xbed   :  { %v5765_v63 = vpop.f32.mrf.mxu1  ;;  %v3442_v57 = vpop.f32.mrf.mxu0 }
 0xbee   :  { %v3515_v31 = vadd.f32 %v3441_v15, %v1343_v36  ;;  %v3443_v17 = vadd.f32 %v3442_v57, %v11142_v34  ;;  %v11157_v36 = vld [vmem:[#allocation68_spill] sm:$0xff] }
 0xbef   :  { %v1414_v15 = vadd.f32 %v11157_v36, %v9581_v59 }
 0xbf0   :  { %v4585_v43 = vmul.f32 -1.442695, %v3515_v31  ;;  %v3516_v44 = vadd.f32 %v3443_v17, %v1345_v11 }
 0xbf2   :  { %6098 = vpow2.f32 %v4585_v43  ;;  %v4586_v53 = vmul.f32 -1.442695, %v3516_v44 }
 0xbf4   :  { %6100 = vpow2.f32 %v4586_v53  ;;  %v11168_v53 = vld [vmem:[#allocation83_spill] sm:$0xff] }
 0xbf5   :  { %v1656_v62 = vadd.f32 %v11168_v53, %v9572_v49  ;;  %v9872_v53 = vld [vmem:[%s10423_s7 + $0x140] sm:$0xff] }
 0xbff   :  { %v6099_v13 = vpop.eup %6098 }
 0xc00   :  { %v3523_v45 = vadd.f32 1.0, %v6099_v13 }
 0xc01   :  { %v6101_v50 = vpop.eup %6100 }
 0xc02   :  { %6102 = vrcp.f32 %v3523_v45  ;;  %v3524_v31 = vadd.f32 1.0, %v6101_v50 }
 0xc0f   :  { %v6103_v37 = vpop.eup %6102 }
 0xc10   :  { %v3529_v43 = vmul.f32 %v6103_v37, %v3512_v19 }
 0xc12   :  { %v3530_v63 = vadd.f32 %v3529_v43, %v1414_v15 }
 0xc14   :  { %6104 = vtanh.f32 %v3530_v63 }
 0xc15   :  { %6106 = vrcp.f32 %v3524_v31  ;;  %v11169_v31 = vld [vmem:[#allocation70_spill] sm:$0xff] }
 0xc21   :  { %v6105_v57 = vpop.eup %6104 }
 0xc22   :  { %v3532_v11 = vsub.f32 %v9667_v23, %v6105_v57  ;;  %v6107_v18 = vpop.eup %6106 }
 0xc24   :  { %v3533_v17 = vmul.f32 %v6107_v18, %v3532_v11 }
 0xc26   :  { %v9748_v13 = vadd.f32 %v6105_v57, %v3533_v17  ;;  %v1725_v57 = vadd.f32 %v11169_v31, %v9581_v59  ;;  %v9929_v31 = vld [vmem:[%s10423_s7 + $0xf8] sm:$0xff] }
 0xc28   :  { %11158 = vst [vmem:[#allocation30_spill] sm:$0xff] %v9748_v13  ;;  %3605 = vmatmul.mubr.f32.vlgmr.msra.gmra.mxu0 %v9748_v13  ;;  %5799 = vmatmul.mubr.f32.vlgmr.msra.gmra.mxu1 %v9748_v13 }
 0xc29   :  { %3707 = vmatpush1.msra.mxu0 %v9179_v3  ;;  %5802 = vmatpush3.msra.mxu1 %v9189_v21  ;;  %v11159_v3 = vld [vmem:[#allocation22_spill] sm:$0xff]  ;;  %v11161_v21 = vld [vmem:[#allocation23_spill] sm:$0xff] }
 0xc2a   :  { %3708 = vmatprep.subr.mxu0 %v9184_v61  ;;  %5803 = vmatprep.subr.mxu1 %v10730_v22  ;;  %v11160_v61 = vld [vmem:[#allocation24_spill] sm:$0xff] }
 0xc2b   :  { %3709 = vmatpush1.msra.mxu0 %v9194_v29  ;;  %5804 = vmatpush3.msra.mxu1 %v9206_v27  ;;  %v11162_v29 = vld [vmem:[#allocation25_spill] sm:$0xff]  ;;  %v11164_v27 = vld [vmem:[#allocation26_spill] sm:$0xff] }
 0xc2c   :  { %3710 = vmatprep.subr.mxu0 %v9200_v24  ;;  %5805 = vmatprep.subr.mxu1 %v10730_v22  ;;  %v11163_v24 = vld [vmem:[#allocation27_spill] sm:$0xff] }
 0xc2d   :  { %3711 = vmatpush1.msra.mxu0 %v9212_v39  ;;  %5806 = vmatpush3.msra.mxu1 %v9225_v56  ;;  %v11165_v39 = vld [vmem:[#allocation28_spill] sm:$0xff] }
 0xc2e   :  { %3712 = vmatprep.subr.mxu0 %v9219_v28  ;;  %5807 = vmatprep.subr.mxu1 %v10730_v22  ;;  %v11166_v28 = vld [vmem:[#allocation29_spill] sm:$0xff]  ;;  %v9820_v56 = vld [vmem:[%s10423_s7 + $0x170] sm:$0xff] }
 0xc2f   :  { %3713 = vmatpush1.msra.mxu0 %v9231_v5  ;;  %5808 = vmatpush3.msra.mxu1 %v9244_v47  ;;  %v11167_v47 = vld [vmem:[#allocation71_spill] sm:$0xff] }
 0xc30   :  { %3714 = vmatprep.subr.mxu0 %v9238_v10  ;;  %5809 = vmatprep.subr.mxu1 %v10730_v22 }
 0xc31   :  { %3715 = vmatpush1.msra.mxu0 %v9250_v12  ;;  %5810 = vmatpush3.msra.mxu1 %v9263_v1  ;;  %v1654_v12 = vadd.f32 %v11167_v47, %v11139_v35 }
 0xc32   :  { %3716 = vmatprep.subr.mxu0 %v9257_v4  ;;  %5811 = vmatprep.subr.mxu1 %v10730_v22 }
 0xc33   :  { %3717 = vmatpush1.msra.mxu0 %v9269_v16  ;;  %5812 = vmatpush3.msra.mxu1 %v9282_v58 }
 0xc34   :  { %3718 = vmatprep.subr.mxu0 %v9276_v55  ;;  %5813 = vmatprep.subr.mxu1 %v10730_v22 }
 0xc35   :  { %3719 = vmatpush1.msra.mxu0 %v9288_v2  ;;  %5814 = vmatpush3.msra.mxu1 %v9301_v6 }
 0xc36   :  { %3720 = vmatprep.subr.mxu0 %v9295_v54  ;;  %5815 = vmatprep.subr.mxu1 %v10730_v22 }
 0xc37   :  { %3721 = vmatpush1.msra.mxu0 %v9307_v46  ;;  %5816 = vmatpush3.msra.mxu1 %v9320_v38 }
 0xc38   :  { %3722 = vmatprep.subr.mxu0 %v9314_v7  ;;  %5817 = vmatprep.subr.mxu1 %v10730_v22 }
 0xc39   :  { %3723 = vmatpush1.msra.mxu0 %v9326_v8  ;;  %5818 = vmatpush3.msra.mxu1 %v9339_v9 }
 0xc3a   :  { %3724 = vmatprep.subr.mxu0 %v9333_v48  ;;  %5819 = vmatprep.subr.mxu1 %v10730_v22 }
 0xc3b   :  { %3725 = vmatpush1.msra.mxu0 %v9345_v0  ;;  %5820 = vmatpush3.msra.mxu1 %v9358_v25 }
 0xc3c   :  { %3726 = vmatprep.subr.mxu0 %v9352_v42  ;;  %5821 = vmatprep.subr.mxu1 %v10730_v22 }
 0xc3d   :  { %3727 = vmatpush1.msra.mxu0 %v9364_v32  ;;  %5822 = vmatpush3.msra.mxu1 %v9377_v33 }
 0xc3e   :  { %3728 = vmatprep.subr.mxu0 %v9371_v20  ;;  %5823 = vmatprep.subr.mxu1 %v10730_v22 }
 0xc3f   :  { %3729 = vmatpush1.msra.mxu0 %v9383_v40  ;;  %5824 = vmatpush3.msra.mxu1 %v9396_v51 }
 0xc40   :  { %3730 = vmatprep.subr.mxu0 %v9390_v52  ;;  %5825 = vmatprep.subr.mxu1 %v10730_v22 }
 0xc41   :  { %3731 = vmatpush1.msra.mxu0 %v9402_v26  ;;  %5826 = vmatpush3.msra.mxu1 %v9415_v41 }
 0xc42   :  { %3732 = vmatprep.subr.mxu0 %v9409_v60  ;;  %5827 = vmatprep.subr.mxu1 %v10730_v22 }
 0xc43   :  { %3733 = vmatpush1.msra.mxu0 %v11159_v3  ;;  %5828 = vmatpush3.msra.mxu1 %v11160_v61 }
 0xc44   :  { %3734 = vmatprep.subr.mxu0 %v11161_v21  ;;  %5829 = vmatprep.subr.mxu1 %v10730_v22 }
 0xc45   :  { %3735 = vmatpush1.msra.mxu0 %v11162_v29  ;;  %5830 = vmatpush3.msra.mxu1 %v11163_v24 }
 0xc46   :  { %3736 = vmatprep.subr.mxu0 %v11164_v27  ;;  %5831 = vmatprep.subr.mxu1 %v10730_v22 }
 0xc47   :  { %3737 = vmatpush1.msra.mxu0 %v11165_v39  ;;  %3770 = vmatprep.mubr.f32.mxu0 %v10730_v22 }
 0xc48   :  { %5832 = vmatpush3.msra.mxu1 %v11166_v28  ;;  %5833 = vmatprep.mubr.msk.f32.mxu1 %vm6421_vm0, %v10730_v22 }
 0xc49   :  { %3872 = vmatprep.subr.mxu0 %v9820_v56  ;;  %5836 = vmatprep.subr.mxu1 %v10730_v22 }
 0xce8   :  { %v3606_v5 = vpop.f32.mrf.mxu0  ;;  %v3677_v10 = vpop.f32.mrf.mxu1 }
 0xce9   :  { %v3607_v4 = vadd.f32 %v3606_v5, %v11141_v14  ;;  %v3678_v43 = vadd.f32 %v3677_v10, %v9578_v30  ;;  %v9841_v10 = vld [vmem:[%s10423_s7 + $0x168] sm:$0xff] }
 0xcea   :  { %v5800_v1 = vpop.f32.mrf.mxu1  ;;  %v3608_v50 = vpop.f32.mrf.mxu0 }
 0xceb   :  { %v3681_v16 = vadd.f32 %v3607_v4, %v1654_v12  ;;  %v3609_v45 = vadd.f32 %v3608_v50, %v11142_v34  ;;  %v9860_v50 = vld [vmem:[%s10423_s7 + $0x150] sm:$0xff] }
 0xced   :  { %v4587_v55 = vmul.f32 -1.442695, %v3681_v16  ;;  %v3682_v44 = vadd.f32 %v3609_v45, %v1656_v62  ;;  %v9847_v16 = vld [vmem:[%s10423_s7 + $0x178] sm:$0xff]  ;;  %v9866_v45 = vld [vmem:[%s10423_s7 + $0x160] sm:$0xff] }
 0xcee   :  { %v9879_v62 = vld [vmem:[%s10423_s7 + $0x138] sm:$0xff] }
 0xcef   :  { %6108 = vpow2.f32 %v4587_v55  ;;  %v4588_v19 = vmul.f32 -1.442695, %v3682_v44  ;;  %v9853_v55 = vld [vmem:[%s10423_s7 + $0x158] sm:$0xff]  ;;  %v9885_v44 = vld [vmem:[%s10423_s7 + $0x148] sm:$0xff] }
 0xcf1   :  { %6110 = vpow2.f32 %v4588_v19  ;;  %v9891_v19 = vld [vmem:[%s10423_s7 + $0x128] sm:$0xff] }
 0xcfc   :  { %v6109_v37 = vpop.eup %6108 }
 0xcfd   :  { %v3689_v36 = vadd.f32 1.0, %v6109_v37  ;;  %v9898_v37 = vld [vmem:[%s10423_s7 + $0x120] sm:$0xff] }
 0xcfe   :  { %v6111_v15 = vpop.eup %6110 }
 0xcff   :  { %6112 = vrcp.f32 %v3689_v36  ;;  %v3690_v17 = vadd.f32 1.0, %v6111_v15  ;;  %v9904_v36 = vld [vmem:[%s10423_s7 + $0x130] sm:$0xff] }
 0xd00   :  { %v9910_v15 = vld [vmem:[%s10423_s7 + $0x110] sm:$0xff] }
 0xd0c   :  { %v6113_v63 = vpop.eup %6112 }
 0xd0d   :  { %v3695_v11 = vmul.f32 %v6113_v63, %v3678_v43  ;;  %v9917_v43 = vld [vmem:[%s10423_s7 + $0x108] sm:$0xff]  ;;  %v9923_v63 = vld [vmem:[%s10423_s7 + $0x118] sm:$0xff] }
 0xd0f   :  { %v3696_v18 = vadd.f32 %v3695_v11, %v1725_v57  ;;  %v9936_v57 = vld [vmem:[%s10423_s7 + $0xf0] sm:$0xff]  ;;  %v9943_v11 = vld [vmem:[%s10423_s7 + $0xe0] sm:$0xff] }
 0xd11   :  { %6114 = vtanh.f32 %v3696_v18  ;;  %v10036_v18 = vld [vmem:[%s10423_s7 + $0xd8] sm:$0xff] }
 0xd12   :  { %6116 = vrcp.f32 %v3690_v17  ;;  %v10042_v17 = vld [vmem:[%s10423_s7 + $0xe8] sm:$0xff] }
 0xd1e   :  { %v6115_v5 = vpop.eup %6114 }
 0xd1f   :  { %v3698_v47 = vsub.f32 %v9748_v13, %v6115_v5  ;;  %v6117_v12 = vpop.eup %6116 }
 0xd21   :  { %v3699_v4 = vmul.f32 %v6117_v12, %v3698_v47  ;;  %v10055_v47 = vld [vmem:[%s10423_s7 + $0xc0] sm:$0xff]  ;;  %v10061_v12 = vld [vmem:[%s10423_s7 + $0xd0] sm:$0xff] }
 0xd23   :  { %v9834_v1 = vadd.f32 %v6115_v5, %v3699_v4  ;;  %v10048_v5 = vld [vmem:[%s10423_s7 + $0xc8] sm:$0xff]  ;;  %v10067_v4 = vld [vmem:[%s10423_s7 + $0xb0] sm:$0xff] }
 0xd25   :  { %11170 = vst [vmem:[#allocation31_spill] sm:$0xff] %v9834_v1  ;;  %3771 = vmatmul.mubr.f32.vlgmr.msra.gmra.mxu0 %v9834_v1  ;;  %5834 = vmatmul.mubr.f32.vlgmr.msra.gmra.mxu1 %v9834_v1 }
 0xd26   :  { %3873 = vmatpush1.msra.mxu0 %v9841_v10  ;;  %5837 = vmatpush3.msra.mxu1 %v9847_v16 }
 0xd27   :  { %3874 = vmatprep.subr.mxu0 %v9853_v55  ;;  %5838 = vmatprep.subr.mxu1 %v10730_v22 }
 0xd28   :  { %3875 = vmatpush1.msra.mxu0 %v9860_v50  ;;  %5839 = vmatpush3.msra.mxu1 %v9866_v45 }
 0xd29   :  { %3876 = vmatprep.subr.mxu0 %v9872_v53  ;;  %5840 = vmatprep.subr.mxu1 %v10730_v22 }
 0xd2a   :  { %3877 = vmatpush1.msra.mxu0 %v9879_v62  ;;  %5841 = vmatpush3.msra.mxu1 %v9885_v44 }
 0xd2b   :  { %3878 = vmatprep.subr.mxu0 %v9891_v19  ;;  %5842 = vmatprep.subr.mxu1 %v10730_v22 }
 0xd2c   :  { %3879 = vmatpush1.msra.mxu0 %v9898_v37  ;;  %5843 = vmatpush3.msra.mxu1 %v9904_v36 }
 0xd2d   :  { %3880 = vmatprep.subr.mxu0 %v9910_v15  ;;  %5844 = vmatprep.subr.mxu1 %v10730_v22 }
 0xd2e   :  { %3881 = vmatpush1.msra.mxu0 %v9917_v43  ;;  %5845 = vmatpush3.msra.mxu1 %v9923_v63 }
 0xd2f   :  { %3882 = vmatprep.subr.mxu0 %v9929_v31  ;;  %5846 = vmatprep.subr.mxu1 %v10730_v22 }
 0xd30   :  { %3883 = vmatpush1.msra.mxu0 %v9936_v57  ;;  %5847 = vmatpush3.msra.mxu1 %v9282_v58 }
 0xd31   :  { %3884 = vmatprep.subr.mxu0 %v9943_v11  ;;  %5848 = vmatprep.subr.mxu1 %v10730_v22 }
 0xd32   :  { %3885 = vmatpush1.msra.mxu0 %v9288_v2  ;;  %5849 = vmatpush3.msra.mxu1 %v9301_v6 }
 0xd33   :  { %3886 = vmatprep.subr.mxu0 %v9295_v54  ;;  %5850 = vmatprep.subr.mxu1 %v10730_v22  ;;  %v11171_v54 = vld [vmem:[#allocation73_spill] sm:$0xff] }
 0xd34   :  { %3887 = vmatpush1.msra.mxu0 %v9307_v46  ;;  %5851 = vmatpush3.msra.mxu1 %v9320_v38  ;;  %v1965_v6 = vadd.f32 %v11171_v54, %v11139_v35  ;;  %v10086_v54 = vld [vmem:[%s10423_s7 + $0x98] sm:$0xff] }
 0xd35   :  { %3888 = vmatprep.subr.mxu0 %v9314_v7  ;;  %5852 = vmatprep.subr.mxu1 %v10730_v22 }
 0xd36   :  { %3889 = vmatpush1.msra.mxu0 %v9326_v8  ;;  %5853 = vmatpush3.msra.mxu1 %v9339_v9 }
 0xd37   :  { %3890 = vmatprep.subr.mxu0 %v9333_v48  ;;  %5854 = vmatprep.subr.mxu1 %v10730_v22 }
 0xd38   :  { %3891 = vmatpush1.msra.mxu0 %v9345_v0  ;;  %5855 = vmatpush3.msra.mxu1 %v9358_v25  ;;  %v11172_v0 = vld [vmem:[#allocation86_spill] sm:$0xff] }
 0xd39   :  { %3892 = vmatprep.subr.mxu0 %v9352_v42  ;;  %5856 = vmatprep.subr.mxu1 %v10730_v22  ;;  %v1967_v42 = vadd.f32 %v11172_v0, %v9572_v49  ;;  %v10137_v0 = vld [vmem:[%s10423_s7 + $0x70] sm:$0xff] }
 0xd3a   :  { %3893 = vmatpush1.msra.mxu0 %v9364_v32  ;;  %5857 = vmatpush3.msra.mxu1 %v9377_v33 }
 0xd3b   :  { %3894 = vmatprep.subr.mxu0 %v9371_v20  ;;  %5858 = vmatprep.subr.mxu1 %v10730_v22 }
 0xd3c   :  { %3895 = vmatpush1.msra.mxu0 %v9383_v40  ;;  %5859 = vmatpush3.msra.mxu1 %v9396_v51 }
 0xd3d   :  { %3896 = vmatprep.subr.mxu0 %v9390_v52  ;;  %5860 = vmatprep.subr.mxu1 %v10730_v22 }
 0xd3e   :  { %3897 = vmatpush1.msra.mxu0 %v9402_v26  ;;  %5861 = vmatpush3.msra.mxu1 %v9415_v41  ;;  %v11173_v26 = vld [vmem:[#allocation72_spill] sm:$0xff] }
 0xd3f   :  { %3898 = vmatprep.subr.mxu0 %v9409_v60  ;;  %5862 = vmatprep.subr.mxu1 %v10730_v22  ;;  %v2036_v60 = vadd.f32 %v11173_v26, %v9581_v59  ;;  %v10194_v26 = vld [vmem:[%s10423_s7 + $0x28] sm:$0xff] }
 0xd40   :  { %3899 = vmatpush1.msra.mxu0 %v11159_v3  ;;  %5863 = vmatpush3.msra.mxu1 %v11160_v61  ;;  %11178 = vst [vmem:[#allocation36_spill] sm:$0xff] %v10194_v26 }
 0xd41   :  { %3900 = vmatprep.subr.mxu0 %v11161_v21  ;;  %5864 = vmatprep.subr.mxu1 %v10730_v22 }
 0xd42   :  { %3901 = vmatpush1.msra.mxu0 %v11162_v29  ;;  %5865 = vmatpush3.msra.mxu1 %v11163_v24 }
 0xd43   :  { %3902 = vmatprep.subr.mxu0 %v11164_v27  ;;  %5866 = vmatprep.subr.mxu1 %v10730_v22 }
 0xd44   :  { %3903 = vmatpush1.msra.mxu0 %v11165_v39  ;;  %3936 = vmatprep.mubr.f32.mxu0 %v10730_v22 }
 0xd45   :  { %5867 = vmatpush3.msra.mxu1 %v11166_v28  ;;  %5868 = vmatprep.mubr.msk.f32.mxu1 %vm6421_vm0, %v10730_v22  ;;  %v10028_v28 = vld [vmem:[%s10423_s7 + $0x100] sm:$0xff] }
 0xd46   :  { %4038 = vmatprep.subr.mxu0 %v9820_v56  ;;  %5871 = vmatprep.subr.mxu1 %v10730_v22 }
 0xde5   :  { %v3772_v58 = vpop.f32.mrf.mxu0  ;;  %v3843_v2 = vpop.f32.mrf.mxu1 }
 0xde6   :  { %v3773_v46 = vadd.f32 %v3772_v58, %v11141_v14  ;;  %v3844_v52 = vadd.f32 %v3843_v2, %v9578_v30  ;;  %v10074_v58 = vld [vmem:[%s10423_s7 + $0xa8] sm:$0xff]  ;;  %v10080_v2 = vld [vmem:[%s10423_s7 + $0xb8] sm:$0xff] }
 0xde7   :  { %v5835_v7 = vpop.f32.mrf.mxu1  ;;  %v3774_v48 = vpop.f32.mrf.mxu0 }
 0xde8   :  { %v3847_v38 = vadd.f32 %v3773_v46, %v1965_v6  ;;  %v3775_v9 = vadd.f32 %v3774_v48, %v11142_v34  ;;  %v10093_v6 = vld [vmem:[%s10423_s7 + $0x90] sm:$0xff]  ;;  %v10099_v46 = vld [vmem:[%s10423_s7 + $0xa0] sm:$0xff]  ;;  %v10124_v48 = vld [vmem:[%s10423_s7 + $0x68] sm:$0xff] }
 0xde9   :  { %v10105_v7 = vld [vmem:[%s10423_s7 + $0x80] sm:$0xff] }
 0xdea   :  { %v4589_v8 = vmul.f32 -1.442695, %v3847_v38  ;;  %v3848_v25 = vadd.f32 %v3775_v9, %v1967_v42  ;;  %v10112_v38 = vld [vmem:[%s10423_s7 + $0x78] sm:$0xff]  ;;  %v10131_v9 = vld [vmem:[%s10423_s7 + $0x60] sm:$0xff]  ;;  %v10143_v42 = vld [vmem:[%s10423_s7 + $0x50] sm:$0xff] }
 0xdec   :  { %6118 = vpow2.f32 %v4589_v8  ;;  %v4590_v32 = vmul.f32 -1.442695, %v3848_v25  ;;  %v10118_v8 = vld [vmem:[%s10423_s7 + $0x88] sm:$0xff] }
 0xded   :  { %v10150_v25 = vld [vmem:[%s10423_s7 + $0x48] sm:$0xff] }
 0xdee   :  { %6120 = vpow2.f32 %v4590_v32  ;;  %v10156_v32 = vld [vmem:[%s10423_s7 + $0x58] sm:$0xff] }
 0xdf9   :  { %v6119_v20 = vpop.eup %6118 }
 0xdfa   :  { %v3855_v33 = vadd.f32 1.0, %v6119_v20  ;;  %v10162_v20 = vld [vmem:[%s10423_s7 + $0x38] sm:$0xff] }
 0xdfb   :  { %v6121_v40 = vpop.eup %6120 }
 0xdfc   :  { %6122 = vrcp.f32 %v3855_v33  ;;  %v3856_v61 = vadd.f32 1.0, %v6121_v40  ;;  %v10169_v33 = vld [vmem:[%s10423_s7 + $0x30] sm:$0xff]  ;;  %v10175_v40 = vld [vmem:[%s10423_s7 + $0x40] sm:$0xff] }
 0xdfd   :  { %11174 = vst [vmem:[#allocation32_spill] sm:$0xff] %v10169_v33  ;;  %11175 = vst [vmem:[#allocation33_spill] sm:$0xff] %v10175_v40 }
 0xe09   :  { %v6123_v51 = vpop.eup %6122 }
 0xe0a   :  { %v3861_v41 = vmul.f32 %v6123_v51, %v3844_v52  ;;  %v10181_v52 = vld [vmem:[%s10423_s7 + $0x20] sm:$0xff]  ;;  %v10188_v51 = vld [vmem:[%s10423_s7 + $0x18] sm:$0xff] }
 0xe0b   :  { %11176 = vst [vmem:[#allocation34_spill] sm:$0xff] %v10181_v52  ;;  %11177 = vst [vmem:[#allocation35_spill] sm:$0xff] %v10188_v51 }
 0xe0c   :  { %v3862_v3 = vadd.f32 %v3861_v41, %v2036_v60  ;;  %v10200_v60 = vld [vmem:[%s10423_s7 + $0x8] sm:$0xff]  ;;  %v10207_v41 = vld [vmem:[%s10423_s7] sm:$0xff] }
 0xe0d   :  { %11179 = vst [vmem:[#allocation37_spill] sm:$0xff] %v10200_v60  ;;  %11180 = vst [vmem:[#allocation38_spill] sm:$0xff] %v10207_v41 }
 0xe0e   :  { %6124 = vtanh.f32 %v3862_v3  ;;  %v10214_v3 = vld [vmem:[%s10423_s7 + $0x10] sm:$0xff] }
 0xe0f   :  { %6126 = vrcp.f32 %v3856_v61  ;;  %11181 = vst [vmem:[#allocation39_spill] sm:$0xff] %v10214_v3 }
 0xe1b   :  { %v6125_v21 = vpop.eup %6124 }
 0xe1c   :  { %v3864_v29 = vsub.f32 %v9834_v1, %v6125_v21  ;;  %v6127_v24 = vpop.eup %6126 }
 0xe1e   :  { %v3865_v27 = vmul.f32 %v6127_v24, %v3864_v29  ;;  %v11182_v29 = vld [vmem:[#allocation16_spill] sm:$0xff] }
 0xe1f   :  { %v2276_v24 = vadd.f32 %v11182_v29, %v11139_v35 }
 0xe20   :  { %v10000_v39 = vadd.f32 %v6125_v21, %v3865_v27 }
 0xe22   :  { %3937 = vmatmul.mubr.f32.vlgmr.msra.gmra.mxu0 %v10000_v39  ;;  %5869 = vmatmul.mubr.f32.vlgmr.msra.gmra.mxu1 %v10000_v39 }
 0xe23   :  { %4039 = vmatpush1.msra.mxu0 %v9841_v10  ;;  %5872 = vmatpush3.msra.mxu1 %v9847_v16 }
 0xe24   :  { %4040 = vmatprep.subr.mxu0 %v9853_v55  ;;  %5873 = vmatprep.subr.mxu1 %v10730_v22 }
 0xe25   :  { %4041 = vmatpush1.msra.mxu0 %v9860_v50  ;;  %5874 = vmatpush3.msra.mxu1 %v9866_v45 }
 0xe26   :  { %4042 = vmatprep.subr.mxu0 %v9872_v53  ;;  %5875 = vmatprep.subr.mxu1 %v10730_v22 }
 0xe27   :  { %4043 = vmatpush1.msra.mxu0 %v9879_v62  ;;  %5876 = vmatpush3.msra.mxu1 %v9885_v44 }
 0xe28   :  { %4044 = vmatprep.subr.mxu0 %v9891_v19  ;;  %5877 = vmatprep.subr.mxu1 %v10730_v22 }
 0xe29   :  { %4045 = vmatpush1.msra.mxu0 %v9898_v37  ;;  %5878 = vmatpush3.msra.mxu1 %v9904_v36 }
 0xe2a   :  { %4046 = vmatprep.subr.mxu0 %v9910_v15  ;;  %5879 = vmatprep.subr.mxu1 %v10730_v22 }
 0xe2b   :  { %4047 = vmatpush1.msra.mxu0 %v9917_v43  ;;  %5880 = vmatpush3.msra.mxu1 %v9923_v63 }
 0xe2c   :  { %4048 = vmatprep.subr.mxu0 %v9929_v31  ;;  %5881 = vmatprep.subr.mxu1 %v10730_v22 }
 0xe2d   :  { %4049 = vmatpush1.msra.mxu0 %v9936_v57  ;;  %5882 = vmatpush3.msra.mxu1 %v10028_v28 }
 0xe2e   :  { %4050 = vmatprep.subr.mxu0 %v9943_v11  ;;  %5883 = vmatprep.subr.mxu1 %v10730_v22 }
 0xe2f   :  { %4051 = vmatpush1.msra.mxu0 %v10036_v18  ;;  %5884 = vmatpush3.msra.mxu1 %v10042_v17 }
 0xe30   :  { %4052 = vmatprep.subr.mxu0 %v10048_v5  ;;  %5885 = vmatprep.subr.mxu1 %v10730_v22 }
 0xe31   :  { %4053 = vmatpush1.msra.mxu0 %v10055_v47  ;;  %5886 = vmatpush3.msra.mxu1 %v10061_v12 }
 0xe32   :  { %4054 = vmatprep.subr.mxu0 %v10067_v4  ;;  %5887 = vmatprep.subr.mxu1 %v10730_v22 }
 0xe33   :  { %4055 = vmatpush1.msra.mxu0 %v10074_v58  ;;  %5888 = vmatpush3.msra.mxu1 %v10080_v2 }
 0xe34   :  { %4056 = vmatprep.subr.mxu0 %v10086_v54  ;;  %5889 = vmatprep.subr.mxu1 %v10730_v22 }
 0xe35   :  { %4057 = vmatpush1.msra.mxu0 %v10093_v6  ;;  %5890 = vmatpush3.msra.mxu1 %v10099_v46 }
 0xe36   :  { %4058 = vmatprep.subr.mxu0 %v10105_v7  ;;  %5891 = vmatprep.subr.mxu1 %v10730_v22 }
 0xe37   :  { %4059 = vmatpush1.msra.mxu0 %v10112_v38  ;;  %5892 = vmatpush3.msra.mxu1 %v10118_v8 }
 0xe38   :  { %4060 = vmatprep.subr.mxu0 %v10124_v48  ;;  %5893 = vmatprep.subr.mxu1 %v10730_v22 }
 0xe39   :  { %4061 = vmatpush1.msra.mxu0 %v10131_v9  ;;  %5894 = vmatpush3.msra.mxu1 %v10137_v0 }
 0xe3a   :  { %4062 = vmatprep.subr.mxu0 %v10143_v42  ;;  %5895 = vmatprep.subr.mxu1 %v10730_v22 }
 0xe3b   :  { %4063 = vmatpush1.msra.mxu0 %v10150_v25  ;;  %5896 = vmatpush3.msra.mxu1 %v10156_v32 }
 0xe3c   :  { %4064 = vmatprep.subr.mxu0 %v10162_v20  ;;  %5897 = vmatprep.subr.mxu1 %v10730_v22 }
 0xe3d   :  { %4065 = vmatpush1.msra.mxu0 %v10169_v33  ;;  %5898 = vmatpush3.msra.mxu1 %v10175_v40 }
 0xe3e   :  { %4066 = vmatprep.subr.mxu0 %v10181_v52  ;;  %5899 = vmatprep.subr.mxu1 %v10730_v22 }
 0xe3f   :  { %4067 = vmatpush1.msra.mxu0 %v10188_v51  ;;  %5900 = vmatpush3.msra.mxu1 %v10194_v26 }
 0xe40   :  { %4068 = vmatprep.subr.mxu0 %v10200_v60  ;;  %5901 = vmatprep.subr.mxu1 %v10730_v22  ;;  %v11183_v60 = vld [vmem:[#allocation17_spill] sm:$0xff] }
 0xe41   :  { %4069 = vmatpush1.msra.mxu0 %v10207_v41  ;;  %4102 = vmatprep.mubr.f32.mxu0 %v10730_v22  ;;  %v2278_v26 = vadd.f32 %v11183_v60, %v9572_v49 }
 0xe42   :  { %5902 = vmatpush3.msra.mxu1 %v10214_v3  ;;  %5903 = vmatprep.mubr.msk.f32.mxu1 %vm6421_vm0, %v10730_v22 }
 0xe43   :  { %4204 = vmatprep.subr.mxu0 %v9820_v56  ;;  %5906 = vmatprep.subr.mxu1 %v10730_v22 }
 0xee2   :  { %v3938_v61 = vpop.f32.mrf.mxu0  ;;  %v4009_v21 = vpop.f32.mrf.mxu1 }
 0xee3   :  { %v3939_v27 = vadd.f32 %v3938_v61, %v11141_v14  ;;  %v4010_v29 = vadd.f32 %v4009_v21, %v9578_v30  ;;  %v4460_v21 = vld [vmem:[%s10426_s10 + $0x50] sm:$0xff] }
 0xee4   :  { %v5870_v23 = vpop.f32.mrf.mxu1  ;;  %v3940_v41 = vpop.f32.mrf.mxu0 }
 0xee5   :  { %v4013_v13 = vadd.f32 %v3939_v27, %v2276_v24  ;;  %v3941_v3 = vadd.f32 %v3940_v41, %v11142_v34  ;;  %v11184_v23 = vld [vmem:[#allocation15_spill] sm:$0xff] }
 0xee7   :  { %v4591_v1 = vmul.f32 -1.442695, %v4013_v13  ;;  %v4014_v56 = vadd.f32 %v3941_v3, %v2278_v26  ;;  %v2347_v13 = vadd.f32 %v11184_v23, %v9581_v59  ;;  %v4456_v23 = vld [vmem:[%s10426_s10 + $0x30] sm:$0xff] }
 0xee9   :  { %6128 = vpow2.f32 %v4591_v1  ;;  %v4592_v51 = vmul.f32 -1.442695, %v4014_v56  ;;  %v4459_v56 = vld [vmem:[%s10426_s10 + $0x48] sm:$0xff] }
 0xeeb   :  { %6130 = vpow2.f32 %v4592_v51  ;;  %v4461_v51 = vld [vmem:[%s10426_s10 + $0x58] sm:$0xff] }
 0xef6   :  { %v6129_v52 = vpop.eup %6128 }
 0xef7   :  { %v4021_v40 = vadd.f32 1.0, %v6129_v52 }
 0xef8   :  { %v6131_v33 = vpop.eup %6130 }
 0xef9   :  { %6132 = vrcp.f32 %v4021_v40  ;;  %v4022_v27 = vadd.f32 1.0, %v6131_v33  ;;  %v4463_v33 = vld [vmem:[%s10426_s10 + $0x68] sm:$0xff]  ;;  %v4462_v40 = vld [vmem:[%s10426_s10 + $0x60] sm:$0xff] }
 0xf06   :  { %v6133_v61 = vpop.eup %6132 }
 0xf07   :  { %v4027_v1 = vmul.f32 %v6133_v61, %v4010_v29  ;;  %v4458_v29 = vld [vmem:[%s10426_s10 + $0x40] sm:$0xff]  ;;  %v4457_v61 = vld [vmem:[%s10426_s10 + $0x38] sm:$0xff] }
 0xf09   :  { %v4028_v24 = vadd.f32 %v4027_v1, %v2347_v13  ;;  %v4455_v13 = vld [vmem:[%s10426_s10 + $0x28] sm:$0xff]  ;;  %v4454_v1 = vld [vmem:[%s10426_s10 + $0x20] sm:$0xff] }
 0xf0b   :  { %6134 = vtanh.f32 %v4028_v24  ;;  %v4453_v24 = vld [vmem:[%s10426_s10 + $0x18] sm:$0xff] }
 0xf0c   :  { %6136 = vrcp.f32 %v4022_v27  ;;  %v4452_v27 = vld [vmem:[%s10426_s10 + $0x10] sm:$0xff] }
 0xf18   :  { %v6135_v41 = vpop.eup %6134 }
 0xf19   :  { %v4030_v26 = vsub.f32 %v10000_v39, %v6135_v41  ;;  %v6137_v60 = vpop.eup %6136 }
 0xf1b   :  { %v4031_v3 = vmul.f32 %v6137_v60, %v4030_v26 }
 0xf1d   :  { %v10231_v52 = vadd.f32 %v6135_v41, %v4031_v3  ;;  %v4451_v41 = vld [vmem:[%s10426_s10 + $0x8] sm:$0xff]  ;;  %v11196_v3 = vld [vmem:[#allocation66_spill] sm:$0xff] }
 0xf1f   :  { %4103 = vmatmul.mubr.f32.vlgmr.msra.gmra.mxu0 %v10231_v52  ;;  %5904 = vmatmul.mubr.f32.vlgmr.msra.gmra.mxu1 %v10231_v52 }
 0xf20   :  { %4205 = vmatpush1.msra.mxu0 %v9841_v10  ;;  %5907 = vmatpush3.msra.mxu1 %v9847_v16  ;;  %v11185_v10 = vld [vmem:[#allocation32_spill] sm:$0xff]  ;;  %v11186_v16 = vld [vmem:[#allocation33_spill] sm:$0xff] }
 0xf21   :  { %4206 = vmatprep.subr.mxu0 %v9853_v55  ;;  %5908 = vmatprep.subr.mxu1 %v10730_v22  ;;  %v11187_v55 = vld [vmem:[#allocation34_spill] sm:$0xff] }
 0xf22   :  { %4207 = vmatpush1.msra.mxu0 %v9860_v50  ;;  %5909 = vmatpush3.msra.mxu1 %v9866_v45  ;;  %v11188_v50 = vld [vmem:[#allocation35_spill] sm:$0xff]  ;;  %v11189_v45 = vld [vmem:[#allocation36_spill] sm:$0xff] }
 0xf23   :  { %4208 = vmatprep.subr.mxu0 %v9872_v53  ;;  %5910 = vmatprep.subr.mxu1 %v10730_v22  ;;  %v11190_v53 = vld [vmem:[#allocation37_spill] sm:$0xff] }
 0xf24   :  { %4209 = vmatpush1.msra.mxu0 %v9879_v62  ;;  %5911 = vmatpush3.msra.mxu1 %v9885_v44  ;;  %v11191_v62 = vld [vmem:[#allocation38_spill] sm:$0xff]  ;;  %v11192_v44 = vld [vmem:[#allocation39_spill] sm:$0xff] }
 0xf25   :  { %4210 = vmatprep.subr.mxu0 %v9891_v19  ;;  %5912 = vmatprep.subr.mxu1 %v10730_v22 }
 0xf26   :  { %4211 = vmatpush1.msra.mxu0 %v9898_v37  ;;  %5913 = vmatpush3.msra.mxu1 %v9904_v36  ;;  %v11193_v36 = vld [vmem:[#allocation20_spill] sm:$0xff] }
 0xf27   :  { %4212 = vmatprep.subr.mxu0 %v9910_v15  ;;  %5914 = vmatprep.subr.mxu1 %v10730_v22  ;;  %v2587_v15 = vadd.f32 %v11193_v36, %v11139_v35 }
 0xf28   :  { %4213 = vmatpush1.msra.mxu0 %v9917_v43  ;;  %5915 = vmatpush3.msra.mxu1 %v9923_v63 }
 0xf29   :  { %4214 = vmatprep.subr.mxu0 %v9929_v31  ;;  %5916 = vmatprep.subr.mxu1 %v10730_v22 }
 0xf2a   :  { %4215 = vmatpush1.msra.mxu0 %v9936_v57  ;;  %5917 = vmatpush3.msra.mxu1 %v10028_v28 }
 0xf2b   :  { %4216 = vmatprep.subr.mxu0 %v9943_v11  ;;  %5918 = vmatprep.subr.mxu1 %v10730_v22 }
 0xf2c   :  { %4217 = vmatpush1.msra.mxu0 %v10036_v18  ;;  %5919 = vmatpush3.msra.mxu1 %v10042_v17  ;;  %v11194_v18 = vld [vmem:[#allocation21_spill] sm:$0xff] }
 0xf2d   :  { %4218 = vmatprep.subr.mxu0 %v10048_v5  ;;  %5920 = vmatprep.subr.mxu1 %v10730_v22  ;;  %v2589_v17 = vadd.f32 %v11194_v18, %v9572_v49 }
 0xf2e   :  { %4219 = vmatpush1.msra.mxu0 %v10055_v47  ;;  %5921 = vmatpush3.msra.mxu1 %v10061_v12 }
 0xf2f   :  { %4220 = vmatprep.subr.mxu0 %v10067_v4  ;;  %5922 = vmatprep.subr.mxu1 %v10730_v22 }
 0xf30   :  { %4221 = vmatpush1.msra.mxu0 %v10074_v58  ;;  %5923 = vmatpush3.msra.mxu1 %v10080_v2 }
 0xf31   :  { %4222 = vmatprep.subr.mxu0 %v10086_v54  ;;  %5924 = vmatprep.subr.mxu1 %v10730_v22 }
 0xf32   :  { %4223 = vmatpush1.msra.mxu0 %v10093_v6  ;;  %5925 = vmatpush3.msra.mxu1 %v10099_v46  ;;  %v11195_v6 = vld [vmem:[#allocation19_spill] sm:$0xff] }
 0xf33   :  { %4224 = vmatprep.subr.mxu0 %v10105_v7  ;;  %5926 = vmatprep.subr.mxu1 %v10730_v22  ;;  %v2658_v46 = vadd.f32 %v11195_v6, %v9581_v59 }
 0xf34   :  { %4225 = vmatpush1.msra.mxu0 %v10112_v38  ;;  %5927 = vmatpush3.msra.mxu1 %v10118_v8 }
 0xf35   :  { %4226 = vmatprep.subr.mxu0 %v10124_v48  ;;  %5928 = vmatprep.subr.mxu1 %v10730_v22 }
 0xf36   :  { %4227 = vmatpush1.msra.mxu0 %v10131_v9  ;;  %5929 = vmatpush3.msra.mxu1 %v10137_v0 }
 0xf37   :  { %4228 = vmatprep.subr.mxu0 %v10143_v42  ;;  %5930 = vmatprep.subr.mxu1 %v10730_v22 }
 0xf38   :  { %4229 = vmatpush1.msra.mxu0 %v10150_v25  ;;  %5931 = vmatpush3.msra.mxu1 %v10156_v32  ;;  %v4465_v32 = vld [vmem:[%s10426_s10 + $0x78] sm:$0xff] }
 0xf39   :  { %4230 = vmatprep.subr.mxu0 %v10162_v20  ;;  %5932 = vmatprep.subr.mxu1 %v10730_v22  ;;  %v4464_v20 = vld [vmem:[%s10426_s10 + $0x70] sm:$0xff] }
 0xf3a   :  { %4231 = vmatpush1.msra.mxu0 %v11185_v10  ;;  %5933 = vmatpush3.msra.mxu1 %v11186_v16  ;;  %v2898_v10 = vadd.f32 %v11196_v3, %v11139_v35 }
 0xf3b   :  { %4232 = vmatprep.subr.mxu0 %v11187_v55  ;;  %5934 = vmatprep.subr.mxu1 %v10730_v22 }
 0xf3c   :  { %4233 = vmatpush1.msra.mxu0 %v11188_v50  ;;  %5935 = vmatpush3.msra.mxu1 %v11189_v45 }
 0xf3d   :  { %4234 = vmatprep.subr.mxu0 %v11190_v53  ;;  %5936 = vmatprep.subr.mxu1 %v10730_v22 }
 0xf3e   :  { %4235 = vmatpush1.msra.mxu0 %v11191_v62  ;;  %4268 = vmatprep.mubr.f32.mxu0 %v10730_v22 }
 0xf3f   :  { %5937 = vmatpush3.msra.mxu1 %v11192_v44  ;;  %5938 = vmatprep.mubr.msk.f32.mxu1 %vm6421_vm0, %v10730_v22  ;;  %v11197_v44 = vld [vmem:[#allocation10_spill] sm:$0xff] }
 0xf40   :  { %5941 = vmatprep.subr.mxu0 %v10730_v22  ;;  %5960 = vmatprep.subr.mxu1 %v10730_v22 }
 0xfdf   :  { %v4104_v19 = vpop.f32.mrf.mxu0  ;;  %v4175_v37 = vpop.f32.mrf.mxu1 }
 0xfe0   :  { %v4105_v43 = vadd.f32 %v4104_v19, %v11141_v14  ;;  %v4176_v2 = vadd.f32 %v4175_v37, %v9578_v30  ;;  %v2900_v19 = vadd.f32 %v11197_v44, %v9572_v49 }
 0xfe1   :  { %v5905_v63 = vpop.f32.mrf.mxu1  ;;  %v4106_v11 = vpop.f32.mrf.mxu0 }
 0xfe2   :  { %v4179_v31 = vadd.f32 %v4105_v43, %v2587_v15  ;;  %v4107_v28 = vadd.f32 %v4106_v11, %v11142_v34 }
 0xfe4   :  { %v4593_v57 = vmul.f32 -1.442695, %v4179_v31  ;;  %v4180_v5 = vadd.f32 %v4107_v28, %v2589_v17  ;;  %v11198_v31 = vld [vmem:[#allocation7_spill] sm:$0xff] }
 0xfe6   :  { %6138 = vpow2.f32 %v4593_v57  ;;  %v4594_v47 = vmul.f32 -1.442695, %v4180_v5  ;;  %v2969_v57 = vadd.f32 %v11198_v31, %v9581_v59  ;;  %v11200_v59 = vld [vmem:[#allocation30_spill] sm:$0xff] }
 0xfe8   :  { %6140 = vpow2.f32 %v4594_v47 }
 0xff3   :  { %v6139_v12 = vpop.eup %6138 }
 0xff4   :  { %v4187_v4 = vadd.f32 1.0, %v6139_v12  ;;  %v11201_v12 = vld [vmem:[#allocation85_spill] sm:$0xff] }
 0xff5   :  { %v6141_v58 = vpop.eup %6140 }
 0xff6   :  { %6142 = vrcp.f32 %v4187_v4  ;;  %v4188_v8 = vadd.f32 1.0, %v6141_v58  ;;  %v4450_v4 = vld [vmem:[%s10426_s10] sm:$0xff] }
0x1003   :  { %v6143_v54 = vpop.eup %6142 }
0x1004   :  { %v4193_v7 = vmul.f32 %v6143_v54, %v4176_v2  ;;  %v4598_v54 = vld [vmem:[%s10427_s11] ss:$0 sm:$0xff] }
0x1006   :  { %v4194_v38 = vadd.f32 %v4193_v7, %v2658_v46 }
0x1008   :  { %6144 = vtanh.f32 %v4194_v38 }
0x1009   :  { %6146 = vrcp.f32 %v4188_v8 }
0x1015   :  { %v6145_v48 = vpop.eup %6144 }
0x1016   :  { %v4196_v9 = vsub.f32 %v10231_v52, %v6145_v48  ;;  %v6147_v0 = vpop.eup %6146 }
0x1018   :  { %v4197_v42 = vmul.f32 %v6147_v0, %v4196_v9 }
0x101a   :  { %v10312_v25 = vadd.f32 %v6145_v48, %v4197_v42 }
0x101c   :  { %4269 = vmatmul.mubr.f32.vlgmr.msra.gmra.mxu0 %v10312_v25  ;;  %5939 = vmatmul.mubr.f32.vlgmr.msra.gmra.mxu1 %v10312_v25 }
0x101d   :  { %5957 = vmatprep.mubr.msk.f32.mxu0 %vm6421_vm0, %v10730_v22  ;;  %5992 = vmatprep.mubr.msk.f32.mxu1 %vm6421_vm0, %v10730_v22 }
0x101e   :  { %5961 = vmatpush3.msra.mxu1 %v4465_v32 }
0x101f   :  { %5962 = vmatprep.subr.mxu1 %v10730_v22 }
0x1020   :  { %5963 = vmatpush3.msra.mxu1 %v4464_v20 }
0x1021   :  { %5964 = vmatprep.subr.mxu1 %v10730_v22 }
0x1022   :  { %5965 = vmatpush3.msra.mxu1 %v4463_v33 }
0x1023   :  { %5966 = vmatprep.subr.mxu1 %v10730_v22 }
0x1024   :  { %5967 = vmatpush3.msra.mxu1 %v4462_v40 }
0x1025   :  { %5968 = vmatprep.subr.mxu1 %v10730_v22 }
0x1026   :  { %5969 = vmatpush3.msra.mxu1 %v4461_v51 }
0x1027   :  { %5970 = vmatprep.subr.mxu1 %v10730_v22 }
0x1028   :  { %5971 = vmatpush3.msra.mxu1 %v4460_v21 }
0x1029   :  { %5972 = vmatprep.subr.mxu1 %v10730_v22 }
0x102a   :  { %5973 = vmatpush3.msra.mxu1 %v4459_v56 }
0x102b   :  { %5974 = vmatprep.subr.mxu1 %v10730_v22 }
0x102c   :  { %5975 = vmatpush3.msra.mxu1 %v4458_v29 }
0x102d   :  { %5976 = vmatprep.subr.mxu1 %v10730_v22 }
0x102e   :  { %5977 = vmatpush3.msra.mxu1 %v4457_v61 }
0x102f   :  { %5978 = vmatprep.subr.mxu1 %v10730_v22 }
0x1030   :  { %5979 = vmatpush3.msra.mxu1 %v4456_v23 }
0x1031   :  { %5980 = vmatprep.subr.mxu1 %v10730_v22 }
0x1032   :  { %5981 = vmatpush3.msra.mxu1 %v4455_v13 }
0x1033   :  { %5982 = vmatprep.subr.mxu1 %v10730_v22 }
0x1034   :  { %5983 = vmatpush3.msra.mxu1 %v4454_v1 }
0x1035   :  { %5984 = vmatprep.subr.mxu1 %v10730_v22 }
0x1036   :  { %5985 = vmatpush3.msra.mxu1 %v4453_v24 }
0x1037   :  { %5986 = vmatprep.subr.mxu1 %v10730_v22 }
0x1038   :  { %5987 = vmatpush3.msra.mxu1 %v4452_v27 }
0x1039   :  { %5988 = vmatprep.subr.mxu1 %v10730_v22 }
0x103a   :  { %5989 = vmatpush3.msra.mxu1 %v4451_v41 }
0x103b   :  { %5990 = vmatprep.subr.mxu1 %v10730_v22 }
0x103c   :  { %5991 = vmatpush3.msra.mxu1 %v4450_v4 }
0x10dc   :  { %v4270_v26 = vpop.f32.mrf.mxu0  ;;  %v4341_v60 = vpop.f32.mrf.mxu1 }
0x10dd   :  { %v4271_v16 = vadd.f32 %v4270_v26, %v11141_v14  ;;  %v4342_v35 = vadd.f32 %v4341_v60, %v9578_v30  ;;  %v11199_v30 = vld [vmem:[#allocation31_spill] sm:$0xff] }
0x10de   :  { %v5940_v55 = vpop.f32.mrf.mxu1  ;;  %v4272_v53 = vpop.f32.mrf.mxu0 }
0x10df   :  { %v4345_v50 = vadd.f32 %v4271_v16, %v2898_v10  ;;  %v4273_v62 = vadd.f32 %v4272_v53, %v11142_v34 }
0x10e1   :  { %v4595_v45 = vmul.f32 -1.442695, %v4345_v50  ;;  %v4346_v37 = vadd.f32 %v4273_v62, %v2900_v19 }
0x10e3   :  { %6148 = vpow2.f32 %v4595_v45  ;;  %v4596_v36 = vmul.f32 -1.442695, %v4346_v37 }
0x10e5   :  { %6150 = vpow2.f32 %v4596_v36 }
0x10f0   :  { %v6149_v15 = vpop.eup %6148 }
0x10f1   :  { %v4353_v43 = vadd.f32 1.0, %v6149_v15 }
0x10f2   :  { %v6151_v63 = vpop.eup %6150 }
0x10f3   :  { %6152 = vrcp.f32 %v4353_v43  ;;  %v4354_v18 = vadd.f32 1.0, %v6151_v63 }
0x1100   :  { %v6153_v14 = vpop.eup %6152 }
0x1101   :  { %v4359_v11 = vmul.f32 %v6153_v14, %v4342_v35 }
0x1103   :  { %v4360_v28 = vadd.f32 %v4359_v11, %v2969_v57 }
0x1105   :  { %6154 = vtanh.f32 %v4360_v28 }
0x1106   :  { %6156 = vrcp.f32 %v4354_v18 }
0x1112   :  { %v6155_v34 = vpop.eup %6154 }
0x1113   :  { %v4362_v49 = vsub.f32 %v10312_v25, %v6155_v34  ;;  %v6157_v17 = vpop.eup %6156 }
0x1115   :  { %v4363_v5 = vmul.f32 %v6157_v17, %v4362_v49 }
0x1117   :  { %v4364_v47 = vadd.f32 %v6155_v34, %v4363_v5 }
0x1119   :  { %5942 = vmatpush3.msra.mxu0 %v4364_v47 }
0x111a   :  { %5943 = vmatprep.subr.mxu0 %v10730_v22 }
0x111b   :  { %5944 = vmatpush3.msra.mxu0 %v10312_v25 }
0x111c   :  { %5945 = vmatprep.subr.mxu0 %v10730_v22 }
0x111d   :  { %5946 = vmatpush3.msra.mxu0 %v10231_v52  ;;  %v4367_v52 = vld [vmem:[%s10425_s9] sm:$0xff]  ;;  %s4550_s9 = sshll.u32 %s6422_s6, 4  ;;  %s4551_s9 = int_to_ptr.vmem [resolvable:$true] %s4550_s9 }
0x111e   :  { %5947 = vmatprep.subr.mxu0 %v10730_v22  ;;  %s6398_s8 = scalar_lea.vmem %s4551_s9, 128  ;;  %p6403_p1 = scmp.lt.s32.totalorder %s4551_s9, %s4551_s9 }
0x111f   :  { %5948 = vmatpush3.msra.mxu0 %v10000_v39  ;;  %v11202_v39 = vld [vmem:[#allocation76_spill] sm:$0xff]  ;;  %p6399_p0 = scmp.ne.s32.totalorder %s4551_s9, %s6398_s8  ;;  %p6404_p2 = scmp.lt.s32.totalorder %s6398_s8, %s6398_s8 }
0x1120   :  { %5949 = vmatprep.subr.mxu0 %v10730_v22 }
0x1121   :  { %5950 = vmatpush3.msra.mxu0 %v11199_v30  ;;  %p6405_p3 = por %p6404_p2, %p6403_p1 }
0x1122   :  { %5951 = vmatprep.subr.mxu0 %v10730_v22 }
0x1123   :  { %5952 = vmatpush3.msra.mxu0 %v11200_v59  ;;  %p6406_p4 = pnand %p6405_p3, %p6399_p0 }
0x1124   :  { %5953 = vmatprep.subr.mxu0 %v10730_v22 }
0x1125   :  { %5954 = vmatpush3.msra.mxu0 %v11201_v12 }
0x1126   :  { %5955 = vmatprep.subr.mxu0 %v10730_v22 }
0x1127   :  { %5956 = vmatpush3.msra.mxu0 %v11202_v39 }
0x1128   :  { %5958 = vmatmul.mubr.msk.f32.vlgmr.msra.gmra.mxu0 %vm4376_vm1, %v4367_v52 }
0x11e8   :  { %v4446_v58 = vpop.f32.mrf.mxu0 }
0x11e9   :  { %5993 = vmatmul.mubr.f32.vlgmr.msra.gmra.mxu1 %v4446_v58 }
0x11ea   :  { %v5959_v2 = vpop.f32.mrf.mxu0 }
0x12a9   :  { %v4539_v6 = vpop.f32.mrf.mxu1 }
0x12aa   :  { %v4540_v46 = vadd.f32 %v4598_v54, %v4539_v6 }
0x12ab   :  { %v5994_v22 = vpop.f32.mrf.mxu1 }
0x12ac   :  { %4543 = vst [vmem:[#allocation4] sm:$0xff] %v4540_v46 }
0x12ad   :  { %6409 = shalt.err (!%p6406_p4)
}
0x12ae   :  { %4553 = dma.vmem_to_hbm [thread:$0]  %s4551_s9, 128, %s10428_s12, [#allocation5]  }
0x12af   :  { %6418 = dma.done.wait [#allocation5], 128  }
0x12b0   :  { %6419 = vsyncadd [#allocation5], 4294967168 }
0x12b1   :  { %4557 = vsyncpa [#allocation5], 1 }

</bundles_post_ra>
